<compile_context>
chip_gen: v6e
topology: v6e:2x2x1
jax: 0.10.0
libtpu: 0.0.40
codegen_flags: <defaults>
</compile_context>

<pallas_src>
import functools

import jax
import jax.numpy as jnp
from jax.experimental import pallas as pl
from jax.experimental.pallas import tpu as pltpu

IN_DIM = 784
HID_DIM = 512
NUM_CLASS = 10

IN_PAD = 896     # 7 * 128, lane-dense feature dim
C_PAD = 128      # lane-dense class dim (column NUM_CLASS carries the loss)
NEG_BIG = -1e30  # mask value for padded logit columns


def _round_up(x, m):
    return ((x + m - 1) // m) * m


def mnist_kernel(x_ref, lbl_ref,
                 w0a_ref, b0a_ref, w0b_ref, b0b_ref,
                 w1a_ref, b1a_ref, w1b_ref, b1b_ref,
                 out_ref, *, num_class):
    x_bf = x_ref[...]                                   # (TB, IN_PAD) bf16
    x_f32 = x_bf.astype(jnp.float32)

    # layer0: Linear(784,512) -> ReLU -> Linear(512,784), residual add (f32)
    h0 = jnp.dot(x_bf, w0a_ref[...],
                 preferred_element_type=jnp.float32) + b0a_ref[...]
    h0 = jnp.maximum(h0, 0.0).astype(jnp.bfloat16)      # (TB, 512)
    r0 = jnp.dot(h0, w0b_ref[...],
                 preferred_element_type=jnp.float32) + b0b_ref[...]
    x1 = (x_f32 + r0).astype(jnp.bfloat16)              # (TB, IN_PAD)

    # layer: Linear(784,512) -> ReLU -> Linear(512,C_PAD)
    h1 = jnp.dot(x1, w1a_ref[...],
                 preferred_element_type=jnp.float32) + b1a_ref[...]
    h1 = jnp.maximum(h1, 0.0).astype(jnp.bfloat16)      # (TB, 512)
    logits = jnp.dot(h1, w1b_ref[...],
                     preferred_element_type=jnp.float32) + b1b_ref[...]

    # cross-entropy per example (padded class columns masked out)
    col = jax.lax.broadcasted_iota(jnp.int32, logits.shape, 1)   # (TB, C_PAD)
    masked = jnp.where(col < num_class, logits, NEG_BIG)
    m = jnp.max(masked, axis=-1, keepdims=True)                  # (TB, 1)
    lse = jnp.log(jnp.sum(jnp.exp(masked - m), axis=-1, keepdims=True)) + m
    correct = jnp.sum(jnp.where(col == lbl_ref[...], logits, 0.0),
                      axis=-1, keepdims=True)                    # (TB, 1)
    per_ex = lse - correct                                       # (TB, 1)

    # single lane-dense store: real logits in cols [0,num_class),
    # per-example loss folded into padded column `num_class`.
    out_ref[...] = jnp.where(col == num_class, per_ex, logits)


@functools.partial(jax.jit, static_argnames=("num_class",))
def mnist_forward(images, labels, params, num_class=NUM_CLASS):
    assert num_class < C_PAD  # need one spare padded column for the loss
    B = images.shape[0]
    x = images.reshape(B, -1).astype(jnp.bfloat16)               # (B, 784) bf16
    in_dim = x.shape[1]

    # Batch tile: up to 512 rows (v5e-safe).  For 256 < B <= 1024 split into
    # exactly two tiles so both v7x TensorCores get work on the parallel axis.
    if B <= 256:
        TB = _round_up(B, 8)
    elif B <= 1024:
        TB = _round_up(-(-B // 2), 8)
    else:
        TB = 512
    B_pad = _round_up(B, TB)
    nb = B_pad // TB

    # Single fused pad of the bf16 input (zeros contribute 0 to every dot).
    x_pad = jnp.pad(x, ((0, B_pad - B), (0, IN_PAD - in_dim)))
    lbl = jnp.pad(labels.astype(jnp.int32)[:, None], ((0, B_pad - B), (0, 0)))

    stream2d = lambda w: pl.BlockSpec((TB, w), lambda i: (i, 0))
    resident = lambda shape: pl.BlockSpec(shape, lambda i: (0, 0))

    out = pl.pallas_call(
        functools.partial(mnist_kernel, num_class=num_class),
        out_shape=jax.ShapeDtypeStruct((B_pad, C_PAD), jnp.float32),
        grid=(nb,),
        in_specs=[
            stream2d(IN_PAD),                    # x block (streamed)
            stream2d(1),                         # labels block (streamed)
            resident((IN_PAD, HID_DIM)),         # w0a (bf16, resident)
            resident((1, HID_DIM)),              # b0a
            resident((HID_DIM, IN_PAD)),         # w0b
            resident((1, IN_PAD)),               # b0b
            resident((IN_PAD, HID_DIM)),         # w1a
            resident((1, HID_DIM)),              # b1a
            resident((HID_DIM, C_PAD)),          # w1b
            resident((1, C_PAD)),                # b1b
        ],
        out_specs=stream2d(C_PAD),               # logits + folded loss column
        compiler_params=pltpu.CompilerParams(
            dimension_semantics=("parallel",),
            vmem_limit_bytes=48 * 1024 * 1024,
        ),
    )(x_pad, lbl,
      params["w0a"], params["b0a"], params["w0b"], params["b0b"],
      params["w1a"], params["b1a"], params["w1b"], params["b1b"])

    logits = out[:B, :num_class]
    loss = jnp.sum(out[:B, num_class]) / B                       # mean over real rows
    return logits, loss


def init_params(key, num_class=NUM_CLASS):
    """nn.Linear-style U(-1/sqrt(fan_in), ...) init; weights stored bf16,
    zero-padded to lane-dense shapes; biases kept f32."""
    ks = jax.random.split(key, 8)

    def lin(kw, kb, fan_in, fan_out, pad_in, pad_out):
        bound = 1.0 / jnp.sqrt(fan_in)
        w = jax.random.uniform(kw, (fan_in, fan_out), jnp.float32, -bound, bound)
        b = jax.random.uniform(kb, (1, fan_out), jnp.float32, -bound, bound)
        w_pad = jnp.zeros((pad_in, pad_out), jnp.bfloat16)
        w_pad = w_pad.at[:fan_in, :fan_out].set(w.astype(jnp.bfloat16))
        b_pad = jnp.zeros((1, pad_out), jnp.float32).at[:, :fan_out].set(b)
        return w_pad, b_pad

    w0a, b0a = lin(ks[0], ks[1], IN_DIM, HID_DIM, IN_PAD, HID_DIM)
    w0b, b0b = lin(ks[2], ks[3], HID_DIM, IN_DIM, HID_DIM, IN_PAD)
    w1a, b1a = lin(ks[4], ks[5], IN_DIM, HID_DIM, IN_PAD, HID_DIM)
    w1b, b1b = lin(ks[6], ks[7], HID_DIM, num_class, HID_DIM, C_PAD)
    return dict(w0a=w0a, b0a=b0a, w0b=w0b, b0b=b0b,
                w1a=w1a, b1a=b1a, w1b=w1b, b1b=b1b)


if __name__ == "__main__":
    key = jax.random.PRNGKey(0)
    k_img, k_lbl, k_par = jax.random.split(key, 3)

    B = 8  # tiny demo batch; real training batches use the 512-row tiles
    images = jax.random.normal(k_img, (B, 1, 28, 28), dtype=jnp.float32)  # NCHW
    labels = jax.random.randint(k_lbl, (B,), 0, NUM_CLASS, dtype=jnp.int32)
    params = init_params(k_par, NUM_CLASS)

    logits, loss = mnist_forward(images, labels, params)
    jax.block_until_ready((logits, loss))

    # pure-JAX reference using the same bf16 weights / f32 accumulation
    w0a = params["w0a"][:IN_DIM, :HID_DIM]; b0a = params["b0a"][:, :HID_DIM]
    w0b = params["w0b"][:HID_DIM, :IN_DIM]; b0b = params["b0b"][:, :IN_DIM]
    w1a = params["w1a"][:IN_DIM, :HID_DIM]; b1a = params["b1a"][:, :HID_DIM]
    w1b = params["w1b"][:HID_DIM, :NUM_CLASS]; b1b = params["b1b"][:, :NUM_CLASS]

    xb = images.reshape(B, -1).astype(jnp.bfloat16)
    h0 = jnp.maximum(jnp.dot(xb, w0a, preferred_element_type=jnp.float32) + b0a, 0.0)
    r0 = jnp.dot(h0.astype(jnp.bfloat16), w0b, preferred_element_type=jnp.float32) + b0b
    x1 = (xb.astype(jnp.float32) + r0).astype(jnp.bfloat16)
    h1 = jnp.maximum(jnp.dot(x1, w1a, preferred_element_type=jnp.float32) + b1a, 0.0)
    ref_logits = jnp.dot(h1.astype(jnp.bfloat16), w1b,
                         preferred_element_type=jnp.float32) + b1b
    ref_loss = jnp.mean(
        jax.nn.logsumexp(ref_logits, axis=-1)
        - jnp.take_along_axis(ref_logits, labels[:, None], axis=-1)[:, 0]
    )

    assert jnp.allclose(logits, ref_logits, atol=5e-3, rtol=5e-3), \
        float(jnp.max(jnp.abs(logits - ref_logits)))
    assert jnp.allclose(loss, ref_loss, atol=5e-3, rtol=5e-3), \
        (float(loss), float(ref_loss))

    print("KERNEL_OK")
</pallas_src>

<mosaic_0001>
module attributes {stable_mosaic.version = 11 : i64} {
  func.func @mnist_kernel(%arg0: i32, %arg1: memref<8x896xbf16, #tpu.memory_space<vmem>>, %arg2: memref<8x1xi32, #tpu.memory_space<vmem>>, %arg3: memref<896x512xbf16, #tpu.memory_space<vmem>>, %arg4: memref<1x512xf32, #tpu.memory_space<vmem>>, %arg5: memref<512x896xbf16, #tpu.memory_space<vmem>>, %arg6: memref<1x896xf32, #tpu.memory_space<vmem>>, %arg7: memref<896x512xbf16, #tpu.memory_space<vmem>>, %arg8: memref<1x512xf32, #tpu.memory_space<vmem>>, %arg9: memref<512x128xbf16, #tpu.memory_space<vmem>>, %arg10: memref<1x128xf32, #tpu.memory_space<vmem>>, %arg11: memref<8x128xf32, #tpu.memory_space<vmem>>) attributes {dimension_semantics = [#tpu.dimension_semantics<parallel>], iteration_bounds = array<i64: 1>, scalar_prefetch = 0 : i64, scratch_operands = 0 : i64, tpu.core_type = #tpu.core_type<tc>, window_params = [{transform_indices = @transform_0, window_bounds = array<i64: 8, 896>}, {transform_indices = @transform_1, window_bounds = array<i64: 8, 1>}, {pipeline_mode = #tpu.pipeline_mode<synchronous>, transform_indices = @transform_2, window_bounds = array<i64: 896, 512>}, {pipeline_mode = #tpu.pipeline_mode<synchronous>, transform_indices = @transform_3, window_bounds = array<i64: 1, 512>}, {pipeline_mode = #tpu.pipeline_mode<synchronous>, transform_indices = @transform_4, window_bounds = array<i64: 512, 896>}, {pipeline_mode = #tpu.pipeline_mode<synchronous>, transform_indices = @transform_5, window_bounds = array<i64: 1, 896>}, {pipeline_mode = #tpu.pipeline_mode<synchronous>, transform_indices = @transform_6, window_bounds = array<i64: 896, 512>}, {pipeline_mode = #tpu.pipeline_mode<synchronous>, transform_indices = @transform_7, window_bounds = array<i64: 1, 512>}, {pipeline_mode = #tpu.pipeline_mode<synchronous>, transform_indices = @transform_8, window_bounds = array<i64: 512, 128>}, {pipeline_mode = #tpu.pipeline_mode<synchronous>, transform_indices = @transform_9, window_bounds = array<i64: 1, 128>}, {transform_indices = @transform_10, window_bounds = array<i64: 8, 128>}]} {
    %c0 = arith.constant 0 : index
    %c0_0 = arith.constant 0 : index
    %0 = vector.load %arg1[%c0, %c0_0] : memref<8x896xbf16, #tpu.memory_space<vmem>>, vector<8x896xbf16>
    %1 = arith.extf %0 : vector<8x896xbf16> to vector<8x896xf32>
    %c0_1 = arith.constant 0 : index
    %c0_2 = arith.constant 0 : index
    %2 = vector.load %arg3[%c0_1, %c0_2] : memref<896x512xbf16, #tpu.memory_space<vmem>>, vector<896x512xbf16>
    %cst = arith.constant dense<0.000000e+00> : vector<8x512xf32>
    %3 = tpu.matmul %0, %2, %cst {dimension_numbers = #tpu.dot_dimension_numbers<[1], [0], [0], [1], [0, 0, 1, 1], [], []>} : vector<8x896xbf16>, vector<896x512xbf16>, vector<8x512xf32> -> vector<8x512xf32>
    %c0_3 = arith.constant 0 : index
    %c0_4 = arith.constant 0 : index
    %4 = vector.load %arg4[%c0_3, %c0_4] : memref<1x512xf32, #tpu.memory_space<vmem>>, vector<1x512xf32>
    %5 = vector.broadcast %4 : vector<1x512xf32> to vector<8x512xf32>
    %6 = arith.addf %3, %5 : vector<8x512xf32>
    %cst_5 = arith.constant 0.000000e+00 : f32
    %7 = vector.broadcast %cst_5 : f32 to vector<8x512xf32>
    %8 = arith.maximumf %6, %7 : vector<8x512xf32>
    %9 = arith.truncf %8 : vector<8x512xf32> to vector<8x512xbf16>
    %c0_6 = arith.constant 0 : index
    %c0_7 = arith.constant 0 : index
    %10 = vector.load %arg5[%c0_6, %c0_7] : memref<512x896xbf16, #tpu.memory_space<vmem>>, vector<512x896xbf16>
    %cst_8 = arith.constant dense<0.000000e+00> : vector<8x896xf32>
    %11 = tpu.matmul %9, %10, %cst_8 {dimension_numbers = #tpu.dot_dimension_numbers<[1], [0], [0], [1], [0, 0, 1, 1], [], []>} : vector<8x512xbf16>, vector<512x896xbf16>, vector<8x896xf32> -> vector<8x896xf32>
    %c0_9 = arith.constant 0 : index
    %c0_10 = arith.constant 0 : index
    %12 = vector.load %arg6[%c0_9, %c0_10] : memref<1x896xf32, #tpu.memory_space<vmem>>, vector<1x896xf32>
    %13 = vector.broadcast %12 : vector<1x896xf32> to vector<8x896xf32>
    %14 = arith.addf %11, %13 : vector<8x896xf32>
    %15 = arith.addf %1, %14 : vector<8x896xf32>
    %16 = arith.truncf %15 : vector<8x896xf32> to vector<8x896xbf16>
    %c0_11 = arith.constant 0 : index
    %c0_12 = arith.constant 0 : index
    %17 = vector.load %arg7[%c0_11, %c0_12] : memref<896x512xbf16, #tpu.memory_space<vmem>>, vector<896x512xbf16>
    %cst_13 = arith.constant dense<0.000000e+00> : vector<8x512xf32>
    %18 = tpu.matmul %16, %17, %cst_13 {dimension_numbers = #tpu.dot_dimension_numbers<[1], [0], [0], [1], [0, 0, 1, 1], [], []>} : vector<8x896xbf16>, vector<896x512xbf16>, vector<8x512xf32> -> vector<8x512xf32>
    %c0_14 = arith.constant 0 : index
    %c0_15 = arith.constant 0 : index
    %19 = vector.load %arg8[%c0_14, %c0_15] : memref<1x512xf32, #tpu.memory_space<vmem>>, vector<1x512xf32>
    %20 = vector.broadcast %19 : vector<1x512xf32> to vector<8x512xf32>
    %21 = arith.addf %18, %20 : vector<8x512xf32>
    %cst_16 = arith.constant 0.000000e+00 : f32
    %22 = vector.broadcast %cst_16 : f32 to vector<8x512xf32>
    %23 = arith.maximumf %21, %22 : vector<8x512xf32>
    %24 = arith.truncf %23 : vector<8x512xf32> to vector<8x512xbf16>
    %c0_17 = arith.constant 0 : index
    %c0_18 = arith.constant 0 : index
    %25 = vector.load %arg9[%c0_17, %c0_18] : memref<512x128xbf16, #tpu.memory_space<vmem>>, vector<512x128xbf16>
    %cst_19 = arith.constant dense<0.000000e+00> : vector<8x128xf32>
    %26 = tpu.matmul %24, %25, %cst_19 {dimension_numbers = #tpu.dot_dimension_numbers<[1], [0], [0], [1], [0, 0, 1, 1], [], []>} : vector<8x512xbf16>, vector<512x128xbf16>, vector<8x128xf32> -> vector<8x128xf32>
    %c0_20 = arith.constant 0 : index
    %c0_21 = arith.constant 0 : index
    %27 = vector.load %arg10[%c0_20, %c0_21] : memref<1x128xf32, #tpu.memory_space<vmem>>, vector<1x128xf32>
    %28 = vector.broadcast %27 : vector<1x128xf32> to vector<8x128xf32>
    %29 = arith.addf %26, %28 : vector<8x128xf32>
    %30 = tpu.iota {dimensions = array<i32: 1>} : vector<8x128xi32>
    %c10_i32 = arith.constant 10 : i32
    %31 = vector.broadcast %c10_i32 : i32 to vector<8x128xi32>
    %32 = arith.cmpi slt, %30, %31 : vector<8x128xi32>
    %cst_22 = arith.constant -1.000000e+30 : f32
    %33 = vector.broadcast %cst_22 : f32 to vector<8x128xf32>
    %34 = arith.select %32, %29, %33 : vector<8x128xi1>, vector<8x128xf32>
    %cst_23 = arith.constant dense<0xFF800000> : vector<8xf32>
    %35 = vector.multi_reduction <maximumf>, %34, %cst_23 [1] : vector<8x128xf32> to vector<8xf32>
    %36 = vector.shape_cast %35 : vector<8xf32> to vector<8x1xf32>
    %37 = vector.broadcast %36 : vector<8x1xf32> to vector<8x128xf32>
    %38 = arith.subf %34, %37 : vector<8x128xf32>
    %39 = math.exp %38 : vector<8x128xf32>
    %cst_24 = arith.constant dense<0.000000e+00> : vector<8xf32>
    %40 = vector.multi_reduction <add>, %39, %cst_24 [1] : vector<8x128xf32> to vector<8xf32>
    %41 = vector.shape_cast %40 : vector<8xf32> to vector<8x1xf32>
    %42 = math.log %41 : vector<8x1xf32>
    %43 = arith.addf %42, %36 : vector<8x1xf32>
    %c0_25 = arith.constant 0 : index
    %c0_26 = arith.constant 0 : index
    %44 = vector.load %arg2[%c0_25, %c0_26] : memref<8x1xi32, #tpu.memory_space<vmem>>, vector<8x1xi32>
    %45 = vector.broadcast %44 : vector<8x1xi32> to vector<8x128xi32>
    %46 = arith.cmpi eq, %30, %45 : vector<8x128xi32>
    %cst_27 = arith.constant 0.000000e+00 : f32
    %47 = vector.broadcast %cst_27 : f32 to vector<8x128xf32>
    %48 = arith.select %46, %29, %47 : vector<8x128xi1>, vector<8x128xf32>
    %cst_28 = arith.constant dense<0.000000e+00> : vector<8xf32>
    %49 = vector.multi_reduction <add>, %48, %cst_28 [1] : vector<8x128xf32> to vector<8xf32>
    %50 = vector.shape_cast %49 : vector<8xf32> to vector<8x1xf32>
    %51 = arith.subf %43, %50 : vector<8x1xf32>
    %c10_i32_29 = arith.constant 10 : i32
    %52 = vector.broadcast %c10_i32_29 : i32 to vector<8x128xi32>
    %53 = arith.cmpi eq, %30, %52 : vector<8x128xi32>
    %54 = vector.shape_cast %51 : vector<8x1xf32> to vector<8x1xf32>
    %55 = vector.broadcast %54 : vector<8x1xf32> to vector<8x128xf32>
    %56 = arith.select %53, %55, %29 : vector<8x128xi1>, vector<8x128xf32>
    %c0_30 = arith.constant 0 : index
    %c0_31 = arith.constant 0 : index
    %57 = vector.load %arg11[%c0_30, %c0_31] : memref<8x128xf32, #tpu.memory_space<vmem>>, vector<8x128xf32>
    tpu.vector_store %arg11[%c0_30, %c0_31], %56 {strides = array<i32>} : memref<8x128xf32, #tpu.memory_space<vmem>>, vector<8x128xf32>,
    return
  }
  func.func @transform_0(%arg0: i32) -> (i32, i32) {
    %c0_i32 = arith.constant 0 : i32
    %c0_i32_0 = arith.constant 0 : i32
    return %arg0, %c0_i32 : i32, i32
  }
  func.func @transform_1(%arg0: i32) -> (i32, i32) {
    %c0_i32 = arith.constant 0 : i32
    %c0_i32_0 = arith.constant 0 : i32
    return %arg0, %c0_i32 : i32, i32
  }
  func.func @transform_2(%arg0: i32) -> (i32, i32) {
    %c0_i32 = arith.constant 0 : i32
    %c0_i32_0 = arith.constant 0 : i32
    %c0_i32_1 = arith.constant 0 : i32
    return %c0_i32, %c0_i32_0 : i32, i32
  }
  func.func @transform_3(%arg0: i32) -> (i32, i32) {
    %c0_i32 = arith.constant 0 : i32
    %c0_i32_0 = arith.constant 0 : i32
    %c0_i32_1 = arith.constant 0 : i32
    return %c0_i32, %c0_i32_0 : i32, i32
  }
  func.func @transform_4(%arg0: i32) -> (i32, i32) {
    %c0_i32 = arith.constant 0 : i32
    %c0_i32_0 = arith.constant 0 : i32
    %c0_i32_1 = arith.constant 0 : i32
    return %c0_i32, %c0_i32_0 : i32, i32
  }
  func.func @transform_5(%arg0: i32) -> (i32, i32) {
    %c0_i32 = arith.constant 0 : i32
    %c0_i32_0 = arith.constant 0 : i32
    %c0_i32_1 = arith.constant 0 : i32
    return %c0_i32, %c0_i32_0 : i32, i32
  }
  func.func @transform_6(%arg0: i32) -> (i32, i32) {
    %c0_i32 = arith.constant 0 : i32
    %c0_i32_0 = arith.constant 0 : i32
    %c0_i32_1 = arith.constant 0 : i32
    return %c0_i32, %c0_i32_0 : i32, i32
  }
  func.func @transform_7(%arg0: i32) -> (i32, i32) {
    %c0_i32 = arith.constant 0 : i32
    %c0_i32_0 = arith.constant 0 : i32
    %c0_i32_1 = arith.constant 0 : i32
    return %c0_i32, %c0_i32_0 : i32, i32
  }
  func.func @transform_8(%arg0: i32) -> (i32, i32) {
    %c0_i32 = arith.constant 0 : i32
    %c0_i32_0 = arith.constant 0 : i32
    %c0_i32_1 = arith.constant 0 : i32
    return %c0_i32, %c0_i32_0 : i32, i32
  }
  func.func @transform_9(%arg0: i32) -> (i32, i32) {
    %c0_i32 = arith.constant 0 : i32
    %c0_i32_0 = arith.constant 0 : i32
    %c0_i32_1 = arith.constant 0 : i32
    return %c0_i32, %c0_i32_0 : i32, i32
  }
  func.func @transform_10(%arg0: i32) -> (i32, i32) {
    %c0_i32 = arith.constant 0 : i32
    %c0_i32_0 = arith.constant 0 : i32
    return %arg0, %c0_i32 : i32, i32
  }
}

</mosaic_0001>

<bundles_post_ra>
// kernel: mnist_forward.1
= control target key start
LH: loop header
LB: loop body
LE: loop exit
PB: predicated region body
PF: predicated region fallthrough
CT: control target
= control target key end

     0   :  { %15 = vsyncpa [#allocation3], 0  ;;  %s7983_s0 = inlined_call_operand.vmem [shape: bf16[8,896], index: 0, kind: input, shape index: {}]   ;;  %s7984_s1 = inlined_call_operand.vmem [shape: s32[8,1], index: 1, kind: input, shape index: {}]   ;;  %s7985_s2 = inlined_call_operand.hbm [shape: bf16[896,512], index: 2, kind: input, shape index: {}]   ;;  %s7986_s3 = inlined_call_operand.vmem [shape: f32[1,512], index: 3, kind: input, shape index: {}]   ;;  %s7987_s4 = inlined_call_operand.hbm [shape: bf16[512,896], index: 4, kind: input, shape index: {}]   ;;  %s7988_s5 = inlined_call_operand.vmem [shape: f32[1,896], index: 5, kind: input, shape index: {}]   ;;  %s7989_s6 = inlined_call_operand.hbm [shape: bf16[896,512], index: 6, kind: input, shape index: {}]   ;;  %s7990_s7 = inlined_call_operand.vmem [shape: f32[1,512], index: 7, kind: input, shape index: {}]   ;;  %s7991_s8 = inlined_call_operand.vmem [shape: bf16[512,128], index: 8, kind: input, shape index: {}]   ;;  %s7992_s9 = inlined_call_operand.vmem [shape: f32[1,128], index: 9, kind: input, shape index: {}]   ;;  %s7993_s10 = inlined_call_operand.vmem [shape: f32[8,128], index: 10, kind: output, shape index: {}]  }
   0x1   :  { %16 = vsyncpa [#allocation5], 0  ;;  %s7589_s13 = smov [#allocation4]  }
   0x2   :  { %s40_s14 = sshll.u32 %s7589_s13, 4  ;;  %s41_s14 = int_to_ptr.vmem [resolvable:$true] %s40_s14 }
   0x3   :  { %s7533_s15 = scalar_lea.vmem %s41_s14, 28672  ;;  %p7538_p1 = scmp.lt.s32.totalorder %s41_s14, %s41_s14 }
   0x4   :  { %p7534_p0 = scmp.ne.s32.totalorder %s41_s14, %s7533_s15  ;;  %p7539_p2 = scmp.lt.s32.totalorder %s7533_s15, %s7533_s15 }
   0x6   :  { %p7540_p3 = por %p7539_p2, %p7538_p1 }
   0x8   :  { %p7541_p4 = pnand %p7540_p3, %p7534_p0 }
   0xa   :  { %7544 = shalt.err (!%p7541_p4)
}
   0xb   :  { %s7590_s16 = smov 448   ;;  %s7591_s17 = smov 28  }
   0xc   :  { %46 = dma.hbm_to_vmem [thread:$0]  %s7987_s4, 28672, %s41_s14, [#allocation5], %s7590_s16, %s7590_s16, %s7591_s17  }
   0xd   :  { %s7592_s20 = smov [#allocation2]  }
   0xe   :  { %s26_s21 = sshll.u32 %s7592_s20, 4  ;;  %s27_s21 = int_to_ptr.vmem [resolvable:$true] %s26_s21 }
   0xf   :  { %s7553_s22 = scalar_lea.vmem %s27_s21, 28672  ;;  %p7558_p6 = scmp.lt.s32.totalorder %s27_s21, %s27_s21 }
  0x10   :  { %p7554_p5 = scmp.ne.s32.totalorder %s27_s21, %s7553_s22  ;;  %p7559_p7 = scmp.lt.s32.totalorder %s7553_s22, %s7553_s22 }
  0x12   :  { %p7560_p8 = por %p7559_p7, %p7558_p6 }
  0x14   :  { %p7561_p9 = pnand %p7560_p8, %p7554_p5 }
  0x16   :  { %7564 = shalt.err (!%p7561_p9)
}
  0x17   :  { %s7593_s23 = smov 256   ;;  %s7594_s24 = smov 16  }
  0x18   :  { %32 = dma.hbm_to_vmem [thread:$0]  %s7985_s2, 28672, %s27_s21, [#allocation3], %s7593_s23, %s7593_s23, %s7594_s24  }
  0x19   :  { %s7595_s27 = smov [#allocation6]  }
  0x1a   :  { %s54_s28 = sshll.u32 %s7595_s27, 4  ;;  %s55_s28 = int_to_ptr.vmem [resolvable:$true] %s54_s28 }
  0x1b   :  { %s7573_s4 = scalar_lea.vmem %s55_s28, 28672  ;;  %p7578_p11 = scmp.lt.s32.totalorder %s55_s28, %s55_s28 }
  0x1c   :  { %p7574_p10 = scmp.ne.s32.totalorder %s55_s28, %s7573_s4  ;;  %p7579_p12 = scmp.lt.s32.totalorder %s7573_s4, %s7573_s4 }
  0x1e   :  { %p7580_p13 = por %p7579_p12, %p7578_p11 }
  0x20   :  { %p7581_p0 = pnand %p7580_p13, %p7574_p10 }
  0x22   :  { %7584 = shalt.err (!%p7581_p0)
}
  0x23   :  { %60 = dma.hbm_to_vmem [thread:$0]  %s7989_s6, 28672, %s55_s28, [#allocation5], %s7593_s23, %s7593_s23, %s7594_s24  }
  0x24   :  { %7585 = dma.done.wait [#allocation3], 28672  }
  0x25   :  { %7586 = vsyncadd [#allocation3], 4294938624 }
  0x26   :  { %7587 = dma.done.wait [#allocation5], 57344  }
  0x27   :  { %7588 = vsyncadd [#allocation5], 4294909952  ;;  %v7596_v0 = vmov 0   ;;  %v6486_v1 = vld [vmem:[#allocation2 + $0xe4] ss:$16 sps:$4 sm:$0xff]   ;;  %v78_v49 = vld [vmem:[%s7983_s0 + $0x8] sm:$0xff] }
  0x28   :  { %6485 = vset.pattern.permute.xlu0 %v7596_v0  ;;  %v6488_v2 = vld [vmem:[#allocation2 + $0x2e4] ss:$16 sps:$4 sm:$0xff]   ;;  %1479 = vmatprep.subr.bf16.mxu0 %v6486_v1  ;;  %v6490_v3 = vld [vmem:[#allocation2 + $0xe0] ss:$16 sps:$4 sm:$0xff]   ;;  %v7670_v52 = vcombine.high %v78_v49, %v78_v49 }
  0x29   :  { %v6491_v4 = vld [vmem:[#allocation2 + $0x2e0] ss:$16 sps:$4 sm:$0xff]   ;;  %1520 = vmatprep.subr.bf16.mxu1 %v6488_v2  ;;  %v6492_v5 = vld [vmem:[#allocation2 + $0xc4] ss:$16 sps:$4 sm:$0xff]   ;;  %1480 = vmatpush1.bf16.msra.mxu0 %v6490_v3 }
  0x2a   :  { %1521 = vmatpush1.bf16.msra.mxu1 %v6491_v4  ;;  %v6494_v6 = vld [vmem:[#allocation2 + $0x2c4] ss:$16 sps:$4 sm:$0xff]   ;;  %v6496_v7 = vld [vmem:[#allocation2 + $0xc0] ss:$16 sps:$4 sm:$0xff]   ;;  %1481 = vmatprep.subr.bf16.mxu0 %v6492_v5 }
  0x2b   :  { %v6497_v8 = vld [vmem:[#allocation2 + $0x2c0] ss:$16 sps:$4 sm:$0xff]   ;;  %1522 = vmatprep.subr.bf16.mxu1 %v6494_v6  ;;  %v6498_v9 = vld [vmem:[#allocation2 + $0xa4] ss:$16 sps:$4 sm:$0xff]   ;;  %1552 = vmatprep.mubr.bf16.mxu1 %v7670_v52 }
  0x2c   :  { %v6500_v10 = vld [vmem:[#allocation2 + $0x2a4] ss:$16 sps:$4 sm:$0xff]   ;;  %v6502_v11 = vld [vmem:[#allocation2 + $0xa0] ss:$16 sps:$4 sm:$0xff]  }
  0x2d   :  { %v6503_v12 = vld [vmem:[#allocation2 + $0x2a0] ss:$16 sps:$4 sm:$0xff]   ;;  %1482 = vmatpush1.bf16.msra.mxu0 %v6496_v7  ;;  %v6504_v13 = vld [vmem:[#allocation2 + $0x84] ss:$16 sps:$4 sm:$0xff]  }
  0x2e   :  { %1523 = vmatpush1.bf16.msra.mxu1 %v6497_v8  ;;  %1483 = vmatprep.subr.bf16.mxu0 %v6498_v9  ;;  %v6506_v14 = vld [vmem:[#allocation2 + $0x284] ss:$16 sps:$4 sm:$0xff]   ;;  %v6508_v15 = vld [vmem:[#allocation2 + $0x80] ss:$16 sps:$4 sm:$0xff]   ;;  %v7676_v9 = vcombine.low %v78_v49, %v78_v49 }
  0x2f   :  { %1524 = vmatprep.subr.bf16.mxu1 %v6500_v10  ;;  %v6509_v16 = vld [vmem:[#allocation2 + $0x280] ss:$16 sps:$4 sm:$0xff]   ;;  %v6510_v17 = vld [vmem:[#allocation2 + $0x64] ss:$16 sps:$4 sm:$0xff]  }
  0x30   :  { %v6512_v18 = vld [vmem:[#allocation2 + $0x264] ss:$16 sps:$4 sm:$0xff]   ;;  %v6514_v19 = vld [vmem:[#allocation2 + $0x60] ss:$16 sps:$4 sm:$0xff]  }
  0x31   :  { %1484 = vmatpush1.bf16.msra.mxu0 %v6502_v11  ;;  %v6515_v20 = vld [vmem:[#allocation2 + $0x260] ss:$16 sps:$4 sm:$0xff]   ;;  %v6516_v21 = vld [vmem:[#allocation2 + $0x44] ss:$16 sps:$4 sm:$0xff]  }
  0x32   :  { %1525 = vmatpush1.bf16.msra.mxu1 %v6503_v12  ;;  %1485 = vmatprep.subr.bf16.mxu0 %v6504_v13  ;;  %v6518_v22 = vld [vmem:[#allocation2 + $0x244] ss:$16 sps:$4 sm:$0xff]   ;;  %v6520_v23 = vld [vmem:[#allocation2 + $0x40] ss:$16 sps:$4 sm:$0xff]  }
  0x33   :  { %1526 = vmatprep.subr.bf16.mxu1 %v6506_v14  ;;  %v6521_v24 = vld [vmem:[#allocation2 + $0x240] ss:$16 sps:$4 sm:$0xff]   ;;  %v6522_v25 = vld [vmem:[#allocation2 + $0x24] ss:$16 sps:$4 sm:$0xff]  }
  0x34   :  { %v6524_v26 = vld [vmem:[#allocation2 + $0x224] ss:$16 sps:$4 sm:$0xff]   ;;  %v6526_v27 = vld [vmem:[#allocation2 + $0x20] ss:$16 sps:$4 sm:$0xff]  }
  0x35   :  { %1486 = vmatpush1.bf16.msra.mxu0 %v6508_v15  ;;  %v6527_v28 = vld [vmem:[#allocation2 + $0x220] ss:$16 sps:$4 sm:$0xff]   ;;  %v6528_v29 = vld [vmem:[#allocation2 + $0x4] ss:$16 sps:$4 sm:$0xff]  }
  0x36   :  { %1527 = vmatpush1.bf16.msra.mxu1 %v6509_v16  ;;  %1487 = vmatprep.subr.bf16.mxu0 %v6510_v17  ;;  %v6530_v30 = vld [vmem:[#allocation2 + $0x204] ss:$16 sps:$4 sm:$0xff]   ;;  %v6532_v31 = vld [vmem:[#allocation2] ss:$16 sps:$4 sm:$0xff]  }
  0x37   :  { %1528 = vmatprep.subr.bf16.mxu1 %v6512_v18  ;;  %v6533_v32 = vld [vmem:[#allocation2 + $0x200] ss:$16 sps:$4 sm:$0xff]   ;;  %v6534_v33 = vld [vmem:[#allocation2 + $0x1e4] ss:$16 sps:$4 sm:$0xff]  }
  0x38   :  { %v6536_v34 = vld [vmem:[#allocation2 + $0x3e4] ss:$16 sps:$4 sm:$0xff]   ;;  %v6538_v35 = vld [vmem:[#allocation2 + $0x1e0] ss:$16 sps:$4 sm:$0xff]  }
  0x39   :  { %1488 = vmatpush1.bf16.msra.mxu0 %v6514_v19  ;;  %v6539_v36 = vld [vmem:[#allocation2 + $0x3e0] ss:$16 sps:$4 sm:$0xff]   ;;  %v6540_v37 = vld [vmem:[#allocation2 + $0x1c4] ss:$16 sps:$4 sm:$0xff]  }
  0x3a   :  { %1529 = vmatpush1.bf16.msra.mxu1 %v6515_v20  ;;  %1489 = vmatprep.subr.bf16.mxu0 %v6516_v21  ;;  %v6542_v38 = vld [vmem:[#allocation2 + $0x3c4] ss:$16 sps:$4 sm:$0xff]   ;;  %v6544_v39 = vld [vmem:[#allocation2 + $0x1c0] ss:$16 sps:$4 sm:$0xff]  }
  0x3b   :  { %1530 = vmatprep.subr.bf16.mxu1 %v6518_v22  ;;  %v6545_v40 = vld [vmem:[#allocation2 + $0x3c0] ss:$16 sps:$4 sm:$0xff]   ;;  %v6546_v41 = vld [vmem:[#allocation2 + $0x1a4] ss:$16 sps:$4 sm:$0xff]  }
  0x3c   :  { %v6548_v42 = vld [vmem:[#allocation2 + $0x3a4] ss:$16 sps:$4 sm:$0xff]   ;;  %v6550_v43 = vld [vmem:[#allocation2 + $0x1a0] ss:$16 sps:$4 sm:$0xff]  }
  0x3d   :  { %1490 = vmatpush1.bf16.msra.mxu0 %v6520_v23  ;;  %v6551_v44 = vld [vmem:[#allocation2 + $0x3a0] ss:$16 sps:$4 sm:$0xff]   ;;  %v6552_v45 = vld [vmem:[#allocation2 + $0x184] ss:$16 sps:$4 sm:$0xff]  }
  0x3e   :  { %1531 = vmatpush1.bf16.msra.mxu1 %v6521_v24  ;;  %1491 = vmatprep.subr.bf16.mxu0 %v6522_v25  ;;  %v6554_v46 = vld [vmem:[#allocation2 + $0x384] ss:$16 sps:$4 sm:$0xff]   ;;  %v6556_v50 = vld [vmem:[#allocation2 + $0x180] ss:$16 sps:$4 sm:$0xff]  }
  0x3f   :  { %1532 = vmatprep.subr.bf16.mxu1 %v6524_v26  ;;  %v77_v47 = vld [vmem:[%s7983_s0] sm:$0xff] }
  0x40   :  { %v7665_v48 = vcombine.high %v77_v47, %v77_v47  ;;  %v6557_v51 = vld [vmem:[#allocation2 + $0x380] ss:$16 sps:$4 sm:$0xff]   ;;  %v6558_v53 = vld [vmem:[#allocation2 + $0x164] ss:$16 sps:$4 sm:$0xff]   ;;  %v7674_v8 = vcombine.low %v77_v47, %v77_v47  ;;  %v6638_v47 = vld [vmem:[#allocation2 + $0xe8] ss:$16 sps:$4 sm:$0xff]  }
  0x41   :  { %1492 = vmatpush1.bf16.msra.mxu0 %v6526_v27  ;;  %v6560_v54 = vld [vmem:[#allocation2 + $0x364] ss:$16 sps:$4 sm:$0xff]   ;;  %v6562_v55 = vld [vmem:[#allocation2 + $0x160] ss:$16 sps:$4 sm:$0xff]  }
  0x42   :  { %1533 = vmatpush1.bf16.msra.mxu1 %v6527_v28  ;;  %1493 = vmatprep.subr.bf16.mxu0 %v6528_v29  ;;  %v6563_v56 = vld [vmem:[#allocation2 + $0x360] ss:$16 sps:$4 sm:$0xff]   ;;  %v6564_v57 = vld [vmem:[#allocation2 + $0x144] ss:$16 sps:$4 sm:$0xff]  }
  0x43   :  { %1534 = vmatprep.subr.bf16.mxu1 %v6530_v30  ;;  %1511 = vmatprep.mubr.bf16.mxu0 %v7665_v48  ;;  %v6566_v58 = vld [vmem:[#allocation2 + $0x344] ss:$16 sps:$4 sm:$0xff]   ;;  %v6568_v59 = vld [vmem:[#allocation2 + $0x140] ss:$16 sps:$4 sm:$0xff]  }
  0x44   :  { %v6569_v60 = vld [vmem:[#allocation2 + $0x340] ss:$16 sps:$4 sm:$0xff]   ;;  %v6570_v61 = vld [vmem:[#allocation2 + $0x124] ss:$16 sps:$4 sm:$0xff]  }
  0x45   :  { %1494 = vmatpush1.bf16.msra.mxu0 %v6532_v31  ;;  %v6572_v62 = vld [vmem:[#allocation2 + $0x324] ss:$16 sps:$4 sm:$0xff]   ;;  %v6574_v63 = vld [vmem:[#allocation2 + $0x120] ss:$16 sps:$4 sm:$0xff]  }
  0x46   :  { %1535 = vmatpush1.bf16.msra.mxu1 %v6533_v32  ;;  %1495 = vmatprep.subr.bf16.mxu0 %v6534_v33  ;;  %v6575_v1 = vld [vmem:[#allocation2 + $0x320] ss:$16 sps:$4 sm:$0xff]   ;;  %v6576_v2 = vld [vmem:[#allocation2 + $0x104] ss:$16 sps:$4 sm:$0xff]  }
  0x47   :  { %1536 = vmatprep.subr.bf16.mxu1 %v6536_v34  ;;  %v6578_v3 = vld [vmem:[#allocation2 + $0x304] ss:$16 sps:$4 sm:$0xff]   ;;  %v6580_v4 = vld [vmem:[#allocation2 + $0x100] ss:$16 sps:$4 sm:$0xff]  }
  0x48   :  { %v6581_v5 = vld [vmem:[#allocation2 + $0x300] ss:$16 sps:$4 sm:$0xff]   ;;  %v6588_v6 = vld [vmem:[#allocation2 + $0x4e4] ss:$16 sps:$4 sm:$0xff]  }
  0x49   :  { %1496 = vmatpush2.bf16.msra.mxu0 %v6538_v35  ;;  %v6591_v7 = vld [vmem:[#allocation2 + $0x6e4] ss:$16 sps:$4 sm:$0xff]   ;;  %v6586_v10 = vld [vmem:[#allocation2 + $0x4e0] ss:$16 sps:$4 sm:$0xff]  }
  0x4a   :  { %1537 = vmatpush2.bf16.msra.mxu1 %v6539_v36  ;;  %1497 = vmatprep.subr.bf16.mxu0 %v6540_v37  ;;  %v6589_v11 = vld [vmem:[#allocation2 + $0x6e0] ss:$16 sps:$4 sm:$0xff]   ;;  %v6594_v12 = vld [vmem:[#allocation2 + $0x4c4] ss:$16 sps:$4 sm:$0xff]  }
  0x4b   :  { %1538 = vmatprep.subr.bf16.mxu1 %v6542_v38  ;;  %v6597_v13 = vld [vmem:[#allocation2 + $0x6c4] ss:$16 sps:$4 sm:$0xff]   ;;  %v6592_v14 = vld [vmem:[#allocation2 + $0x4c0] ss:$16 sps:$4 sm:$0xff]  }
  0x4c   :  { %v6595_v15 = vld [vmem:[#allocation2 + $0x6c0] ss:$16 sps:$4 sm:$0xff]   ;;  %v6600_v16 = vld [vmem:[#allocation2 + $0x4a4] ss:$16 sps:$4 sm:$0xff]  }
  0x4d   :  { %1498 = vmatpush2.bf16.msra.mxu0 %v6544_v39  ;;  %v6603_v17 = vld [vmem:[#allocation2 + $0x6a4] ss:$16 sps:$4 sm:$0xff]   ;;  %v6598_v18 = vld [vmem:[#allocation2 + $0x4a0] ss:$16 sps:$4 sm:$0xff]  }
  0x4e   :  { %1539 = vmatpush2.bf16.msra.mxu1 %v6545_v40  ;;  %1499 = vmatprep.subr.bf16.mxu0 %v6546_v41  ;;  %v6601_v19 = vld [vmem:[#allocation2 + $0x6a0] ss:$16 sps:$4 sm:$0xff]   ;;  %v6606_v20 = vld [vmem:[#allocation2 + $0x484] ss:$16 sps:$4 sm:$0xff]  }
  0x4f   :  { %1540 = vmatprep.subr.bf16.mxu1 %v6548_v42  ;;  %v6609_v21 = vld [vmem:[#allocation2 + $0x684] ss:$16 sps:$4 sm:$0xff]   ;;  %v6604_v22 = vld [vmem:[#allocation2 + $0x480] ss:$16 sps:$4 sm:$0xff]  }
  0x50   :  { %v6607_v23 = vld [vmem:[#allocation2 + $0x680] ss:$16 sps:$4 sm:$0xff]   ;;  %v6612_v24 = vld [vmem:[#allocation2 + $0x464] ss:$16 sps:$4 sm:$0xff]  }
  0x51   :  { %1500 = vmatpush2.bf16.msra.mxu0 %v6550_v43  ;;  %v6615_v25 = vld [vmem:[#allocation2 + $0x664] ss:$16 sps:$4 sm:$0xff]   ;;  %v6610_v26 = vld [vmem:[#allocation2 + $0x460] ss:$16 sps:$4 sm:$0xff]   ;;  %v80_v43 = vld [vmem:[%s7983_s0 + $0x18] sm:$0xf] }
  0x52   :  { %1541 = vmatpush2.bf16.msra.mxu1 %v6551_v44  ;;  %1501 = vmatprep.subr.bf16.mxu0 %v6552_v45  ;;  %v6613_v27 = vld [vmem:[#allocation2 + $0x660] ss:$16 sps:$4 sm:$0xff]   ;;  %v6618_v28 = vld [vmem:[#allocation2 + $0x444] ss:$16 sps:$4 sm:$0xff]   ;;  %v6640_v44 = vld [vmem:[#allocation2 + $0xec] ss:$16 sps:$4 sm:$0xff]  }
  0x53   :  { %1542 = vmatprep.subr.bf16.mxu1 %v6554_v46  ;;  %v6621_v29 = vld [vmem:[#allocation2 + $0x644] ss:$16 sps:$4 sm:$0xff]   ;;  %v6616_v30 = vld [vmem:[#allocation2 + $0x440] ss:$16 sps:$4 sm:$0xff]   ;;  %v7694_v46 = vcombine.low %v80_v43, %v80_v43  ;;  %v6721_v43 = vld [vmem:[#allocation2 + $0x128] ss:$16 sps:$4 sm:$0xff]  }
  0x54   :  { %v6619_v31 = vld [vmem:[#allocation2 + $0x640] ss:$16 sps:$4 sm:$0xff]   ;;  %v6624_v32 = vld [vmem:[#allocation2 + $0x424] ss:$16 sps:$4 sm:$0xff]  }
  0x55   :  { %1502 = vmatpush2.bf16.msra.mxu0 %v6556_v50  ;;  %v6627_v33 = vld [vmem:[#allocation2 + $0x624] ss:$16 sps:$4 sm:$0xff]   ;;  %v6622_v35 = vld [vmem:[#allocation2 + $0x420] ss:$16 sps:$4 sm:$0xff]   ;;  %v6646_v50 = vld [vmem:[#allocation2 + $0xcc] ss:$16 sps:$4 sm:$0xff]  }
  0x56   :  { %1543 = vmatpush2.bf16.msra.mxu1 %v6557_v51  ;;  %1503 = vmatprep.subr.bf16.mxu0 %v6558_v53  ;;  %v7684_v34 = vld [vmem:[%s7983_s0 + $0x10] sm:$0xff]  ;;  %v6644_v53 = vld [vmem:[#allocation2 + $0xc8] ss:$16 sps:$4 sm:$0xff]  }
  0x57   :  { %1544 = vmatprep.subr.bf16.mxu1 %v6560_v54  ;;  %v6625_v36 = vld [vmem:[#allocation2 + $0x620] ss:$16 sps:$4 sm:$0xff]   ;;  %v7688_v37 = vcombine.high %v7684_v34, %v7684_v34  ;;  %v6630_v38 = vld [vmem:[#allocation2 + $0x404] ss:$16 sps:$4 sm:$0xff]  }
  0x58   :  { %v6633_v39 = vld [vmem:[#allocation2 + $0x604] ss:$16 sps:$4 sm:$0xff]   ;;  %v6628_v40 = vld [vmem:[#allocation2 + $0x400] ss:$16 sps:$4 sm:$0xff]  }
  0x59   :  { %1504 = vmatpush2.bf16.msra.mxu0 %v6562_v55  ;;  %v6631_v41 = vld [vmem:[#allocation2 + $0x600] ss:$16 sps:$4 sm:$0xff]   ;;  %v6636_v42 = vld [vmem:[#allocation2 + $0x5e4] ss:$16 sps:$4 sm:$0xff]   ;;  %v6652_v55 = vld [vmem:[#allocation2 + $0xac] ss:$16 sps:$4 sm:$0xff]  }
  0x5a   :  { %1545 = vmatpush2.bf16.msra.mxu1 %v6563_v56  ;;  %1505 = vmatprep.subr.bf16.mxu0 %v6564_v57  ;;  %v6634_v45 = vld [vmem:[#allocation2 + $0x5e0] ss:$16 sps:$4 sm:$0xff]   ;;  %v6643_v49 = vld [vmem:[#allocation2 + $0x5c4] ss:$16 sps:$4 sm:$0xff]   ;;  %v6650_v57 = vld [vmem:[#allocation2 + $0xa8] ss:$16 sps:$4 sm:$0xff]  }
  0x5b   :  { %1546 = vmatprep.subr.bf16.mxu1 %v6566_v58  ;;  %v6641_v51 = vld [vmem:[#allocation2 + $0x5c0] ss:$16 sps:$4 sm:$0xff]   ;;  %v6649_v54 = vld [vmem:[#allocation2 + $0x5a4] ss:$16 sps:$4 sm:$0xff]  }
  0x5c   :  { %v6647_v56 = vld [vmem:[#allocation2 + $0x5a0] ss:$16 sps:$4 sm:$0xff]   ;;  %v6655_v58 = vld [vmem:[#allocation2 + $0x584] ss:$16 sps:$4 sm:$0xff]  }
  0x5d   :  { %1506 = vmatpush2.bf16.msra.mxu0 %v6568_v59  ;;  %v6658_v59 = vld [vmem:[#allocation2 + $0x8c] ss:$16 sps:$4 sm:$0xff]  }
  0x5e   :  { %1547 = vmatpush2.bf16.msra.mxu1 %v6569_v60  ;;  %1507 = vmatprep.subr.bf16.mxu0 %v6570_v61  ;;  %v6653_v60 = vld [vmem:[#allocation2 + $0x580] ss:$16 sps:$4 sm:$0xff]   ;;  %v6656_v61 = vld [vmem:[#allocation2 + $0x88] ss:$16 sps:$4 sm:$0xff]  }
  0x5f   :  { %1548 = vmatprep.subr.bf16.mxu1 %v6572_v62  ;;  %v6661_v62 = vld [vmem:[#allocation2 + $0x564] ss:$16 sps:$4 sm:$0xff]  }
  0x61   :  { %1508 = vmatpush2.bf16.msra.mxu0 %v6574_v63  ;;  %v6664_v63 = vld [vmem:[#allocation2 + $0x6c] ss:$16 sps:$4 sm:$0xff]  }
  0x62   :  { %1549 = vmatpush2.bf16.msra.mxu1 %v6575_v1  ;;  %1509 = vmatprep.subr.bf16.mxu0 %v6576_v2  ;;  %v6659_v1 = vld [vmem:[#allocation2 + $0x560] ss:$16 sps:$4 sm:$0xff]   ;;  %v6662_v2 = vld [vmem:[#allocation2 + $0x68] ss:$16 sps:$4 sm:$0xff]  }
  0x63   :  { %1550 = vmatprep.subr.bf16.mxu1 %v6578_v3  ;;  %v6670_v3 = vld [vmem:[#allocation2 + $0x4c] ss:$16 sps:$4 sm:$0xff]  }
  0x65   :  { %1510 = vmatpush2.bf16.msra.mxu0 %v6580_v4  ;;  %v6665_v4 = vld [vmem:[#allocation2 + $0x540] ss:$16 sps:$4 sm:$0xff]  }
  0x66   :  { %1551 = vmatpush2.bf16.msra.mxu1 %v6581_v5  ;;  %1561 = vmatprep.subr.bf16.mxu0 %v6588_v6  ;;  %v6668_v5 = vld [vmem:[#allocation2 + $0x48] ss:$16 sps:$4 sm:$0xff]   ;;  %v6673_v6 = vld [vmem:[#allocation2 + $0x524] ss:$16 sps:$4 sm:$0xff]  }
  0x67   :  { %1602 = vmatprep.subr.bf16.mxu1 %v6591_v7  ;;  %v6676_v7 = vld [vmem:[#allocation2 + $0x2c] ss:$16 sps:$4 sm:$0xff]  }
  0x68   :  { %1512 = vmatmul.mubr.bf16.vlgmr.msra.gmra.mxu0 %v7674_v8 }
  0x69   :  { %1553 = vmatmul.mubr.bf16.vlgmr.msra.gmra.mxu1 %v7676_v9  ;;  %1562 = vmatpush1.bf16.msra.mxu0 %v6586_v10  ;;  %v6671_v10 = vld [vmem:[#allocation2 + $0x520] ss:$16 sps:$4 sm:$0xff]  }
  0x6a   :  { %1603 = vmatpush1.bf16.msra.mxu1 %v6589_v11  ;;  %1563 = vmatprep.subr.bf16.mxu0 %v6594_v12  ;;  %v6674_v11 = vld [vmem:[#allocation2 + $0x28] ss:$16 sps:$4 sm:$0xff]   ;;  %v6679_v12 = vld [vmem:[#allocation2 + $0x504] ss:$16 sps:$4 sm:$0xff]  }
  0x6b   :  { %1604 = vmatprep.subr.bf16.mxu1 %v6597_v13  ;;  %1634 = vmatprep.mubr.bf16.mxu1 %v7596_v0  ;;  %v6682_v13 = vld [vmem:[#allocation2 + $0xc] ss:$16 sps:$4 sm:$0xff]  }
  0x6c   :  { %1593 = vmatprep.mubr.bf16.mxu0 %v7688_v37 }
  0x6d   :  { %1564 = vmatpush1.bf16.msra.mxu0 %v6592_v14  ;;  %v6677_v14 = vld [vmem:[#allocation2 + $0x500] ss:$16 sps:$4 sm:$0xff]  }
  0x6e   :  { %1605 = vmatpush1.bf16.msra.mxu1 %v6595_v15  ;;  %1565 = vmatprep.subr.bf16.mxu0 %v6600_v16  ;;  %v6680_v15 = vld [vmem:[#allocation2 + $0x8] ss:$16 sps:$4 sm:$0xff]   ;;  %v6687_v16 = vld [vmem:[#allocation2 + $0x1ec] ss:$16 sps:$4 sm:$0xff]  }
  0x6f   :  { %1606 = vmatprep.subr.bf16.mxu1 %v6603_v17  ;;  %v6690_v17 = vld [vmem:[#allocation2 + $0x2ec] ss:$16 sps:$4 sm:$0xff]  }
  0x71   :  { %1566 = vmatpush1.bf16.msra.mxu0 %v6598_v18  ;;  %v7700_v18 = vcombine.low %v7684_v34, %v7684_v34  ;;  %v6714_v34 = vld [vmem:[#allocation2 + $0x26c] ss:$16 sps:$4 sm:$0xff]  }
  0x72   :  { %1607 = vmatpush1.bf16.msra.mxu1 %v6601_v19  ;;  %1567 = vmatprep.subr.bf16.mxu0 %v6606_v20  ;;  %v6685_v19 = vld [vmem:[#allocation2 + $0x1e8] ss:$16 sps:$4 sm:$0xff]  }
  0x73   :  { %1608 = vmatprep.subr.bf16.mxu1 %v6609_v21  ;;  %v6688_v20 = vld [vmem:[#allocation2 + $0x2e8] ss:$16 sps:$4 sm:$0xff]   ;;  %v6693_v21 = vld [vmem:[#allocation2 + $0x1cc] ss:$16 sps:$4 sm:$0xff]  }
  0x75   :  { %1568 = vmatpush1.bf16.msra.mxu0 %v6604_v22  ;;  %v6696_v22 = vld [vmem:[#allocation2 + $0x2cc] ss:$16 sps:$4 sm:$0xff]  }
  0x76   :  { %1609 = vmatpush1.bf16.msra.mxu1 %v6607_v23  ;;  %1569 = vmatprep.subr.bf16.mxu0 %v6612_v24  ;;  %v6691_v23 = vld [vmem:[#allocation2 + $0x1c8] ss:$16 sps:$4 sm:$0xff]  }
  0x77   :  { %1610 = vmatprep.subr.bf16.mxu1 %v6615_v25  ;;  %v6694_v24 = vld [vmem:[#allocation2 + $0x2c8] ss:$16 sps:$4 sm:$0xff]   ;;  %v6699_v25 = vld [vmem:[#allocation2 + $0x1ac] ss:$16 sps:$4 sm:$0xff]  }
  0x79   :  { %1570 = vmatpush1.bf16.msra.mxu0 %v6610_v26  ;;  %v6702_v26 = vld [vmem:[#allocation2 + $0x2ac] ss:$16 sps:$4 sm:$0xff]  }
  0x7a   :  { %1611 = vmatpush1.bf16.msra.mxu1 %v6613_v27  ;;  %1571 = vmatprep.subr.bf16.mxu0 %v6618_v28  ;;  %v6697_v27 = vld [vmem:[#allocation2 + $0x1a8] ss:$16 sps:$4 sm:$0xff]  }
  0x7b   :  { %1612 = vmatprep.subr.bf16.mxu1 %v6621_v29  ;;  %v6700_v28 = vld [vmem:[#allocation2 + $0x2a8] ss:$16 sps:$4 sm:$0xff]   ;;  %v6705_v29 = vld [vmem:[#allocation2 + $0x18c] ss:$16 sps:$4 sm:$0xff]  }
  0x7d   :  { %1572 = vmatpush1.bf16.msra.mxu0 %v6616_v30  ;;  %v6708_v30 = vld [vmem:[#allocation2 + $0x28c] ss:$16 sps:$4 sm:$0xff]  }
  0x7e   :  { %1613 = vmatpush1.bf16.msra.mxu1 %v6619_v31  ;;  %1573 = vmatprep.subr.bf16.mxu0 %v6624_v32  ;;  %v6703_v31 = vld [vmem:[#allocation2 + $0x188] ss:$16 sps:$4 sm:$0xff]  }
  0x7f   :  { %1614 = vmatprep.subr.bf16.mxu1 %v6627_v33  ;;  %v6706_v32 = vld [vmem:[#allocation2 + $0x288] ss:$16 sps:$4 sm:$0xff]   ;;  %v6711_v33 = vld [vmem:[#allocation2 + $0x16c] ss:$16 sps:$4 sm:$0xff]  }
  0x81   :  { %1574 = vmatpush1.bf16.msra.mxu0 %v6622_v35  ;;  %v6709_v35 = vld [vmem:[#allocation2 + $0x168] ss:$16 sps:$4 sm:$0xff]  }
  0x82   :  { %1615 = vmatpush1.bf16.msra.mxu1 %v6625_v36  ;;  %1575 = vmatprep.subr.bf16.mxu0 %v6630_v38  ;;  %v6712_v36 = vld [vmem:[#allocation2 + $0x268] ss:$16 sps:$4 sm:$0xff]   ;;  %v6720_v38 = vld [vmem:[#allocation2 + $0x24c] ss:$16 sps:$4 sm:$0xff]  }
  0x83   :  { %1616 = vmatprep.subr.bf16.mxu1 %v6633_v39  ;;  %v6715_v39 = vld [vmem:[#allocation2 + $0x148] ss:$16 sps:$4 sm:$0xff]  }
  0x85   :  { %1576 = vmatpush1.bf16.msra.mxu0 %v6628_v40  ;;  %v6718_v40 = vld [vmem:[#allocation2 + $0x248] ss:$16 sps:$4 sm:$0xff]  }
  0x86   :  { %1617 = vmatpush1.bf16.msra.mxu1 %v6631_v41  ;;  %1577 = vmatprep.subr.bf16.mxu0 %v6636_v42  ;;  %v6723_v41 = vld [vmem:[#allocation2 + $0x12c] ss:$16 sps:$4 sm:$0xff]  }
  0x87   :  { %1643 = vmatprep.subr.bf16.mxu1 %v6640_v44  ;;  %v6726_v42 = vld [vmem:[#allocation2 + $0x22c] ss:$16 sps:$4 sm:$0xff]   ;;  %v6724_v44 = vld [vmem:[#allocation2 + $0x228] ss:$16 sps:$4 sm:$0xff]  }
  0x89   :  { %1635 = vmatmul.mubr.bf16.vlgmr.msra.gmra.mxu1 %v7694_v46  ;;  %1578 = vmatpush2.bf16.msra.mxu0 %v6634_v45  ;;  %v6729_v45 = vld [vmem:[#allocation2 + $0x10c] ss:$16 sps:$4 sm:$0xff]  }
  0x8a   :  { %1644 = vmatpush1.bf16.msra.mxu1 %v6638_v47  ;;  %1579 = vmatprep.subr.bf16.mxu0 %v6643_v49  ;;  %v6732_v47 = vld [vmem:[#allocation2 + $0x20c] ss:$16 sps:$4 sm:$0xff]   ;;  %v6727_v49 = vld [vmem:[#allocation2 + $0x108] ss:$16 sps:$4 sm:$0xff]  }
  0x8b   :  { %1645 = vmatprep.subr.bf16.mxu1 %v6646_v50  ;;  %1675 = vmatprep.mubr.bf16.mxu1 %v7665_v48  ;;  %v6667_v48 = vld [vmem:[#allocation2 + $0x544] ss:$16 sps:$4 sm:$0xff]   ;;  %v6730_v50 = vld [vmem:[#allocation2 + $0x208] ss:$16 sps:$4 sm:$0xff]  }
  0x8d   :  { %1580 = vmatpush2.bf16.msra.mxu0 %v6641_v51  ;;  %v6735_v51 = vld [vmem:[#allocation2 + $0x3ec] ss:$16 sps:$4 sm:$0xff]  }
  0x8e   :  { %1646 = vmatpush1.bf16.msra.mxu1 %v6644_v53  ;;  %1581 = vmatprep.subr.bf16.mxu0 %v6649_v54  ;;  %v6738_v53 = vld [vmem:[#allocation2 + $0x4ec] ss:$16 sps:$4 sm:$0xff]   ;;  %v6733_v54 = vld [vmem:[#allocation2 + $0x3e8] ss:$16 sps:$4 sm:$0xff]  }
  0x8f   :  { %1647 = vmatprep.subr.bf16.mxu1 %v6652_v55  ;;  %v6736_v55 = vld [vmem:[#allocation2 + $0x4e8] ss:$16 sps:$4 sm:$0xff]  }
  0x91   :  { %1582 = vmatpush2.bf16.msra.mxu0 %v6647_v56  ;;  %v6741_v56 = vld [vmem:[#allocation2 + $0x3cc] ss:$16 sps:$4 sm:$0xff]  }
  0x92   :  { %1648 = vmatpush1.bf16.msra.mxu1 %v6650_v57  ;;  %1583 = vmatprep.subr.bf16.mxu0 %v6655_v58  ;;  %v6744_v57 = vld [vmem:[#allocation2 + $0x4cc] ss:$16 sps:$4 sm:$0xff]   ;;  %v6739_v58 = vld [vmem:[#allocation2 + $0x3c8] ss:$16 sps:$4 sm:$0xff]  }
  0x93   :  { %1649 = vmatprep.subr.bf16.mxu1 %v6658_v59  ;;  %v6742_v59 = vld [vmem:[#allocation2 + $0x4c8] ss:$16 sps:$4 sm:$0xff]  }
  0x95   :  { %1584 = vmatpush2.bf16.msra.mxu0 %v6653_v60  ;;  %v6747_v60 = vld [vmem:[#allocation2 + $0x3ac] ss:$16 sps:$4 sm:$0xff]  }
  0x96   :  { %1650 = vmatpush1.bf16.msra.mxu1 %v6656_v61  ;;  %1585 = vmatprep.subr.bf16.mxu0 %v6661_v62  ;;  %v6750_v61 = vld [vmem:[#allocation2 + $0x4ac] ss:$16 sps:$4 sm:$0xff]   ;;  %v6745_v62 = vld [vmem:[#allocation2 + $0x3a8] ss:$16 sps:$4 sm:$0xff]  }
  0x97   :  { %1651 = vmatprep.subr.bf16.mxu1 %v6664_v63  ;;  %v6748_v63 = vld [vmem:[#allocation2 + $0x4a8] ss:$16 sps:$4 sm:$0xff]  }
  0x99   :  { %1586 = vmatpush2.bf16.msra.mxu0 %v6659_v1  ;;  %v6753_v1 = vld [vmem:[#allocation2 + $0x38c] ss:$16 sps:$4 sm:$0xff]  }
  0x9a   :  { %1652 = vmatpush1.bf16.msra.mxu1 %v6662_v2  ;;  %1587 = vmatprep.subr.bf16.mxu0 %v6667_v48  ;;  %v6756_v2 = vld [vmem:[#allocation2 + $0x48c] ss:$16 sps:$4 sm:$0xff]   ;;  %v6751_v48 = vld [vmem:[#allocation2 + $0x388] ss:$16 sps:$4 sm:$0xff]  }
  0x9b   :  { %1653 = vmatprep.subr.bf16.mxu1 %v6670_v3  ;;  %v6759_v3 = vld [vmem:[#allocation2 + $0x36c] ss:$16 sps:$4 sm:$0xff]  }
  0x9d   :  { %1588 = vmatpush2.bf16.msra.mxu0 %v6665_v4  ;;  %v6762_v4 = vld [vmem:[#allocation2 + $0x46c] ss:$16 sps:$4 sm:$0xff]  }
  0x9e   :  { %1654 = vmatpush1.bf16.msra.mxu1 %v6668_v5  ;;  %1589 = vmatprep.subr.bf16.mxu0 %v6673_v6  ;;  %v6757_v5 = vld [vmem:[#allocation2 + $0x368] ss:$16 sps:$4 sm:$0xff]  }
  0x9f   :  { %1655 = vmatprep.subr.bf16.mxu1 %v6676_v7  ;;  %v6760_v6 = vld [vmem:[#allocation2 + $0x468] ss:$16 sps:$4 sm:$0xff]   ;;  %v6765_v7 = vld [vmem:[#allocation2 + $0x34c] ss:$16 sps:$4 sm:$0xff]  }
  0xa1   :  { %1590 = vmatpush2.bf16.msra.mxu0 %v6671_v10  ;;  %v6768_v10 = vld [vmem:[#allocation2 + $0x44c] ss:$16 sps:$4 sm:$0xff]  }
  0xa2   :  { %1656 = vmatpush1.bf16.msra.mxu1 %v6674_v11  ;;  %1591 = vmatprep.subr.bf16.mxu0 %v6679_v12  ;;  %v6766_v11 = vld [vmem:[#allocation2 + $0x448] ss:$16 sps:$4 sm:$0xff]   ;;  %v6771_v12 = vld [vmem:[#allocation2 + $0x32c] ss:$16 sps:$4 sm:$0xff]  }
  0xa3   :  { %1657 = vmatprep.subr.bf16.mxu1 %v6682_v13  ;;  %v6774_v13 = vld [vmem:[#allocation2 + $0x42c] ss:$16 sps:$4 sm:$0xff]  }
  0xa5   :  { %1592 = vmatpush2.bf16.msra.mxu0 %v6677_v14  ;;  %v6769_v14 = vld [vmem:[#allocation2 + $0x328] ss:$16 sps:$4 sm:$0xff]  }
  0xa6   :  { %1658 = vmatpush1.bf16.msra.mxu1 %v6680_v15  ;;  %1684 = vmatprep.subr.bf16.mxu0 %v6690_v17  ;;  %v6772_v15 = vld [vmem:[#allocation2 + $0x428] ss:$16 sps:$4 sm:$0xff]   ;;  %v6780_v17 = vld [vmem:[#allocation2 + $0x40c] ss:$16 sps:$4 sm:$0xff]  }
  0xa7   :  { %1659 = vmatprep.subr.bf16.mxu1 %v6687_v16  ;;  %v6777_v16 = vld [vmem:[#allocation2 + $0x30c] ss:$16 sps:$4 sm:$0xff]  }
  0xa8   :  { %1594 = vmatmul.mubr.bf16.vlgmr.msra.gmra.mxu0 %v7700_v18 }
  0xa9   :  { %1685 = vmatpush1.bf16.msra.mxu0 %v6688_v20  ;;  %1716 = vmatprep.mubr.bf16.mxu0 %v7670_v52  ;;  %v6717_v52 = vld [vmem:[#allocation2 + $0x14c] ss:$16 sps:$4 sm:$0xff]   ;;  %v6778_v20 = vld [vmem:[#allocation2 + $0x408] ss:$16 sps:$4 sm:$0xff]  }
  0xaa   :  { %1660 = vmatpush2.bf16.msra.mxu1 %v6685_v19  ;;  %1686 = vmatprep.subr.bf16.mxu0 %v6696_v22  ;;  %v6775_v19 = vld [vmem:[#allocation2 + $0x308] ss:$16 sps:$4 sm:$0xff]   ;;  %v6786_v22 = vld [vmem:[#allocation2 + $0x6ec] ss:$16 sps:$4 sm:$0xff]  }
  0xab   :  { %1661 = vmatprep.subr.bf16.mxu1 %v6693_v21  ;;  %v6783_v21 = vld [vmem:[#allocation2 + $0x5ec] ss:$16 sps:$4 sm:$0xff]  }
  0xad   :  { %1687 = vmatpush1.bf16.msra.mxu0 %v6694_v24  ;;  %v6784_v24 = vld [vmem:[#allocation2 + $0x6e8] ss:$16 sps:$4 sm:$0xff]  }
  0xae   :  { %1662 = vmatpush2.bf16.msra.mxu1 %v6691_v23  ;;  %1688 = vmatprep.subr.bf16.mxu0 %v6702_v26  ;;  %v6781_v23 = vld [vmem:[#allocation2 + $0x5e8] ss:$16 sps:$4 sm:$0xff]   ;;  %v6792_v26 = vld [vmem:[#allocation2 + $0x6cc] ss:$16 sps:$4 sm:$0xff]  }
  0xaf   :  { %1663 = vmatprep.subr.bf16.mxu1 %v6699_v25  ;;  %v6789_v25 = vld [vmem:[#allocation2 + $0x5cc] ss:$16 sps:$4 sm:$0xff]  }
  0xb1   :  { %1689 = vmatpush1.bf16.msra.mxu0 %v6700_v28  ;;  %v6790_v28 = vld [vmem:[#allocation2 + $0x6c8] ss:$16 sps:$4 sm:$0xff]  }
  0xb2   :  { %1664 = vmatpush2.bf16.msra.mxu1 %v6697_v27  ;;  %1690 = vmatprep.subr.bf16.mxu0 %v6708_v30  ;;  %v6787_v27 = vld [vmem:[#allocation2 + $0x5c8] ss:$16 sps:$4 sm:$0xff]   ;;  %v6798_v30 = vld [vmem:[#allocation2 + $0x6ac] ss:$16 sps:$4 sm:$0xff]  }
  0xb3   :  { %1665 = vmatprep.subr.bf16.mxu1 %v6705_v29  ;;  %v6795_v29 = vld [vmem:[#allocation2 + $0x5ac] ss:$16 sps:$4 sm:$0xff]  }
  0xb5   :  { %1691 = vmatpush1.bf16.msra.mxu0 %v6706_v32  ;;  %v6796_v32 = vld [vmem:[#allocation2 + $0x6a8] ss:$16 sps:$4 sm:$0xff]  }
  0xb6   :  { %1666 = vmatpush2.bf16.msra.mxu1 %v6703_v31  ;;  %1692 = vmatprep.subr.bf16.mxu0 %v6714_v34  ;;  %v6793_v31 = vld [vmem:[#allocation2 + $0x5a8] ss:$16 sps:$4 sm:$0xff]   ;;  %v6804_v34 = vld [vmem:[#allocation2 + $0x68c] ss:$16 sps:$4 sm:$0xff]  }
  0xb7   :  { %1667 = vmatprep.subr.bf16.mxu1 %v6711_v33  ;;  %v6801_v33 = vld [vmem:[#allocation2 + $0x58c] ss:$16 sps:$4 sm:$0xff]  }
  0xb9   :  { %1693 = vmatpush1.bf16.msra.mxu0 %v6712_v36  ;;  %v6802_v36 = vld [vmem:[#allocation2 + $0x688] ss:$16 sps:$4 sm:$0xff]  }
  0xba   :  { %1668 = vmatpush2.bf16.msra.mxu1 %v6709_v35  ;;  %1694 = vmatprep.subr.bf16.mxu0 %v6720_v38  ;;  %v6799_v35 = vld [vmem:[#allocation2 + $0x588] ss:$16 sps:$4 sm:$0xff]  }
  0xbb   :  { %1669 = vmatprep.subr.bf16.mxu1 %v6717_v52  ;;  %v6810_v52 = vld [vmem:[#allocation2 + $0x66c] ss:$16 sps:$4 sm:$0xff]   ;;  %v6805_v38 = vld [vmem:[#allocation2 + $0x568] ss:$16 sps:$4 sm:$0xff]  }
  0xbd   :  { %1695 = vmatpush1.bf16.msra.mxu0 %v6718_v40  ;;  %v6813_v40 = vld [vmem:[#allocation2 + $0x54c] ss:$16 sps:$4 sm:$0xff]  }
  0xbe   :  { %1670 = vmatpush2.bf16.msra.mxu1 %v6715_v39  ;;  %1696 = vmatprep.subr.bf16.mxu0 %v6726_v42  ;;  %v6808_v39 = vld [vmem:[#allocation2 + $0x668] ss:$16 sps:$4 sm:$0xff]  }
  0xbf   :  { %1671 = vmatprep.subr.bf16.mxu1 %v6723_v41  ;;  %v6816_v41 = vld [vmem:[#allocation2 + $0x64c] ss:$16 sps:$4 sm:$0xff]   ;;  %v6811_v42 = vld [vmem:[#allocation2 + $0x548] ss:$16 sps:$4 sm:$0xff]  }
  0xc1   :  { %1697 = vmatpush1.bf16.msra.mxu0 %v6724_v44  ;;  %v6819_v44 = vld [vmem:[#allocation2 + $0x52c] ss:$16 sps:$4 sm:$0xff]  }
  0xc2   :  { %1672 = vmatpush2.bf16.msra.mxu1 %v6721_v43  ;;  %1698 = vmatprep.subr.bf16.mxu0 %v6732_v47  ;;  %v6814_v43 = vld [vmem:[#allocation2 + $0x648] ss:$16 sps:$4 sm:$0xff]  }
  0xc3   :  { %1673 = vmatprep.subr.bf16.mxu1 %v6729_v45  ;;  %v6822_v45 = vld [vmem:[#allocation2 + $0x62c] ss:$16 sps:$4 sm:$0xff]   ;;  %v6817_v47 = vld [vmem:[#allocation2 + $0x528] ss:$16 sps:$4 sm:$0xff]  }
  0xc5   :  { %1699 = vmatpush1.bf16.msra.mxu0 %v6730_v50  ;;  %v6825_v50 = vld [vmem:[#allocation2 + $0x50c] ss:$16 sps:$4 sm:$0xff]  }
  0xc6   :  { %1674 = vmatpush2.bf16.msra.mxu1 %v6727_v49  ;;  %1700 = vmatprep.subr.bf16.mxu0 %v6735_v51  ;;  %v6820_v49 = vld [vmem:[#allocation2 + $0x628] ss:$16 sps:$4 sm:$0xff]   ;;  %v6828_v51 = vld [vmem:[#allocation2 + $0x60c] ss:$16 sps:$4 sm:$0xff]  }
  0xc7   :  { %1725 = vmatprep.subr.bf16.mxu1 %v6738_v53  ;;  %v6823_v53 = vld [vmem:[#allocation2 + $0x508] ss:$16 sps:$4 sm:$0xff]  }
  0xc9   :  { %1676 = vmatmul.mubr.bf16.vlgmr.msra.gmra.mxu1 %v7674_v8  ;;  %1701 = vmatpush2.bf16.msra.mxu0 %v6733_v54  ;;  %v6754_v8 = vld [vmem:[#allocation2 + $0x488] ss:$16 sps:$4 sm:$0xff]  }
  0xca   :  { %1726 = vmatpush1.bf16.msra.mxu1 %v6736_v55  ;;  %1702 = vmatprep.subr.bf16.mxu0 %v6741_v56  ;;  %v6826_v54 = vld [vmem:[#allocation2 + $0x608] ss:$16 sps:$4 sm:$0xff]  }
  0xcb   :  { %1727 = vmatprep.subr.bf16.mxu1 %v6744_v57  ;;  %1757 = vmatprep.mubr.bf16.mxu1 %v7688_v37  ;;  %v6763_v37 = vld [vmem:[#allocation2 + $0x348] ss:$16 sps:$4 sm:$0xff]   ;;  %v6834_v57 = vld [vmem:[#allocation4 + $0x154] ss:$28 sps:$4 sm:$0xff]  }
  0xcc   :  { %v6831_v55 = vld [vmem:[#allocation4 + $0x18c] ss:$28 sps:$4 sm:$0xff]  }
  0xcd   :  { %1703 = vmatpush2.bf16.msra.mxu0 %v6739_v58  ;;  %v6829_v56 = vld [vmem:[#allocation4 + $0x188] ss:$28 sps:$4 sm:$0xff]   ;;  %v6832_v58 = vld [vmem:[#allocation4 + $0x150] ss:$28 sps:$4 sm:$0xff]  }
  0xce   :  { %1728 = vmatpush1.bf16.msra.mxu1 %v6742_v59  ;;  %1704 = vmatprep.subr.bf16.mxu0 %v6747_v60  ;;  %v6837_v59 = vld [vmem:[#allocation4 + $0x11c] ss:$28 sps:$4 sm:$0xff]  }
  0xcf   :  { %1729 = vmatprep.subr.bf16.mxu1 %v6750_v61  ;;  %v6835_v60 = vld [vmem:[#allocation4 + $0x118] ss:$28 sps:$4 sm:$0xff]   ;;  %v6840_v61 = vld [vmem:[#allocation4 + $0xe4] ss:$28 sps:$4 sm:$0xff]  }
  0xd1   :  { %1705 = vmatpush2.bf16.msra.mxu0 %v6745_v62  ;;  %v6838_v62 = vld [vmem:[#allocation4 + $0xe0] ss:$28 sps:$4 sm:$0xff]  }
  0xd2   :  { %1730 = vmatpush1.bf16.msra.mxu1 %v6748_v63  ;;  %1706 = vmatprep.subr.bf16.mxu0 %v6753_v1  ;;  %v6901_v63 = vld [vmem:[#allocation4 + $0x508] ss:$28 sps:$4 sm:$0xff]  }
  0xd3   :  { %1731 = vmatprep.subr.bf16.mxu1 %v6756_v2  ;;  %v6903_v1 = vld [vmem:[#allocation4 + $0x50c] ss:$28 sps:$4 sm:$0xff]  }
  0xd4   :  { %v6843_v2 = vld [vmem:[#allocation4 + $0xac] ss:$28 sps:$4 sm:$0xff]  }
  0xd5   :  { %1707 = vmatpush2.bf16.msra.mxu0 %v6751_v48  ;;  %v6841_v48 = vld [vmem:[#allocation4 + $0xa8] ss:$28 sps:$4 sm:$0xff]  }
  0xd6   :  { %1732 = vmatpush1.bf16.msra.mxu1 %v6754_v8  ;;  %1708 = vmatprep.subr.bf16.mxu0 %v6759_v3  ;;  %v6909_v8 = vld [vmem:[#allocation4 + $0x4d4] ss:$28 sps:$4 sm:$0xff]  }
  0xd7   :  { %1733 = vmatprep.subr.bf16.mxu1 %v6762_v4  ;;  %v6844_v3 = vld [vmem:[#allocation4 + $0x70] ss:$28 sps:$4 sm:$0xff]   ;;  %v6913_v4 = vld [vmem:[#allocation4 + $0x498] ss:$28 sps:$4 sm:$0xff]  }
  0xd9   :  { %1709 = vmatpush2.bf16.msra.mxu0 %v6757_v5  ;;  %v6915_v5 = vld [vmem:[#allocation4 + $0x49c] ss:$28 sps:$4 sm:$0xff]  }
  0xda   :  { %1734 = vmatpush1.bf16.msra.mxu1 %v6760_v6  ;;  %1710 = vmatprep.subr.bf16.mxu0 %v6765_v7  ;;  %v6849_v6 = vld [vmem:[#allocation4 + $0x3c] ss:$28 sps:$4 sm:$0xff]  }
  0xdb   :  { %1735 = vmatprep.subr.bf16.mxu1 %v6768_v10  ;;  %v6847_v7 = vld [vmem:[#allocation4 + $0x38] ss:$28 sps:$4 sm:$0xff]   ;;  %v6919_v10 = vld [vmem:[#allocation4 + $0x460] ss:$28 sps:$4 sm:$0xff]  }
  0xdd   :  { %1711 = vmatpush2.bf16.msra.mxu0 %v6763_v37  ;;  %v6921_v37 = vld [vmem:[#allocation4 + $0x464] ss:$28 sps:$4 sm:$0xff]  }
  0xde   :  { %1736 = vmatpush1.bf16.msra.mxu1 %v6766_v11  ;;  %1712 = vmatprep.subr.bf16.mxu0 %v6771_v12  ;;  %v6852_v11 = vld [vmem:[#allocation4 + $0x4] ss:$28 sps:$4 sm:$0xff]  }
  0xdf   :  { %1737 = vmatprep.subr.bf16.mxu1 %v6774_v13  ;;  %v6850_v12 = vld [vmem:[#allocation4] ss:$28 sps:$4 sm:$0xff]   ;;  %v6925_v13 = vld [vmem:[#allocation4 + $0x428] ss:$28 sps:$4 sm:$0xff]  }
  0xe1   :  { %1713 = vmatpush2.bf16.msra.mxu0 %v6769_v14  ;;  %v6927_v14 = vld [vmem:[#allocation4 + $0x42c] ss:$28 sps:$4 sm:$0xff]  }
  0xe2   :  { %1738 = vmatpush1.bf16.msra.mxu1 %v6772_v15  ;;  %1714 = vmatprep.subr.bf16.mxu0 %v6777_v16  ;;  %v6855_v15 = vld [vmem:[#allocation4 + $0x34c] ss:$28 sps:$4 sm:$0xff]  }
  0xe3   :  { %1739 = vmatprep.subr.bf16.mxu1 %v6780_v17  ;;  %v6853_v16 = vld [vmem:[#allocation4 + $0x348] ss:$28 sps:$4 sm:$0xff]   ;;  %v6931_v17 = vld [vmem:[#allocation4 + $0x3f0] ss:$28 sps:$4 sm:$0xff]  }
  0xe5   :  { %1715 = vmatpush2.bf16.msra.mxu0 %v6775_v19  ;;  %v6933_v19 = vld [vmem:[#allocation4 + $0x3f4] ss:$28 sps:$4 sm:$0xff]  }
  0xe6   :  { %1740 = vmatpush1.bf16.msra.mxu1 %v6778_v20  ;;  %1766 = vmatprep.subr.bf16.mxu0 %v6786_v22  ;;  %v6858_v20 = vld [vmem:[#allocation4 + $0x314] ss:$28 sps:$4 sm:$0xff]  }
  0xe7   :  { %1741 = vmatprep.subr.bf16.mxu1 %v6783_v21  ;;  %v6856_v21 = vld [vmem:[#allocation4 + $0x310] ss:$28 sps:$4 sm:$0xff]  }
  0xe8   :  { %1717 = vmatmul.mubr.bf16.vlgmr.msra.gmra.mxu0 %v7676_v9  ;;  %v6807_v9 = vld [vmem:[#allocation2 + $0x56c] ss:$16 sps:$4 sm:$0xff]  }
  0xe9   :  { %1767 = vmatpush1.bf16.msra.mxu0 %v6784_v24  ;;  %1798 = vmatprep.mubr.bf16.mxu0 %v7596_v0 }
  0xea   :  { %1742 = vmatpush2.bf16.msra.mxu1 %v6781_v23  ;;  %1768 = vmatprep.subr.bf16.mxu0 %v6792_v26  ;;  %v6861_v26 = vld [vmem:[#allocation4 + $0x2dc] ss:$28 sps:$4 sm:$0xff]  }
  0xeb   :  { %1743 = vmatprep.subr.bf16.mxu1 %v6789_v25 }
  0xed   :  { %1769 = vmatpush1.bf16.msra.mxu0 %v6790_v28  ;;  %v6859_v28 = vld [vmem:[#allocation4 + $0x2d8] ss:$28 sps:$4 sm:$0xff]  }
  0xee   :  { %1744 = vmatpush2.bf16.msra.mxu1 %v6787_v27  ;;  %1770 = vmatprep.subr.bf16.mxu0 %v6798_v30  ;;  %v6939_v27 = vld [vmem:[#allocation4 + $0x3bc] ss:$28 sps:$4 sm:$0xff]  }
  0xef   :  { %1745 = vmatprep.subr.bf16.mxu1 %v6795_v29  ;;  %v6937_v29 = vld [vmem:[#allocation4 + $0x3b8] ss:$28 sps:$4 sm:$0xff]  }
  0xf1   :  { %1771 = vmatpush1.bf16.msra.mxu0 %v6796_v32 }
  0xf2   :  { %1746 = vmatpush2.bf16.msra.mxu1 %v6793_v31  ;;  %1772 = vmatprep.subr.bf16.mxu0 %v6804_v34  ;;  %v6864_v34 = vld [vmem:[#allocation4 + $0x2a4] ss:$28 sps:$4 sm:$0xff]  }
  0xf3   :  { %1747 = vmatprep.subr.bf16.mxu1 %v6801_v33 }
  0xf5   :  { %1773 = vmatpush1.bf16.msra.mxu0 %v6802_v36  ;;  %v6945_v36 = vld [vmem:[#allocation4 + $0x384] ss:$28 sps:$4 sm:$0xff]  }
  0xf6   :  { %1748 = vmatpush2.bf16.msra.mxu1 %v6799_v35  ;;  %1774 = vmatprep.subr.bf16.mxu0 %v6810_v52  ;;  %v6943_v35 = vld [vmem:[#allocation4 + $0x380] ss:$28 sps:$4 sm:$0xff]   ;;  %v6949_v52 = vld [vmem:[#allocation4 + $0x6c8] ss:$28 sps:$4 sm:$0xff]  }
  0xf7   :  { %1749 = vmatprep.subr.bf16.mxu1 %v6807_v9  ;;  %v6862_v9 = vld [vmem:[#allocation4 + $0x2a0] ss:$28 sps:$4 sm:$0xff]  }
  0xf9   :  { %1775 = vmatpush1.bf16.msra.mxu0 %v6808_v39  ;;  %v6867_v39 = vld [vmem:[#allocation4 + $0x26c] ss:$28 sps:$4 sm:$0xff]  }
  0xfa   :  { %1750 = vmatpush2.bf16.msra.mxu1 %v6805_v38  ;;  %1776 = vmatprep.subr.bf16.mxu0 %v6816_v41  ;;  %v6951_v38 = vld [vmem:[#allocation4 + $0x6cc] ss:$28 sps:$4 sm:$0xff]  }
  0xfb   :  { %1751 = vmatprep.subr.bf16.mxu1 %v6813_v40  ;;  %v6865_v40 = vld [vmem:[#allocation4 + $0x268] ss:$28 sps:$4 sm:$0xff]   ;;  %v6955_v41 = vld [vmem:[#allocation4 + $0x690] ss:$28 sps:$4 sm:$0xff]  }
  0xfd   :  { %1777 = vmatpush1.bf16.msra.mxu0 %v6814_v43  ;;  %v6870_v43 = vld [vmem:[#allocation4 + $0x234] ss:$28 sps:$4 sm:$0xff]  }
  0xfe   :  { %1752 = vmatpush2.bf16.msra.mxu1 %v6811_v42  ;;  %1778 = vmatprep.subr.bf16.mxu0 %v6822_v45  ;;  %v6957_v42 = vld [vmem:[#allocation4 + $0x694] ss:$28 sps:$4 sm:$0xff]  }
  0xff   :  { %1753 = vmatprep.subr.bf16.mxu1 %v6819_v44  ;;  %v6868_v44 = vld [vmem:[#allocation4 + $0x230] ss:$28 sps:$4 sm:$0xff]   ;;  %v6961_v45 = vld [vmem:[#allocation4 + $0x658] ss:$28 sps:$4 sm:$0xff]  }
 0x101   :  { %1779 = vmatpush1.bf16.msra.mxu0 %v6820_v49  ;;  %v6873_v49 = vld [vmem:[#allocation4 + $0x1fc] ss:$28 sps:$4 sm:$0xff]  }
 0x102   :  { %1754 = vmatpush2.bf16.msra.mxu1 %v6817_v47  ;;  %1780 = vmatprep.subr.bf16.mxu0 %v6828_v51  ;;  %v6963_v47 = vld [vmem:[#allocation4 + $0x65c] ss:$28 sps:$4 sm:$0xff]  }
 0x103   :  { %1755 = vmatprep.subr.bf16.mxu1 %v6825_v50  ;;  %v6871_v50 = vld [vmem:[#allocation4 + $0x1f8] ss:$28 sps:$4 sm:$0xff]   ;;  %v6967_v51 = vld [vmem:[#allocation4 + $0x620] ss:$28 sps:$4 sm:$0xff]  }
 0x105   :  { %1781 = vmatpush1.bf16.msra.mxu0 %v6826_v54  ;;  %v6876_v54 = vld [vmem:[#allocation4 + $0x1c4] ss:$28 sps:$4 sm:$0xff]  }
 0x106   :  { %1756 = vmatpush2.bf16.msra.mxu1 %v6823_v53  ;;  %3260 = vmatprep.subr.bf16.mxu0 %v6831_v55  ;;  %v6969_v53 = vld [vmem:[#allocation4 + $0x624] ss:$28 sps:$4 sm:$0xff]  }
 0x107   :  { %3301 = vmatprep.subr.bf16.mxu1 %v6903_v1  ;;  %v6874_v55 = vld [vmem:[#allocation4 + $0x1c0] ss:$28 sps:$4 sm:$0xff]   ;;  %v6985_v1 = vld [vmem:[#allocation4 + $0x578] ss:$28 sps:$4 sm:$0xff]  }
 0x108   :  { %1799 = vmatmul.mubr.bf16.vlgmr.msra.gmra.mxu0 %v7694_v46  ;;  %v6846_v46 = vld [vmem:[#allocation4 + $0x74] ss:$28 sps:$4 sm:$0xff]  }
 0x109   :  { %1758 = vmatmul.mubr.bf16.vlgmr.msra.gmra.mxu1 %v7700_v18  ;;  %3261 = vmatpush1.bf16.msra.mxu0 %v6829_v56  ;;  %v6907_v18 = vld [vmem:[#allocation4 + $0x4d0] ss:$28 sps:$4 sm:$0xff]   ;;  %v6973_v56 = vld [vmem:[#allocation4 + $0x5e8] ss:$28 sps:$4 sm:$0xff]  }
 0x10a   :  { %3262 = vmatprep.subr.bf16.mxu0 %v6834_v57  ;;  %3302 = vmatpush1.bf16.msra.mxu1 %v6901_v63  ;;  %v6975_v57 = vld [vmem:[#allocation4 + $0x5ec] ss:$28 sps:$4 sm:$0xff]   ;;  %v6987_v63 = vld [vmem:[#allocation4 + $0x57c] ss:$28 sps:$4 sm:$0xff]  }
 0x10b   :  { %3303 = vmatprep.subr.bf16.mxu1 %v6909_v8  ;;  %v6991_v8 = vld [vmem:[#allocation4 + $0x540] ss:$28 sps:$4 sm:$0xff]  }
 0x10d   :  { %3263 = vmatpush1.bf16.msra.mxu0 %v6832_v58  ;;  %v6879_v58 = vld [vmem:[#allocation4 + $0x194] ss:$28 sps:$4 sm:$0xff]  }
 0x10e   :  { %3264 = vmatprep.subr.bf16.mxu0 %v6837_v59  ;;  %3304 = vmatpush1.bf16.msra.mxu1 %v6907_v18  ;;  %v6979_v59 = vld [vmem:[#allocation4 + $0x5b0] ss:$28 sps:$4 sm:$0xff]   ;;  %v6993_v18 = vld [vmem:[#allocation4 + $0x544] ss:$28 sps:$4 sm:$0xff]  }
 0x10f   :  { %3305 = vmatprep.subr.bf16.mxu1 %v6915_v5  ;;  %v7724_v5 = vld [vmem:[%s7986_s3] sm:$0xf] }
 0x111   :  { %3265 = vmatpush1.bf16.msra.mxu0 %v6835_v60  ;;  %v6981_v60 = vld [vmem:[#allocation4 + $0x5b4] ss:$28 sps:$4 sm:$0xff]  }
 0x112   :  { %3266 = vmatprep.subr.bf16.mxu0 %v6840_v61  ;;  %3306 = vmatpush1.bf16.msra.mxu1 %v6913_v4 }
 0x113   :  { %3307 = vmatprep.subr.bf16.mxu1 %v6921_v37 }
 0x115   :  { %3267 = vmatpush1.bf16.msra.mxu0 %v6838_v62 }
 0x116   :  { %3268 = vmatprep.subr.bf16.mxu0 %v6843_v2  ;;  %3308 = vmatpush1.bf16.msra.mxu1 %v6919_v10 }
 0x117   :  { %3309 = vmatprep.subr.bf16.mxu1 %v6927_v14 }
 0x119   :  { %3269 = vmatpush1.bf16.msra.mxu0 %v6841_v48 }
 0x11a   :  { %3270 = vmatprep.subr.bf16.mxu0 %v6846_v46  ;;  %3310 = vmatpush1.bf16.msra.mxu1 %v6925_v13  ;;  %v6999_v46 = vld [vmem:[#allocation4 + $0x514] ss:$28 sps:$4 sm:$0xff]  }
 0x11b   :  { %3311 = vmatprep.subr.bf16.mxu1 %v6933_v19 }
 0x11d   :  { %3271 = vmatpush1.bf16.msra.mxu0 %v6844_v3  ;;  %v314_v3 = vlaneseq }
 0x11e   :  { %3272 = vmatprep.subr.bf16.mxu0 %v6849_v6  ;;  %3312 = vmatpush1.bf16.msra.mxu1 %v6931_v17 }
 0x11f   :  { %3313 = vmatprep.subr.bf16.mxu1 %v6939_v27  ;;  %v7719_v4 = vshrl.u32 %v314_v3, 7 }
 0x121   :  { %3273 = vmatpush1.bf16.msra.mxu0 %v6847_v7  ;;  %v7727_v6 = vsub.s32 0, %v7719_v4  ;;  %v7730_v7 = vsub.s32 1, %v7719_v4 }
 0x122   :  { %3274 = vmatprep.subr.bf16.mxu0 %v6852_v11  ;;  %3314 = vmatpush1.bf16.msra.mxu1 %v6937_v29 }
 0x123   :  { %3315 = vmatprep.subr.bf16.mxu1 %v6945_v36  ;;  %v317_v10 = vrot.slane %v7724_v5, %v7727_v6  ;;  %v321_v37 = vrot.slane %v7724_v5, %v7730_v7  ;;  %v6889_v36 = vld [vmem:[#allocation4 + $0xb0] ss:$28 sps:$4 sm:$0xff]  }
 0x125   :  { %3275 = vmatpush1.bf16.msra.mxu0 %v6850_v12 }
 0x126   :  { %3276 = vmatprep.subr.bf16.mxu0 %v6855_v15  ;;  %3316 = vmatpush1.bf16.msra.mxu1 %v6943_v35  ;;  %v6891_v35 = vld [vmem:[#allocation4 + $0xb4] ss:$28 sps:$4 sm:$0xff]  }
 0x127   :  { %3317 = vmatprep.subr.bf16.mxu1 %v6951_v38  ;;  %v6897_v38 = vld [vmem:[#allocation4 + $0x44] ss:$28 sps:$4 sm:$0xff]  }
 0x128   :  { %v7710_v22 = vpop.f32.mrf.mxu0 }
 0x129   :  { %v7712_v23 = vpop.f32.mrf.mxu1  ;;  %3277 = vmatpush2.bf16.msra.mxu0 %v6853_v16  ;;  %v1514_v11 = vadd.f32 %v7710_v22, %v317_v10  ;;  %v6952_v10 = vld [vmem:[#allocation4 + $0x198] ss:$28 sps:$4 sm:$0xff]  }
 0x12a   :  { %v7714_v24 = vpop.f32.mrf.mxu0  ;;  %3278 = vmatprep.subr.bf16.mxu0 %v6858_v20  ;;  %3318 = vmatpush2.bf16.msra.mxu1 %v6949_v52  ;;  %v6892_v52 = vld [vmem:[#allocation4 + $0x78] ss:$28 sps:$4 sm:$0xff]  }
 0x12b   :  { %v7716_v25 = vpop.f32.mrf.mxu1  ;;  %3319 = vmatprep.subr.bf16.mxu1 %v6957_v42  ;;  %v1516_v12 = vadd.f32 %v7714_v24, %v321_v37  ;;  %v1555_v13 = vadd.f32 %v7712_v23, %v1514_v11  ;;  %v6882_v24 = vld [vmem:[#allocation4 + $0x15c] ss:$28 sps:$4 sm:$0xff]   ;;  %v6900_v42 = vld [vmem:[#allocation4 + $0xc] ss:$28 sps:$4 sm:$0xff]   ;;  %v6960_v37 = vld [vmem:[#allocation4 + $0x164] ss:$28 sps:$4 sm:$0xff]  }
 0x12c   :  { %v1517_v30 = vpop.f32.mrf.mxu0  ;;  %v6880_v23 = vld [vmem:[#allocation4 + $0x158] ss:$28 sps:$4 sm:$0xff]   ;;  %v6958_v11 = vld [vmem:[#allocation4 + $0x160] ss:$28 sps:$4 sm:$0xff]  }
 0x12d   :  { %v1558_v31 = vpop.f32.mrf.mxu1  ;;  %3279 = vmatpush2.bf16.msra.mxu0 %v6856_v21  ;;  %v1557_v15 = vadd.f32 %v7716_v25, %v1516_v12  ;;  %v6885_v25 = vld [vmem:[#allocation4 + $0x124] ss:$28 sps:$4 sm:$0xff]   ;;  %v6966_v12 = vld [vmem:[#allocation4 + $0x12c] ss:$28 sps:$4 sm:$0xff]  }
 0x12e   :  { %v1518_v32 = vpop.f32.mrf.mxu0  ;;  %3280 = vmatprep.subr.bf16.mxu0 %v6861_v26  ;;  %3320 = vmatpush2.bf16.msra.mxu1 %v6955_v41  ;;  %v6877_v31 = vld [vmem:[#allocation4 + $0x190] ss:$28 sps:$4 sm:$0xff]  }
 0x12f   :  { %v1559_v33 = vpop.f32.mrf.mxu1  ;;  %3321 = vmatprep.subr.bf16.mxu1 %v6963_v47  ;;  %v6883_v32 = vld [vmem:[#allocation4 + $0x120] ss:$28 sps:$4 sm:$0xff]   ;;  %v6906_v47 = vld [vmem:[#allocation4 + $0x354] ss:$28 sps:$4 sm:$0xff]  }
 0x130   :  { %v6888_v33 = vld [vmem:[#allocation4 + $0xec] ss:$28 sps:$4 sm:$0xff]  }
 0x131   :  { %3281 = vmatpush2.bf16.msra.mxu0 %v6859_v28 }
 0x132   :  { %3282 = vmatprep.subr.bf16.mxu0 %v6864_v34  ;;  %3322 = vmatpush2.bf16.msra.mxu1 %v6961_v45  ;;  %v6886_v34 = vld [vmem:[#allocation4 + $0xe8] ss:$28 sps:$4 sm:$0xff]  }
 0x133   :  { %3323 = vmatprep.subr.bf16.mxu1 %v6969_v53  ;;  %v6918_v53 = vld [vmem:[#allocation4 + $0x2e4] ss:$28 sps:$4 sm:$0xff]  }
 0x135   :  { %3283 = vmatpush2.bf16.msra.mxu0 %v6862_v9  ;;  %v6894_v9 = vld [vmem:[#allocation4 + $0x7c] ss:$28 sps:$4 sm:$0xff]  }
 0x136   :  { %3284 = vmatprep.subr.bf16.mxu0 %v6867_v39  ;;  %3324 = vmatpush2.bf16.msra.mxu1 %v6967_v51  ;;  %v6910_v51 = vld [vmem:[#allocation4 + $0x318] ss:$28 sps:$4 sm:$0xff]  }
 0x137   :  { %3325 = vmatprep.subr.bf16.mxu1 %v6975_v57  ;;  %v6930_v57 = vld [vmem:[#allocation4 + $0x274] ss:$28 sps:$4 sm:$0xff]  }
 0x139   :  { %3285 = vmatpush2.bf16.msra.mxu0 %v6865_v40  ;;  %v6895_v40 = vld [vmem:[#allocation4 + $0x40] ss:$28 sps:$4 sm:$0xff]  }
 0x13a   :  { %3286 = vmatprep.subr.bf16.mxu0 %v6870_v43  ;;  %3326 = vmatpush2.bf16.msra.mxu1 %v6973_v56  ;;  %v6922_v56 = vld [vmem:[#allocation4 + $0x2a8] ss:$28 sps:$4 sm:$0xff]  }
 0x13b   :  { %3327 = vmatprep.subr.bf16.mxu1 %v6981_v60  ;;  %v6934_v60 = vld [vmem:[#allocation4 + $0x238] ss:$28 sps:$4 sm:$0xff]  }
 0x13d   :  { %3287 = vmatpush2.bf16.msra.mxu0 %v6868_v44  ;;  %v6898_v44 = vld [vmem:[#allocation4 + $0x8] ss:$28 sps:$4 sm:$0xff]  }
 0x13e   :  { %3288 = vmatprep.subr.bf16.mxu0 %v6873_v49  ;;  %3328 = vmatpush2.bf16.msra.mxu1 %v6979_v59  ;;  %v6904_v49 = vld [vmem:[#allocation4 + $0x350] ss:$28 sps:$4 sm:$0xff]   ;;  %v6936_v59 = vld [vmem:[#allocation4 + $0x23c] ss:$28 sps:$4 sm:$0xff]  }
 0x13f   :  { %3329 = vmatprep.subr.bf16.mxu1 %v6987_v63  ;;  %v6940_v63 = vld [vmem:[#allocation4 + $0x200] ss:$28 sps:$4 sm:$0xff]  }
 0x141   :  { %3289 = vmatpush2.bf16.msra.mxu0 %v6871_v50  ;;  %v6912_v50 = vld [vmem:[#allocation4 + $0x31c] ss:$28 sps:$4 sm:$0xff]  }
 0x142   :  { %3290 = vmatprep.subr.bf16.mxu0 %v6876_v54  ;;  %3330 = vmatpush2.bf16.msra.mxu1 %v6985_v1  ;;  %v6916_v54 = vld [vmem:[#allocation4 + $0x2e0] ss:$28 sps:$4 sm:$0xff]   ;;  %v6948_v1 = vld [vmem:[#allocation4 + $0x1cc] ss:$28 sps:$4 sm:$0xff]  }
 0x143   :  { %3331 = vmatprep.subr.bf16.mxu1 %v6993_v18  ;;  %v6946_v18 = vld [vmem:[#allocation4 + $0x1c8] ss:$28 sps:$4 sm:$0xff]  }
 0x145   :  { %3291 = vmatpush2.bf16.msra.mxu0 %v6874_v55  ;;  %v6924_v55 = vld [vmem:[#allocation4 + $0x2ac] ss:$28 sps:$4 sm:$0xff]  }
 0x146   :  { %3342 = vmatprep.subr.bf16.mxu0 %v6879_v58  ;;  %3332 = vmatpush2.bf16.msra.mxu1 %v6991_v8  ;;  %v6928_v58 = vld [vmem:[#allocation4 + $0x270] ss:$28 sps:$4 sm:$0xff]   ;;  %v6954_v8 = vld [vmem:[#allocation4 + $0x19c] ss:$28 sps:$4 sm:$0xff]  }
 0x147   :  { %3383 = vmatprep.subr.bf16.mxu1 %v6999_v46 }
 0x149   :  { %v1636_v61 = vpop.f32.mrf.mxu1 }
 0x14b   :  { %v1638_v62 = vpop.f32.mrf.mxu1 }
 0x14d   :  { %v1640_v2 = vpop.f32.mrf.mxu1 }
 0x14f   :  { %v1641_v48 = vpop.f32.mrf.mxu1 }
 0x168   :  { %v1595_v14 = vpop.f32.mrf.mxu0 }
 0x169   :  { %v1596_v16 = vadd.f32 %v1595_v14, %v1555_v13  ;;  %v6964_v13 = vld [vmem:[#allocation4 + $0x128] ss:$28 sps:$4 sm:$0xff]   ;;  %v6972_v14 = vld [vmem:[#allocation4 + $0xf4] ss:$28 sps:$4 sm:$0xff]  }
 0x16a   :  { %v1597_v17 = vpop.f32.mrf.mxu0 }
 0x16b   :  { %v1637_v19 = vadd.f32 %v1636_v61, %v1596_v16  ;;  %v1598_v20 = vadd.f32 %v1597_v17, %v1557_v15  ;;  %v6942_v61 = vld [vmem:[#allocation4 + $0x204] ss:$28 sps:$4 sm:$0xff]   ;;  %v7754_v15 = vsub.s32 2, %v7719_v4  ;;  %v6970_v16 = vld [vmem:[#allocation4 + $0xf0] ss:$28 sps:$4 sm:$0xff]  }
 0x16c   :  { %v1599_v21 = vpop.f32.mrf.mxu0  ;;  %v6978_v17 = vld [vmem:[#allocation4 + $0xbc] ss:$28 sps:$4 sm:$0xff]  }
 0x16d   :  { %v1639_v26 = vadd.f32 %v1638_v62, %v1598_v20  ;;  %v1807_v27 = vmax.f32 %v1637_v19, 0.0  ;;  %v7757_v19 = vsub.s32 3, %v7719_v4  ;;  %v325_v20 = vrot.slane %v7724_v5, %v7754_v15  ;;  %v6976_v21 = vld [vmem:[#allocation4 + $0xb8] ss:$28 sps:$4 sm:$0xff]  }
 0x16e   :  { %v1600_v28 = vpop.f32.mrf.mxu0 }
 0x16f   :  { %v1808_v29 = vmax.f32 %v1639_v26, 0.0  ;;  %v7742_v22 = vpack.c.bf16 %v1807_v27, %v1807_v27  ;;  %v6984_v26 = vld [vmem:[#allocation4 + $0x84] ss:$28 sps:$4 sm:$0xff]   ;;  %v329_v27 = vrot.slane %v7724_v5, %v7757_v19 }
 0x171   :  { %v7740_v30 = vpack.c.bf16 %v1808_v29, %v1808_v29  ;;  %v6982_v29 = vld [vmem:[#allocation4 + $0x80] ss:$28 sps:$4 sm:$0xff]  }
 0x173   :  { %3292 = vmatprep.mubr.bf16.mxu0 %v7740_v30 }
 0x174   :  { %3293 = vmatmul.mubr.bf16.vlgmr.msra.gmra.mxu0 %v7742_v22 }
 0x175   :  { %3343 = vmatpush1.bf16.msra.mxu0 %v6877_v31  ;;  %3374 = vmatprep.mubr.bf16.mxu0 %v7740_v30  ;;  %v6990_v31 = vld [vmem:[#allocation4 + $0x4c] ss:$28 sps:$4 sm:$0xff]  }
 0x176   :  { %3344 = vmatprep.subr.bf16.mxu0 %v6882_v24 }
 0x179   :  { %3345 = vmatpush1.bf16.msra.mxu0 %v6880_v23 }
 0x17a   :  { %3346 = vmatprep.subr.bf16.mxu0 %v6885_v25 }
 0x17d   :  { %3347 = vmatpush1.bf16.msra.mxu0 %v6883_v32 }
 0x17e   :  { %3348 = vmatprep.subr.bf16.mxu0 %v6888_v33 }
 0x181   :  { %3349 = vmatpush1.bf16.msra.mxu0 %v6886_v34 }
 0x182   :  { %3350 = vmatprep.subr.bf16.mxu0 %v6891_v35  ;;  %v6988_v35 = vld [vmem:[#allocation4 + $0x48] ss:$28 sps:$4 sm:$0xff]  }
 0x185   :  { %3351 = vmatpush1.bf16.msra.mxu0 %v6889_v36 }
 0x186   :  { %3352 = vmatprep.subr.bf16.mxu0 %v6894_v9 }
 0x189   :  { %v7747_v39 = vpop.f32.mrf.mxu1  ;;  %3353 = vmatpush1.bf16.msra.mxu0 %v6892_v52  ;;  %v6996_v52 = vld [vmem:[#allocation4 + $0x14] ss:$28 sps:$4 sm:$0xff]  }
 0x18a   :  { %3354 = vmatprep.subr.bf16.mxu0 %v6897_v38  ;;  %v1678_v28 = vadd.f32 %v7747_v39, %v325_v20  ;;  %v7036_v20 = vld [vmem:[#allocation4 + $0x208] ss:$28 sps:$4 sm:$0xff]  }
 0x18b   :  { %v7749_v41 = vpop.f32.mrf.mxu1 }
 0x18c   :  { %v1680_v24 = vadd.f32 %v7749_v41, %v329_v27  ;;  %v7039_v27 = vld [vmem:[#allocation4 + $0x388] ss:$28 sps:$4 sm:$0xff]  }
 0x18d   :  { %v1681_v43 = vpop.f32.mrf.mxu1  ;;  %3355 = vmatpush1.bf16.msra.mxu0 %v6895_v40 }
 0x18e   :  { %3356 = vmatprep.subr.bf16.mxu0 %v6900_v42  ;;  %v6994_v43 = vld [vmem:[#allocation4 + $0x10] ss:$28 sps:$4 sm:$0xff]  }
 0x18f   :  { %v1682_v45 = vpop.f32.mrf.mxu1 }
 0x191   :  { %3357 = vmatpush1.bf16.msra.mxu0 %v6898_v44 }
 0x192   :  { %3358 = vmatprep.subr.bf16.mxu0 %v6906_v47  ;;  %v7002_v47 = vld [vmem:[#allocation4 + $0x35c] ss:$28 sps:$4 sm:$0xff]  }
 0x195   :  { %3359 = vmatpush2.bf16.msra.mxu0 %v6904_v49 }
 0x196   :  { %3360 = vmatprep.subr.bf16.mxu0 %v6912_v50 }
 0x199   :  { %3361 = vmatpush2.bf16.msra.mxu0 %v6910_v51  ;;  %v6997_v51 = vld [vmem:[#allocation4 + $0x510] ss:$28 sps:$4 sm:$0xff]  }
 0x19a   :  { %3362 = vmatprep.subr.bf16.mxu0 %v6918_v53  ;;  %v7000_v53 = vld [vmem:[#allocation4 + $0x358] ss:$28 sps:$4 sm:$0xff]  }
 0x19d   :  { %3363 = vmatpush2.bf16.msra.mxu0 %v6916_v54 }
 0x19e   :  { %3364 = vmatprep.subr.bf16.mxu0 %v6924_v55  ;;  %v7005_v55 = vld [vmem:[#allocation4 + $0x4dc] ss:$28 sps:$4 sm:$0xff]  }
 0x1a1   :  { %3365 = vmatpush2.bf16.msra.mxu0 %v6922_v56  ;;  %v7008_v56 = vld [vmem:[#allocation4 + $0x324] ss:$28 sps:$4 sm:$0xff]  }
 0x1a2   :  { %3366 = vmatprep.subr.bf16.mxu0 %v6930_v57  ;;  %v7003_v57 = vld [vmem:[#allocation4 + $0x4d8] ss:$28 sps:$4 sm:$0xff]  }
 0x1a5   :  { %3367 = vmatpush2.bf16.msra.mxu0 %v6928_v58  ;;  %v7006_v58 = vld [vmem:[#allocation4 + $0x320] ss:$28 sps:$4 sm:$0xff]  }
 0x1a6   :  { %3368 = vmatprep.subr.bf16.mxu0 %v6936_v59  ;;  %v7011_v59 = vld [vmem:[#allocation4 + $0x4a4] ss:$28 sps:$4 sm:$0xff]  }
 0x1a8   :  { %v1718_v62 = vpop.f32.mrf.mxu0 }
 0x1a9   :  { %3369 = vmatpush2.bf16.msra.mxu0 %v6934_v60  ;;  %v1719_v23 = vadd.f32 %v1718_v62, %v1678_v28  ;;  %v7014_v60 = vld [vmem:[#allocation4 + $0x2ec] ss:$28 sps:$4 sm:$0xff]  }
 0x1aa   :  { %v1720_v2 = vpop.f32.mrf.mxu0  ;;  %3370 = vmatprep.subr.bf16.mxu0 %v6942_v61  ;;  %v7009_v61 = vld [vmem:[#allocation4 + $0x4a0] ss:$28 sps:$4 sm:$0xff]   ;;  %v7012_v62 = vld [vmem:[#allocation4 + $0x2e8] ss:$28 sps:$4 sm:$0xff]   ;;  %v7042_v28 = vld [vmem:[#allocation4 + $0x1d0] ss:$28 sps:$4 sm:$0xff]  }
 0x1ab   :  { %v1721_v33 = vadd.f32 %v1720_v2, %v1680_v24  ;;  %v7015_v2 = vld [vmem:[#allocation4 + $0x468] ss:$28 sps:$4 sm:$0xff]   ;;  %v7045_v24 = vld [vmem:[#allocation4 + $0x6d0] ss:$28 sps:$4 sm:$0xff]  }
 0x1ac   :  { %v1722_v48 = vpop.f32.mrf.mxu0 }
 0x1ad   :  { %3371 = vmatpush2.bf16.msra.mxu0 %v6940_v63  ;;  %v7017_v63 = vld [vmem:[#allocation4 + $0x46c] ss:$28 sps:$4 sm:$0xff]  }
 0x1ae   :  { %v1723_v46 = vpop.f32.mrf.mxu0  ;;  %3372 = vmatprep.subr.bf16.mxu0 %v6948_v1  ;;  %v7020_v1 = vld [vmem:[#allocation4 + $0x2b4] ss:$28 sps:$4 sm:$0xff]  }
 0x1af   :  { %v7018_v48 = vld [vmem:[#allocation4 + $0x2b0] ss:$28 sps:$4 sm:$0xff]  }
 0x1b0   :  { %v7021_v46 = vld [vmem:[#allocation4 + $0x430] ss:$28 sps:$4 sm:$0xff]  }
 0x1b1   :  { %3373 = vmatpush2.bf16.msra.mxu0 %v6946_v18  ;;  %v7023_v18 = vld [vmem:[#allocation4 + $0x434] ss:$28 sps:$4 sm:$0xff]  }
 0x1b2   :  { %3424 = vmatprep.subr.bf16.mxu0 %v6954_v8  ;;  %v7026_v8 = vld [vmem:[#allocation4 + $0x27c] ss:$28 sps:$4 sm:$0xff]  }
 0x1b4   :  { %3375 = vmatmul.mubr.bf16.vlgmr.msra.gmra.mxu0 %v7742_v22 }
 0x1b5   :  { %3425 = vmatpush1.bf16.msra.mxu0 %v6952_v10  ;;  %3456 = vmatprep.mubr.bf16.mxu0 %v7740_v30  ;;  %v7024_v10 = vld [vmem:[#allocation4 + $0x278] ss:$28 sps:$4 sm:$0xff]  }
 0x1b6   :  { %3426 = vmatprep.subr.bf16.mxu0 %v6960_v37  ;;  %v7029_v37 = vld [vmem:[#allocation4 + $0x3fc] ss:$28 sps:$4 sm:$0xff]  }
 0x1b9   :  { %3427 = vmatpush1.bf16.msra.mxu0 %v6958_v11  ;;  %v7032_v11 = vld [vmem:[#allocation4 + $0x244] ss:$28 sps:$4 sm:$0xff]  }
 0x1ba   :  { %3428 = vmatprep.subr.bf16.mxu0 %v6966_v12  ;;  %v7027_v12 = vld [vmem:[#allocation4 + $0x3f8] ss:$28 sps:$4 sm:$0xff]  }
 0x1bd   :  { %3429 = vmatpush1.bf16.msra.mxu0 %v6964_v13  ;;  %v7030_v13 = vld [vmem:[#allocation4 + $0x240] ss:$28 sps:$4 sm:$0xff]  }
 0x1be   :  { %3430 = vmatprep.subr.bf16.mxu0 %v6972_v14  ;;  %v7035_v14 = vld [vmem:[#allocation4 + $0x3c4] ss:$28 sps:$4 sm:$0xff]  }
 0x1c1   :  { %3431 = vmatpush1.bf16.msra.mxu0 %v6970_v16  ;;  %v7038_v16 = vld [vmem:[#allocation4 + $0x20c] ss:$28 sps:$4 sm:$0xff]  }
 0x1c2   :  { %3432 = vmatprep.subr.bf16.mxu0 %v6978_v17  ;;  %v7033_v17 = vld [vmem:[#allocation4 + $0x3c0] ss:$28 sps:$4 sm:$0xff]  }
 0x1c5   :  { %3433 = vmatpush1.bf16.msra.mxu0 %v6976_v21  ;;  %v7041_v21 = vld [vmem:[#allocation4 + $0x38c] ss:$28 sps:$4 sm:$0xff]  }
 0x1c6   :  { %3434 = vmatprep.subr.bf16.mxu0 %v6984_v26  ;;  %v7044_v26 = vld [vmem:[#allocation4 + $0x1d4] ss:$28 sps:$4 sm:$0xff]  }
 0x1c8   :  { %v1800_v32 = vpop.f32.mrf.mxu0 }
 0x1c9   :  { %v1759_v25 = vpop.f32.mrf.mxu1  ;;  %3435 = vmatpush1.bf16.msra.mxu0 %v6982_v29  ;;  %v7047_v29 = vld [vmem:[#allocation4 + $0x6d4] ss:$28 sps:$4 sm:$0xff]  }
 0x1ca   :  { %v1760_v34 = vadd.f32 %v1759_v25, %v1719_v23  ;;  %v1802_v9 = vpop.f32.mrf.mxu0  ;;  %3436 = vmatprep.subr.bf16.mxu0 %v6990_v31  ;;  %v7048_v31 = vld [vmem:[#allocation4 + $0x360] ss:$28 sps:$4 sm:$0xff]  }
 0x1cb   :  { %v1761_v36 = vpop.f32.mrf.mxu1  ;;  %v7049_v23 = vld [vmem:[#allocation4 + $0x1a0] ss:$28 sps:$4 sm:$0xff]  }
 0x1cc   :  { %v1801_v5 = vadd.f32 %v1800_v32, %v1760_v34  ;;  %v1762_v38 = vadd.f32 %v1761_v36, %v1721_v33  ;;  %v1804_v40 = vpop.f32.mrf.mxu0  ;;  %v7052_v25 = vld [vmem:[#allocation4 + $0x69c] ss:$28 sps:$4 sm:$0xff]   ;;  %v7053_v32 = vld [vmem:[#allocation4 + $0x328] ss:$28 sps:$4 sm:$0xff]   ;;  %v7058_v36 = vld [vmem:[#allocation4 + $0x2f0] ss:$28 sps:$4 sm:$0xff]  }
 0x1cd   :  { %v1763_v39 = vpop.f32.mrf.mxu1  ;;  %3437 = vmatpush1.bf16.msra.mxu0 %v6988_v35  ;;  %v7050_v33 = vld [vmem:[#allocation4 + $0x698] ss:$28 sps:$4 sm:$0xff]   ;;  %v7054_v34 = vld [vmem:[#allocation4 + $0x168] ss:$28 sps:$4 sm:$0xff]  }
 0x1ce   :  { %v1803_v42 = vadd.f32 %v1802_v9, %v1762_v38  ;;  %v1809_v44 = vmax.f32 %v1801_v5, 0.0  ;;  %v1805_v45 = vpop.f32.mrf.mxu0  ;;  %3438 = vmatprep.subr.bf16.mxu0 %v6996_v52  ;;  %v7057_v35 = vld [vmem:[#allocation4 + $0x664] ss:$28 sps:$4 sm:$0xff]   ;;  %v7059_v52 = vld [vmem:[#allocation4 + $0x130] ss:$28 sps:$4 sm:$0xff]  }
 0x1cf   :  { %v1764_v41 = vpop.f32.mrf.mxu1  ;;  %v7055_v9 = vld [vmem:[#allocation4 + $0x660] ss:$28 sps:$4 sm:$0xff]   ;;  %v7062_v5 = vld [vmem:[#allocation4 + $0x62c] ss:$28 sps:$4 sm:$0xff]   ;;  %v7063_v38 = vld [vmem:[#allocation4 + $0x2b8] ss:$28 sps:$4 sm:$0xff]  }
 0x1d0   :  { %v1810_v49 = vmax.f32 %v1803_v42, 0.0  ;;  %v7767_v54 = vpack.c.bf16 %v1809_v44, %v1809_v44  ;;  %v7060_v39 = vld [vmem:[#allocation4 + $0x628] ss:$28 sps:$4 sm:$0xff]   ;;  %v7064_v40 = vld [vmem:[#allocation4 + $0xf8] ss:$28 sps:$4 sm:$0xff]  }
 0x1d1   :  { %3439 = vmatpush1.bf16.msra.mxu0 %v6994_v43  ;;  %v7067_v42 = vld [vmem:[#allocation4 + $0x5f4] ss:$28 sps:$4 sm:$0xff]   ;;  %v7069_v44 = vld [vmem:[#allocation4 + $0xc0] ss:$28 sps:$4 sm:$0xff]   ;;  %v7073_v45 = vld [vmem:[#allocation4 + $0x248] ss:$28 sps:$4 sm:$0xff]  }
 0x1d2   :  { %v7765_v50 = vpack.c.bf16 %v1810_v49, %v1810_v49  ;;  %3440 = vmatprep.subr.bf16.mxu0 %v7002_v47  ;;  %v7065_v43 = vld [vmem:[#allocation4 + $0x5f0] ss:$28 sps:$4 sm:$0xff]   ;;  %v7072_v41 = vld [vmem:[#allocation4 + $0x5bc] ss:$28 sps:$4 sm:$0xff]   ;;  %v7074_v49 = vld [vmem:[#allocation4 + $0x88] ss:$28 sps:$4 sm:$0xff]  }
 0x1d3   :  { %v7070_v47 = vld [vmem:[#allocation4 + $0x5b8] ss:$28 sps:$4 sm:$0xff]  }
 0x1d4   :  { %3333 = vmatprep.mubr.bf16.mxu1 %v7765_v50 }
 0x1d5   :  { %3334 = vmatmul.mubr.bf16.vlgmr.msra.gmra.mxu1 %v7767_v54  ;;  %3441 = vmatpush2.bf16.msra.mxu0 %v7000_v53  ;;  %v7078_v53 = vld [vmem:[#allocation4 + $0x210] ss:$28 sps:$4 sm:$0xff]  }
 0x1d6   :  { %3384 = vmatpush1.bf16.msra.mxu1 %v6997_v51  ;;  %3415 = vmatprep.mubr.bf16.mxu1 %v7765_v50  ;;  %v7077_v51 = vld [vmem:[#allocation4 + $0x584] ss:$28 sps:$4 sm:$0xff]  }
 0x1d7   :  { %3385 = vmatprep.subr.bf16.mxu1 %v7005_v55  ;;  %3442 = vmatprep.subr.bf16.mxu0 %v7008_v56  ;;  %v7075_v55 = vld [vmem:[#allocation4 + $0x580] ss:$28 sps:$4 sm:$0xff]   ;;  %v7079_v56 = vld [vmem:[#allocation4 + $0x50] ss:$28 sps:$4 sm:$0xff]  }
 0x1d9   :  { %3443 = vmatpush2.bf16.msra.mxu0 %v7006_v58  ;;  %v7083_v58 = vld [vmem:[#allocation4 + $0x1d8] ss:$28 sps:$4 sm:$0xff]  }
 0x1da   :  { %3386 = vmatpush1.bf16.msra.mxu1 %v7003_v57  ;;  %3444 = vmatprep.subr.bf16.mxu0 %v7014_v60  ;;  %v7082_v57 = vld [vmem:[#allocation4 + $0x54c] ss:$28 sps:$4 sm:$0xff]   ;;  %v7084_v60 = vld [vmem:[#allocation4 + $0x18] ss:$28 sps:$4 sm:$0xff]  }
 0x1db   :  { %3387 = vmatprep.subr.bf16.mxu1 %v7011_v59  ;;  %v7080_v59 = vld [vmem:[#allocation4 + $0x548] ss:$28 sps:$4 sm:$0xff]  }
 0x1dd   :  { %3445 = vmatpush2.bf16.msra.mxu0 %v7012_v62  ;;  %v7141_v62 = vld [vmem:[#allocation6 + $0xe4] ss:$16 sps:$4 sm:$0xff]  }
 0x1de   :  { %3388 = vmatpush1.bf16.msra.mxu1 %v7009_v61  ;;  %3446 = vmatprep.subr.bf16.mxu0 %v7020_v1  ;;  %v7087_v61 = vld [vmem:[#allocation4 + $0x51c] ss:$28 sps:$4 sm:$0xff]   ;;  %v7090_v1 = vld [vmem:[#allocation4 + $0x4e4] ss:$28 sps:$4 sm:$0xff]  }
 0x1df   :  { %3389 = vmatprep.subr.bf16.mxu1 %v7017_v63  ;;  %v7085_v63 = vld [vmem:[#allocation4 + $0x518] ss:$28 sps:$4 sm:$0xff]  }
 0x1e1   :  { %3447 = vmatpush2.bf16.msra.mxu0 %v7018_v48  ;;  %v7146_v48 = vld [vmem:[#allocation6 + $0xc4] ss:$16 sps:$4 sm:$0xff]  }
 0x1e2   :  { %3390 = vmatpush1.bf16.msra.mxu1 %v7015_v2  ;;  %3448 = vmatprep.subr.bf16.mxu0 %v7026_v8  ;;  %v7139_v2 = vld [vmem:[#allocation6 + $0xe0] ss:$16 sps:$4 sm:$0xff]   ;;  %v7093_v8 = vld [vmem:[#allocation4 + $0x4ac] ss:$28 sps:$4 sm:$0xff]  }
 0x1e3   :  { %3391 = vmatprep.subr.bf16.mxu1 %v7023_v18  ;;  %v7088_v18 = vld [vmem:[#allocation4 + $0x4e0] ss:$28 sps:$4 sm:$0xff]  }
 0x1e5   :  { %3449 = vmatpush2.bf16.msra.mxu0 %v7024_v10  ;;  %v7151_v10 = vld [vmem:[#allocation6 + $0xa4] ss:$16 sps:$4 sm:$0xff]  }
 0x1e6   :  { %3392 = vmatpush1.bf16.msra.mxu1 %v7021_v46  ;;  %3450 = vmatprep.subr.bf16.mxu0 %v7032_v11  ;;  %v7144_v46 = vld [vmem:[#allocation6 + $0xc0] ss:$16 sps:$4 sm:$0xff]  }
 0x1e7   :  { %3393 = vmatprep.subr.bf16.mxu1 %v7029_v37  ;;  %v7091_v37 = vld [vmem:[#allocation4 + $0x4a8] ss:$28 sps:$4 sm:$0xff]   ;;  %v7096_v11 = vld [vmem:[#allocation4 + $0x474] ss:$28 sps:$4 sm:$0xff]  }
 0x1e9   :  { %3451 = vmatpush2.bf16.msra.mxu0 %v7030_v13  ;;  %v7156_v13 = vld [vmem:[#allocation6 + $0x84] ss:$16 sps:$4 sm:$0xff]  }
 0x1ea   :  { %3394 = vmatpush1.bf16.msra.mxu1 %v7027_v12  ;;  %3452 = vmatprep.subr.bf16.mxu0 %v7038_v16  ;;  %v7149_v12 = vld [vmem:[#allocation6 + $0xa0] ss:$16 sps:$4 sm:$0xff]  }
 0x1eb   :  { %3395 = vmatprep.subr.bf16.mxu1 %v7035_v14  ;;  %v7099_v14 = vld [vmem:[#allocation4 + $0x43c] ss:$28 sps:$4 sm:$0xff]   ;;  %v7154_v16 = vld [vmem:[#allocation6 + $0x80] ss:$16 sps:$4 sm:$0xff]  }
 0x1ed   :  { %3453 = vmatpush2.bf16.msra.mxu0 %v7036_v20  ;;  %v7097_v20 = vld [vmem:[#allocation4 + $0x438] ss:$28 sps:$4 sm:$0xff]  }
 0x1ee   :  { %3396 = vmatpush1.bf16.msra.mxu1 %v7033_v17  ;;  %3454 = vmatprep.subr.bf16.mxu0 %v7044_v26  ;;  %v7161_v17 = vld [vmem:[#allocation6 + $0x64] ss:$16 sps:$4 sm:$0xff]   ;;  %v7159_v26 = vld [vmem:[#allocation6 + $0x60] ss:$16 sps:$4 sm:$0xff]  }
 0x1ef   :  { %3397 = vmatprep.subr.bf16.mxu1 %v7041_v21  ;;  %v7102_v21 = vld [vmem:[#allocation4 + $0x404] ss:$28 sps:$4 sm:$0xff]  }
 0x1f1   :  { %3455 = vmatpush2.bf16.msra.mxu0 %v7042_v28  ;;  %v7100_v28 = vld [vmem:[#allocation4 + $0x400] ss:$28 sps:$4 sm:$0xff]  }
 0x1f2   :  { %3398 = vmatpush1.bf16.msra.mxu1 %v7039_v27  ;;  %6389 = vmatprep.subr.bf16.mxu0 %v7048_v31  ;;  %v7166_v27 = vld [vmem:[#allocation6 + $0x44] ss:$16 sps:$4 sm:$0xff]   ;;  %v7164_v31 = vld [vmem:[#allocation6 + $0x40] ss:$16 sps:$4 sm:$0xff]  }
 0x1f3   :  { %3399 = vmatprep.subr.bf16.mxu1 %v7047_v29  ;;  %v7105_v29 = vld [vmem:[#allocation4 + $0x3cc] ss:$28 sps:$4 sm:$0xff]  }
 0x1f4   :  { %3457 = vmatmul.mubr.bf16.vlgmr.msra.gmra.mxu0 %v7742_v22 }
 0x1f5   :  { %6390 = vmatpush3.bf16.msra.mxu0 %v7049_v23  ;;  %3538 = vmatprep.mubr.bf16.mxu0 %v7740_v30  ;;  %v7068_v30 = vld [vmem:[#allocation4 + $0x280] ss:$28 sps:$4 sm:$0xff]   ;;  %v7103_v23 = vld [vmem:[#allocation4 + $0x3c8] ss:$28 sps:$4 sm:$0xff]  }
 0x1f6   :  { %3400 = vmatpush2.bf16.msra.mxu1 %v7045_v24  ;;  %6391 = vmatprep.subr.bf16.mxu0 %v7053_v32  ;;  %v7169_v24 = vld [vmem:[#allocation6 + $0x24] ss:$16 sps:$4 sm:$0xff]   ;;  %v7167_v32 = vld [vmem:[#allocation6 + $0x20] ss:$16 sps:$4 sm:$0xff]  }
 0x1f7   :  { %3401 = vmatprep.subr.bf16.mxu1 %v7052_v25  ;;  %v7108_v25 = vld [vmem:[#allocation4 + $0x394] ss:$28 sps:$4 sm:$0xff]  }
 0x1f9   :  { %6392 = vmatpush3.bf16.msra.mxu0 %v7054_v34  ;;  %v7106_v34 = vld [vmem:[#allocation4 + $0x390] ss:$28 sps:$4 sm:$0xff]  }
 0x1fa   :  { %3402 = vmatpush2.bf16.msra.mxu1 %v7050_v33  ;;  %6393 = vmatprep.subr.bf16.mxu0 %v7058_v36  ;;  %v7172_v33 = vld [vmem:[#allocation6 + $0x4] ss:$16 sps:$4 sm:$0xff]   ;;  %v7170_v36 = vld [vmem:[#allocation6] ss:$16 sps:$4 sm:$0xff]  }
 0x1fb   :  { %3403 = vmatprep.subr.bf16.mxu1 %v7057_v35  ;;  %v7111_v35 = vld [vmem:[#allocation4 + $0x6dc] ss:$28 sps:$4 sm:$0xff]  }
 0x1fd   :  { %6394 = vmatpush3.bf16.msra.mxu0 %v7059_v52  ;;  %v7109_v52 = vld [vmem:[#allocation4 + $0x6d8] ss:$28 sps:$4 sm:$0xff]  }
 0x1fe   :  { %3404 = vmatpush2.bf16.msra.mxu1 %v7055_v9  ;;  %6395 = vmatprep.subr.bf16.mxu0 %v7063_v38  ;;  %v7175_v9 = vld [vmem:[#allocation6 + $0x1e4] ss:$16 sps:$4 sm:$0xff]   ;;  %v7173_v38 = vld [vmem:[#allocation6 + $0x1e0] ss:$16 sps:$4 sm:$0xff]  }
 0x1ff   :  { %3405 = vmatprep.subr.bf16.mxu1 %v7062_v5  ;;  %v7114_v5 = vld [vmem:[#allocation4 + $0x6a4] ss:$28 sps:$4 sm:$0xff]  }
 0x201   :  { %6396 = vmatpush3.bf16.msra.mxu0 %v7064_v40 }
 0x202   :  { %3406 = vmatpush2.bf16.msra.mxu1 %v7060_v39  ;;  %6397 = vmatprep.subr.bf16.mxu0 %v7068_v30  ;;  %v7178_v39 = vld [vmem:[#allocation6 + $0x1c4] ss:$16 sps:$4 sm:$0xff]  }
 0x203   :  { %3407 = vmatprep.subr.bf16.mxu1 %v7067_v42  ;;  %v7112_v42 = vld [vmem:[#allocation4 + $0x6a0] ss:$28 sps:$4 sm:$0xff]  }
 0x205   :  { %6398 = vmatpush3.bf16.msra.mxu0 %v7069_v44  ;;  %v7176_v44 = vld [vmem:[#allocation6 + $0x1c0] ss:$16 sps:$4 sm:$0xff]  }
 0x206   :  { %3408 = vmatpush2.bf16.msra.mxu1 %v7065_v43  ;;  %6399 = vmatprep.subr.bf16.mxu0 %v7073_v45  ;;  %v7117_v43 = vld [vmem:[#allocation4 + $0x66c] ss:$28 sps:$4 sm:$0xff]  }
 0x207   :  { %3409 = vmatprep.subr.bf16.mxu1 %v7072_v41  ;;  %v7181_v41 = vld [vmem:[#allocation6 + $0x1a4] ss:$16 sps:$4 sm:$0xff]  }
 0x209   :  { %6400 = vmatpush3.bf16.msra.mxu0 %v7074_v49 }
 0x20a   :  { %3410 = vmatpush2.bf16.msra.mxu1 %v7070_v47  ;;  %6401 = vmatprep.subr.bf16.mxu0 %v7078_v53  ;;  %v7115_v47 = vld [vmem:[#allocation4 + $0x668] ss:$28 sps:$4 sm:$0xff]   ;;  %v7179_v53 = vld [vmem:[#allocation6 + $0x1a0] ss:$16 sps:$4 sm:$0xff]  }
 0x20b   :  { %3411 = vmatprep.subr.bf16.mxu1 %v7077_v51  ;;  %v7120_v51 = vld [vmem:[#allocation4 + $0x634] ss:$28 sps:$4 sm:$0xff]  }
 0x20d   :  { %6402 = vmatpush3.bf16.msra.mxu0 %v7079_v56  ;;  %v7118_v56 = vld [vmem:[#allocation4 + $0x630] ss:$28 sps:$4 sm:$0xff]  }
 0x20e   :  { %3412 = vmatpush2.bf16.msra.mxu1 %v7075_v55  ;;  %6403 = vmatprep.subr.bf16.mxu0 %v7083_v58  ;;  %v7184_v55 = vld [vmem:[#allocation6 + $0x184] ss:$16 sps:$4 sm:$0xff]   ;;  %v7182_v58 = vld [vmem:[#allocation6 + $0x180] ss:$16 sps:$4 sm:$0xff]  }
 0x20f   :  { %3413 = vmatprep.subr.bf16.mxu1 %v7082_v57  ;;  %v7123_v57 = vld [vmem:[#allocation4 + $0x5fc] ss:$28 sps:$4 sm:$0xff]  }
 0x211   :  { %6404 = vmatpush3.bf16.msra.mxu0 %v7084_v60  ;;  %v7121_v60 = vld [vmem:[#allocation4 + $0x5f8] ss:$28 sps:$4 sm:$0xff]  }
 0x212   :  { %3414 = vmatpush2.bf16.msra.mxu1 %v7080_v59  ;;  %4966 = vmatprep.subr.bf16.mxu0 %v7141_v62  ;;  %v7187_v59 = vld [vmem:[#allocation6 + $0x164] ss:$16 sps:$4 sm:$0xff]   ;;  %v7185_v62 = vld [vmem:[#allocation6 + $0x160] ss:$16 sps:$4 sm:$0xff]  }
 0x213   :  { %3465 = vmatprep.subr.bf16.mxu1 %v7087_v61  ;;  %v7126_v61 = vld [vmem:[#allocation4 + $0x5c4] ss:$28 sps:$4 sm:$0xff]  }
 0x214   :  { %3539 = vmatmul.mubr.bf16.vlgmr.msra.gmra.mxu0 %v7742_v22  ;;  %v7094_v22 = vld [vmem:[#allocation4 + $0x470] ss:$28 sps:$4 sm:$0xff]  }
 0x215   :  { %3416 = vmatmul.mubr.bf16.vlgmr.msra.gmra.mxu1 %v7767_v54  ;;  %4967 = vmatpush1.bf16.msra.mxu0 %v7139_v2  ;;  %v7129_v2 = vld [vmem:[#allocation4 + $0x58c] ss:$28 sps:$4 sm:$0xff]  }
 0x216   :  { %3466 = vmatpush1.bf16.msra.mxu1 %v7085_v63  ;;  %3497 = vmatprep.mubr.bf16.mxu1 %v7765_v50  ;;  %v7190_v63 = vld [vmem:[#allocation6 + $0x144] ss:$16 sps:$4 sm:$0xff]  }
 0x217   :  { %3467 = vmatprep.subr.bf16.mxu1 %v7090_v1  ;;  %4968 = vmatprep.subr.bf16.mxu0 %v7146_v48  ;;  %v7124_v1 = vld [vmem:[#allocation4 + $0x5c0] ss:$28 sps:$4 sm:$0xff]  }
 0x218   :  { %v7188_v48 = vld [vmem:[#allocation6 + $0x140] ss:$16 sps:$4 sm:$0xff]  }
 0x219   :  { %4969 = vmatpush1.bf16.msra.mxu0 %v7144_v46  ;;  %v7132_v46 = vld [vmem:[#allocation4 + $0x554] ss:$28 sps:$4 sm:$0xff]  }
 0x21a   :  { %3468 = vmatpush1.bf16.msra.mxu1 %v7088_v18  ;;  %4970 = vmatprep.subr.bf16.mxu0 %v7151_v10  ;;  %v7193_v18 = vld [vmem:[#allocation6 + $0x124] ss:$16 sps:$4 sm:$0xff]   ;;  %v7191_v10 = vld [vmem:[#allocation6 + $0x120] ss:$16 sps:$4 sm:$0xff]  }
 0x21b   :  { %3469 = vmatprep.subr.bf16.mxu1 %v7093_v8  ;;  %v7127_v8 = vld [vmem:[#allocation4 + $0x588] ss:$28 sps:$4 sm:$0xff]  }
 0x21d   :  { %4971 = vmatpush1.bf16.msra.mxu0 %v7149_v12  ;;  %v7133_v12 = vld [vmem:[#allocation4 + $0x6e0] ss:$28 sps:$4 sm:$0xff]  }
 0x21e   :  { %3470 = vmatpush1.bf16.msra.mxu1 %v7091_v37  ;;  %4972 = vmatprep.subr.bf16.mxu0 %v7156_v13  ;;  %v7196_v37 = vld [vmem:[#allocation6 + $0x104] ss:$16 sps:$4 sm:$0xff]   ;;  %v7194_v13 = vld [vmem:[#allocation6 + $0x100] ss:$16 sps:$4 sm:$0xff]  }
 0x21f   :  { %3471 = vmatprep.subr.bf16.mxu1 %v7096_v11  ;;  %v7130_v11 = vld [vmem:[#allocation4 + $0x550] ss:$28 sps:$4 sm:$0xff]  }
 0x221   :  { %4973 = vmatpush1.bf16.msra.mxu0 %v7154_v16  ;;  %v7136_v16 = vld [vmem:[#allocation4 + $0x4e8] ss:$28 sps:$4 sm:$0xff]  }
 0x222   :  { %3472 = vmatpush1.bf16.msra.mxu1 %v7094_v22  ;;  %4974 = vmatprep.subr.bf16.mxu0 %v7161_v17  ;;  %v7134_v22 = vld [vmem:[#allocation4 + $0x520] ss:$28 sps:$4 sm:$0xff]   ;;  %v7137_v17 = vld [vmem:[#allocation4 + $0x670] ss:$28 sps:$4 sm:$0xff]  }
 0x223   :  { %3473 = vmatprep.subr.bf16.mxu1 %v7099_v14  ;;  %v7135_v14 = vld [vmem:[#allocation4 + $0x6a8] ss:$28 sps:$4 sm:$0xff]  }
 0x225   :  { %4975 = vmatpush1.bf16.msra.mxu0 %v7159_v26  ;;  %v7247_v26 = vld [vmem:[#allocation6 + $0x4e4] ss:$16 sps:$4 sm:$0xff]  }
 0x226   :  { %3474 = vmatpush1.bf16.msra.mxu1 %v7097_v20  ;;  %4976 = vmatprep.subr.bf16.mxu0 %v7166_v27  ;;  %v7138_v20 = vld [vmem:[#allocation4 + $0x4b0] ss:$28 sps:$4 sm:$0xff]   ;;  %v7143_v27 = vld [vmem:[#allocation4 + $0x478] ss:$28 sps:$4 sm:$0xff]  }
 0x227   :  { %3475 = vmatprep.subr.bf16.mxu1 %v7102_v21  ;;  %v7142_v21 = vld [vmem:[#allocation4 + $0x638] ss:$28 sps:$4 sm:$0xff]  }
 0x229   :  { %4977 = vmatpush1.bf16.msra.mxu0 %v7164_v31  ;;  %v7152_v31 = vld [vmem:[#allocation4 + $0x5c8] ss:$28 sps:$4 sm:$0xff]  }
 0x22a   :  { %3476 = vmatpush1.bf16.msra.mxu1 %v7100_v28  ;;  %4978 = vmatprep.subr.bf16.mxu0 %v7169_v24  ;;  %v7147_v28 = vld [vmem:[#allocation4 + $0x600] ss:$28 sps:$4 sm:$0xff]   ;;  %v7153_v24 = vld [vmem:[#allocation4 + $0x408] ss:$28 sps:$4 sm:$0xff]  }
 0x22b   :  { %3477 = vmatprep.subr.bf16.mxu1 %v7105_v29  ;;  %v7148_v29 = vld [vmem:[#allocation4 + $0x440] ss:$28 sps:$4 sm:$0xff]  }
 0x22d   :  { %4979 = vmatpush1.bf16.msra.mxu0 %v7167_v32  ;;  %v7163_v32 = vld [vmem:[#allocation4 + $0x398] ss:$28 sps:$4 sm:$0xff]  }
 0x22e   :  { %3478 = vmatpush1.bf16.msra.mxu1 %v7103_v23  ;;  %4980 = vmatprep.subr.bf16.mxu0 %v7172_v33  ;;  %v7158_v23 = vld [vmem:[#allocation4 + $0x3d0] ss:$28 sps:$4 sm:$0xff]   ;;  %v7199_v33 = vld [vmem:[#allocation6 + $0x2e4] ss:$16 sps:$4 sm:$0xff]  }
 0x22f   :  { %3479 = vmatprep.subr.bf16.mxu1 %v7108_v25  ;;  %v7162_v25 = vld [vmem:[#allocation4 + $0x558] ss:$28 sps:$4 sm:$0xff]  }
 0x231   :  { %4981 = vmatpush1.bf16.msra.mxu0 %v7170_v36 }
 0x232   :  { %3480 = vmatpush1.bf16.msra.mxu1 %v7106_v34  ;;  %4982 = vmatprep.subr.bf16.mxu0 %v7175_v9  ;;  %v7197_v34 = vld [vmem:[#allocation6 + $0x2e0] ss:$16 sps:$4 sm:$0xff]  }
 0x233   :  { %3481 = vmatprep.subr.bf16.mxu1 %v7111_v35  ;;  %v7202_v35 = vld [vmem:[#allocation6 + $0x2c4] ss:$16 sps:$4 sm:$0xff]   ;;  %v7200_v9 = vld [vmem:[#allocation6 + $0x2c0] ss:$16 sps:$4 sm:$0xff]  }
 0x234   :  { %v7777_v40 = vpop.f32.mrf.mxu0 }
 0x235   :  { %4983 = vmatpush2.bf16.msra.mxu0 %v7173_v38 }
 0x236   :  { %3482 = vmatpush2.bf16.msra.mxu1 %v7109_v52  ;;  %v7779_v30 = vpop.f32.mrf.mxu0  ;;  %4984 = vmatprep.subr.bf16.mxu0 %v7178_v39  ;;  %v7203_v39 = vld [vmem:[#allocation6 + $0x2a0] ss:$16 sps:$4 sm:$0xff]  }
 0x237   :  { %3483 = vmatprep.subr.bf16.mxu1 %v7114_v5  ;;  %v7205_v5 = vld [vmem:[#allocation6 + $0x2a4] ss:$16 sps:$4 sm:$0xff]  }
 0x238   :  { %v3298_v45 = vpop.f32.mrf.mxu0 }
 0x239   :  { %4985 = vmatpush2.bf16.msra.mxu0 %v7176_v44  ;;  %v7206_v44 = vld [vmem:[#allocation6 + $0x280] ss:$16 sps:$4 sm:$0xff]  }
 0x23a   :  { %3484 = vmatpush2.bf16.msra.mxu1 %v7112_v42  ;;  %v3299_v49 = vpop.f32.mrf.mxu0  ;;  %4986 = vmatprep.subr.bf16.mxu0 %v7181_v41  ;;  %v7211_v41 = vld [vmem:[#allocation6 + $0x264] ss:$16 sps:$4 sm:$0xff]   ;;  %v7209_v45 = vld [vmem:[#allocation6 + $0x260] ss:$16 sps:$4 sm:$0xff]  }
 0x23b   :  { %3485 = vmatprep.subr.bf16.mxu1 %v7117_v43  ;;  %v7208_v43 = vld [vmem:[#allocation6 + $0x284] ss:$16 sps:$4 sm:$0xff]  }
 0x23c   :  { %v7217_v49 = vld [vmem:[#allocation6 + $0x224] ss:$16 sps:$4 sm:$0xff]  }
 0x23d   :  { %4987 = vmatpush2.bf16.msra.mxu0 %v7179_v53  ;;  %v7220_v53 = vld [vmem:[#allocation6 + $0x204] ss:$16 sps:$4 sm:$0xff]  }
 0x23e   :  { %3486 = vmatpush2.bf16.msra.mxu1 %v7115_v47  ;;  %4988 = vmatprep.subr.bf16.mxu0 %v7184_v55  ;;  %v7212_v47 = vld [vmem:[#allocation6 + $0x240] ss:$16 sps:$4 sm:$0xff]  }
 0x23f   :  { %3487 = vmatprep.subr.bf16.mxu1 %v7120_v51  ;;  %v7215_v51 = vld [vmem:[#allocation6 + $0x220] ss:$16 sps:$4 sm:$0xff]  }
 0x240   :  { %v7791_v55 = vld [vmem:[%s7988_s5] sm:$0xff] }
 0x241   :  { %4989 = vmatpush2.bf16.msra.mxu0 %v7182_v58  ;;  %v2076_v58 = vrot.slane %v7791_v55, %v7727_v6 }
 0x242   :  { %3488 = vmatpush2.bf16.msra.mxu1 %v7118_v56  ;;  %4990 = vmatprep.subr.bf16.mxu0 %v7187_v59  ;;  %v7218_v56 = vld [vmem:[#allocation6 + $0x200] ss:$16 sps:$4 sm:$0xff]   ;;  %v2080_v59 = vrot.slane %v7791_v55, %v7730_v7 }
 0x243   :  { %3489 = vmatprep.subr.bf16.mxu1 %v7123_v57  ;;  %v7223_v57 = vld [vmem:[#allocation6 + $0x3e4] ss:$16 sps:$4 sm:$0xff]  }
 0x245   :  { %4991 = vmatpush2.bf16.msra.mxu0 %v7185_v62  ;;  %v3295_v62 = vadd.f32 %v7777_v40, %v2076_v58  ;;  %v7227_v40 = vld [vmem:[#allocation6 + $0x3a0] ss:$16 sps:$4 sm:$0xff]   ;;  %v7274_v58 = vld [vmem:[#allocation6 + $0x5c4] ss:$16 sps:$4 sm:$0xff]  }
 0x246   :  { %3490 = vmatpush2.bf16.msra.mxu1 %v7121_v60  ;;  %4992 = vmatprep.subr.bf16.mxu0 %v7190_v63  ;;  %v7221_v60 = vld [vmem:[#allocation6 + $0x3e0] ss:$16 sps:$4 sm:$0xff]  }
 0x247   :  { %3491 = vmatprep.subr.bf16.mxu1 %v7126_v61  ;;  %v7226_v61 = vld [vmem:[#allocation6 + $0x3c4] ss:$16 sps:$4 sm:$0xff]  }
 0x248   :  { %v7521_v63 = vld [vmem:[%s7983_s0] sm:$0xff] }
 0x249   :  { %4993 = vmatpush2.bf16.msra.mxu0 %v7188_v48  ;;  %v3297_v48 = vadd.f32 %v7779_v30, %v2080_v59  ;;  %v7272_v59 = vld [vmem:[#allocation6 + $0x5c0] ss:$16 sps:$4 sm:$0xff]  }
 0x24a   :  { %3492 = vmatpush2.bf16.msra.mxu1 %v7124_v1  ;;  %4994 = vmatprep.subr.bf16.mxu0 %v7193_v18  ;;  %v81_v1 = vunpack.c.l.bf16 %v7521_v63 }
 0x24b   :  { %3493 = vmatprep.subr.bf16.mxu1 %v7129_v2 }
 0x24d   :  { %4995 = vmatpush2.bf16.msra.mxu0 %v7191_v10 }
 0x24e   :  { %3494 = vmatpush2.bf16.msra.mxu1 %v7127_v8  ;;  %4996 = vmatprep.subr.bf16.mxu0 %v7196_v37  ;;  %v82_v8 = vunpack.c.h.bf16 %v7521_v63  ;;  %v7229_v37 = vld [vmem:[#allocation6 + $0x3a4] ss:$16 sps:$4 sm:$0xff]   ;;  %v7278_v63 = vld [vmem:[#allocation6 + $0x580] ss:$16 sps:$4 sm:$0xff]  }
 0x24f   :  { %3495 = vmatprep.subr.bf16.mxu1 %v7132_v46  ;;  %v7224_v46 = vld [vmem:[#allocation6 + $0x3c0] ss:$16 sps:$4 sm:$0xff]  }
 0x251   :  { %4997 = vmatpush2.bf16.msra.mxu0 %v7194_v13 }
 0x252   :  { %3496 = vmatpush2.bf16.msra.mxu1 %v7130_v11  ;;  %5048 = vmatprep.subr.bf16.mxu0 %v7247_v26  ;;  %v7230_v26 = vld [vmem:[#allocation6 + $0x380] ss:$16 sps:$4 sm:$0xff]  }
 0x253   :  { %6411 = vmatprep.subr.bf16.mxu1 %v7133_v12 }
 0x255   :  { %3498 = vmatmul.mubr.bf16.vlgmr.msra.gmra.mxu1 %v7767_v54 }
 0x256   :  { %6412 = vmatpush3.bf16.msra.mxu1 %v7134_v22  ;;  %3578 = vmatprep.mubr.bf16.mxu1 %v7765_v50  ;;  %v7157_v50 = vld [vmem:[#allocation4 + $0x590] ss:$28 sps:$4 sm:$0xff]  }
 0x257   :  { %6413 = vmatprep.subr.bf16.mxu1 %v7135_v14 }
 0x25a   :  { %6414 = vmatpush3.bf16.msra.mxu1 %v7136_v16  ;;  %v7232_v16 = vld [vmem:[#allocation6 + $0x384] ss:$16 sps:$4 sm:$0xff]  }
 0x25b   :  { %6415 = vmatprep.subr.bf16.mxu1 %v7137_v17 }
 0x25e   :  { %6416 = vmatpush3.bf16.msra.mxu1 %v7138_v20  ;;  %v7245_v20 = vld [vmem:[#allocation6 + $0x4e0] ss:$16 sps:$4 sm:$0xff]  }
 0x25f   :  { %6417 = vmatprep.subr.bf16.mxu1 %v7142_v21  ;;  %v7250_v21 = vld [vmem:[#allocation6 + $0x4c4] ss:$16 sps:$4 sm:$0xff]  }
 0x262   :  { %6418 = vmatpush3.bf16.msra.mxu1 %v7143_v27  ;;  %v7235_v27 = vld [vmem:[#allocation6 + $0x364] ss:$16 sps:$4 sm:$0xff]  }
 0x263   :  { %6419 = vmatprep.subr.bf16.mxu1 %v7147_v28  ;;  %v7248_v28 = vld [vmem:[#allocation6 + $0x4c0] ss:$16 sps:$4 sm:$0xff]  }
 0x266   :  { %6420 = vmatpush3.bf16.msra.mxu1 %v7148_v29  ;;  %v7253_v29 = vld [vmem:[#allocation6 + $0x4a4] ss:$16 sps:$4 sm:$0xff]  }
 0x267   :  { %6421 = vmatprep.subr.bf16.mxu1 %v7152_v31  ;;  %v7233_v31 = vld [vmem:[#allocation6 + $0x360] ss:$16 sps:$4 sm:$0xff]  }
 0x26a   :  { %6422 = vmatpush3.bf16.msra.mxu1 %v7153_v24  ;;  %v7238_v24 = vld [vmem:[#allocation6 + $0x344] ss:$16 sps:$4 sm:$0xff]  }
 0x26b   :  { %6423 = vmatprep.subr.bf16.mxu1 %v7157_v50  ;;  %v7251_v50 = vld [vmem:[#allocation6 + $0x4a0] ss:$16 sps:$4 sm:$0xff]  }
 0x26e   :  { %6424 = vmatpush3.bf16.msra.mxu1 %v7158_v23  ;;  %v7256_v23 = vld [vmem:[#allocation6 + $0x484] ss:$16 sps:$4 sm:$0xff]  }
 0x26f   :  { %6425 = vmatprep.subr.bf16.mxu1 %v7162_v25  ;;  %v7236_v25 = vld [vmem:[#allocation6 + $0x340] ss:$16 sps:$4 sm:$0xff]  }
 0x272   :  { %6426 = vmatpush3.bf16.msra.mxu1 %v7163_v32  ;;  %v7241_v32 = vld [vmem:[#allocation6 + $0x324] ss:$16 sps:$4 sm:$0xff]  }
 0x273   :  { %5007 = vmatprep.subr.bf16.mxu1 %v7199_v33  ;;  %v7254_v33 = vld [vmem:[#allocation6 + $0x480] ss:$16 sps:$4 sm:$0xff]  }
 0x274   :  { %v7783_v36 = vpop.f32.mrf.mxu0 }
 0x275   :  { %3579 = vmatmul.mubr.bf16.vlgmr.msra.gmra.mxu1 %v7767_v54  ;;  %v7214_v54 = vld [vmem:[#allocation6 + $0x244] ss:$16 sps:$4 sm:$0xff]  }
 0x276   :  { %5008 = vmatpush1.bf16.msra.mxu1 %v7197_v34  ;;  %v7786_v52 = vpop.f32.mrf.mxu0  ;;  %v7259_v34 = vld [vmem:[#allocation6 + $0x464] ss:$16 sps:$4 sm:$0xff]  }
 0x277   :  { %5009 = vmatprep.subr.bf16.mxu1 %v7202_v35  ;;  %v7239_v35 = vld [vmem:[#allocation6 + $0x320] ss:$16 sps:$4 sm:$0xff]  }
 0x278   :  { %v3380_v38 = vpop.f32.mrf.mxu0 }
 0x279   :  { %v7262_v38 = vld [vmem:[#allocation6 + $0x444] ss:$16 sps:$4 sm:$0xff]  }
 0x27a   :  { %5010 = vmatpush1.bf16.msra.mxu1 %v7200_v9  ;;  %v3381_v42 = vpop.f32.mrf.mxu0  ;;  %v7244_v9 = vld [vmem:[#allocation6 + $0x304] ss:$16 sps:$4 sm:$0xff]  }
 0x27b   :  { %5011 = vmatprep.subr.bf16.mxu1 %v7205_v5  ;;  %v7257_v5 = vld [vmem:[#allocation6 + $0x460] ss:$16 sps:$4 sm:$0xff]   ;;  %v7298_v42 = vld [vmem:[#allocation6 + $0x6e4] ss:$16 sps:$4 sm:$0xff]  }
 0x27e   :  { %5012 = vmatpush1.bf16.msra.mxu1 %v7203_v39  ;;  %v7242_v39 = vld [vmem:[#allocation6 + $0x300] ss:$16 sps:$4 sm:$0xff]  }
 0x27f   :  { %5013 = vmatprep.subr.bf16.mxu1 %v7208_v43  ;;  %v7260_v43 = vld [vmem:[#allocation6 + $0x440] ss:$16 sps:$4 sm:$0xff]  }
 0x282   :  { %5014 = vmatpush1.bf16.msra.mxu1 %v7206_v44  ;;  %v7265_v44 = vld [vmem:[#allocation6 + $0x424] ss:$16 sps:$4 sm:$0xff]  }
 0x283   :  { %5015 = vmatprep.subr.bf16.mxu1 %v7211_v41  ;;  %v7263_v41 = vld [vmem:[#allocation6 + $0x420] ss:$16 sps:$4 sm:$0xff]  }
 0x286   :  { %5016 = vmatpush1.bf16.msra.mxu1 %v7209_v45 }
 0x287   :  { %5017 = vmatprep.subr.bf16.mxu1 %v7214_v54  ;;  %v7268_v54 = vld [vmem:[#allocation6 + $0x404] ss:$16 sps:$4 sm:$0xff]  }
 0x28a   :  { %5018 = vmatpush1.bf16.msra.mxu1 %v7212_v47 }
 0x28b   :  { %5019 = vmatprep.subr.bf16.mxu1 %v7217_v49  ;;  %v7266_v49 = vld [vmem:[#allocation6 + $0x400] ss:$16 sps:$4 sm:$0xff]  }
 0x28e   :  { %5020 = vmatpush1.bf16.msra.mxu1 %v7215_v51 }
 0x28f   :  { %5021 = vmatprep.subr.bf16.mxu1 %v7220_v53  ;;  %v7271_v53 = vld [vmem:[#allocation6 + $0x5e4] ss:$16 sps:$4 sm:$0xff]  }
 0x292   :  { %5022 = vmatpush1.bf16.msra.mxu1 %v7218_v56 }
 0x293   :  { %5023 = vmatprep.subr.bf16.mxu1 %v7223_v57  ;;  %v7269_v57 = vld [vmem:[#allocation6 + $0x5e0] ss:$16 sps:$4 sm:$0xff]  }
 0x295   :  { %v3335_v2 = vpop.f32.mrf.mxu1 }
 0x296   :  { %v3336_v18 = vadd.f32 %v3335_v2, %v3295_v62  ;;  %5024 = vmatpush2.bf16.msra.mxu1 %v7221_v60  ;;  %v7277_v60 = vld [vmem:[#allocation6 + $0x5a4] ss:$16 sps:$4 sm:$0xff]   ;;  %v7281_v2 = vld [vmem:[#allocation6 + $0x560] ss:$16 sps:$4 sm:$0xff]  }
 0x297   :  { %v3337_v10 = vpop.f32.mrf.mxu1  ;;  %5025 = vmatprep.subr.bf16.mxu1 %v7226_v61  ;;  %v7275_v61 = vld [vmem:[#allocation6 + $0x5a0] ss:$16 sps:$4 sm:$0xff]   ;;  %v7280_v62 = vld [vmem:[#allocation6 + $0x584] ss:$16 sps:$4 sm:$0xff]  }
 0x298   :  { %v3338_v11 = vadd.f32 %v3337_v10, %v3297_v48  ;;  %v3586_v12 = vadd.f32 %v3336_v18, %v81_v1  ;;  %v7283_v1 = vld [vmem:[#allocation6 + $0x564] ss:$16 sps:$4 sm:$0xff]   ;;  %v2084_v18 = vrot.slane %v7791_v55, %v7754_v15  ;;  %v2088_v10 = vrot.slane %v7791_v55, %v7757_v19 }
 0x299   :  { %v3339_v13 = vpop.f32.mrf.mxu1  ;;  %v7286_v48 = vld [vmem:[#allocation6 + $0x544] ss:$16 sps:$4 sm:$0xff]  }
 0x29a   :  { %v3587_v22 = vadd.f32 %v3338_v11, %v82_v8  ;;  %5026 = vmatpush2.bf16.msra.mxu1 %v7224_v46  ;;  %v7804_v30 = vpack.c.bf16 %v3586_v12, %v3586_v12  ;;  %v7284_v8 = vld [vmem:[#allocation6 + $0x540] ss:$16 sps:$4 sm:$0xff]   ;;  %v7289_v46 = vld [vmem:[#allocation6 + $0x524] ss:$16 sps:$4 sm:$0xff]   ;;  %v7522_v12 = vld [vmem:[%s7983_s0 + $0x8] sm:$0xff] }
 0x29b   :  { %v3340_v14 = vpop.f32.mrf.mxu1  ;;  %5027 = vmatprep.subr.bf16.mxu1 %v7229_v37  ;;  %v3377_v37 = vadd.f32 %v7783_v36, %v2084_v18  ;;  %v7287_v11 = vld [vmem:[#allocation6 + $0x520] ss:$16 sps:$4 sm:$0xff]   ;;  %v83_v13 = vunpack.c.l.bf16 %v7522_v12 }
 0x29c   :  { %v7802_v17 = vpack.c.bf16 %v3587_v22, %v3587_v22  ;;  %v7292_v14 = vld [vmem:[#allocation6 + $0x504] ss:$16 sps:$4 sm:$0xff]   ;;  %v7290_v36 = vld [vmem:[#allocation6 + $0x500] ss:$16 sps:$4 sm:$0xff]  }
 0x29e   :  { %4998 = vmatprep.mubr.bf16.mxu0 %v7802_v17  ;;  %5028 = vmatpush2.bf16.msra.mxu1 %v7227_v40 }
 0x29f   :  { %4999 = vmatmul.mubr.bf16.vlgmr.msra.gmra.mxu0 %v7804_v30  ;;  %5029 = vmatprep.subr.bf16.mxu1 %v7232_v16  ;;  %v3379_v16 = vadd.f32 %v7786_v52, %v2088_v10  ;;  %v7296_v52 = vld [vmem:[#allocation6 + $0x6e0] ss:$16 sps:$4 sm:$0xff]  }
 0x2a0   :  { %5049 = vmatpush1.bf16.msra.mxu0 %v7245_v20 }
 0x2a1   :  { %5050 = vmatprep.subr.bf16.mxu0 %v7250_v21  ;;  %v84_v21 = vunpack.c.h.bf16 %v7522_v12 }
 0x2a2   :  { %5030 = vmatpush2.bf16.msra.mxu1 %v7230_v26 }
 0x2a3   :  { %5031 = vmatprep.subr.bf16.mxu1 %v7235_v27 }
 0x2a4   :  { %5051 = vmatpush1.bf16.msra.mxu0 %v7248_v28 }
 0x2a5   :  { %5052 = vmatprep.subr.bf16.mxu0 %v7253_v29 }
 0x2a6   :  { %5032 = vmatpush2.bf16.msra.mxu1 %v7233_v31 }
 0x2a7   :  { %5033 = vmatprep.subr.bf16.mxu1 %v7238_v24 }
 0x2a8   :  { %5053 = vmatpush1.bf16.msra.mxu0 %v7251_v50 }
 0x2a9   :  { %5054 = vmatprep.subr.bf16.mxu0 %v7256_v23  ;;  %v7295_v23 = vld [vmem:[#allocation6 + $0x2ec] ss:$16 sps:$4 sm:$0xff]  }
 0x2aa   :  { %5034 = vmatpush2.bf16.msra.mxu1 %v7236_v25 }
 0x2ab   :  { %5035 = vmatprep.subr.bf16.mxu1 %v7241_v32 }
 0x2ac   :  { %5055 = vmatpush1.bf16.msra.mxu0 %v7254_v33 }
 0x2ad   :  { %5056 = vmatprep.subr.bf16.mxu0 %v7259_v34 }
 0x2ae   :  { %5036 = vmatpush2.bf16.msra.mxu1 %v7239_v35 }
 0x2af   :  { %5037 = vmatprep.subr.bf16.mxu1 %v7244_v9  ;;  %v7304_v9 = vld [vmem:[#allocation6 + $0x6c4] ss:$16 sps:$4 sm:$0xff]  }
 0x2b0   :  { %5057 = vmatpush1.bf16.msra.mxu0 %v7257_v5  ;;  %v7302_v5 = vld [vmem:[#allocation6 + $0x6c0] ss:$16 sps:$4 sm:$0xff]  }
 0x2b1   :  { %5058 = vmatprep.subr.bf16.mxu0 %v7262_v38  ;;  %v7310_v38 = vld [vmem:[#allocation6 + $0x6a4] ss:$16 sps:$4 sm:$0xff]  }
 0x2b2   :  { %5038 = vmatpush2.bf16.msra.mxu1 %v7242_v39  ;;  %v7308_v39 = vld [vmem:[#allocation6 + $0x6a0] ss:$16 sps:$4 sm:$0xff]  }
 0x2b3   :  { %5089 = vmatprep.subr.bf16.mxu1 %v7298_v42  ;;  %v7316_v42 = vld [vmem:[#allocation6 + $0x684] ss:$16 sps:$4 sm:$0xff]  }
 0x2b4   :  { %5059 = vmatpush1.bf16.msra.mxu0 %v7260_v43  ;;  %v7808_v45 = vpop.f32.mrf.mxu0  ;;  %v7314_v43 = vld [vmem:[#allocation6 + $0x680] ss:$16 sps:$4 sm:$0xff]  }
 0x2b5   :  { %5060 = vmatprep.subr.bf16.mxu0 %v7265_v44  ;;  %v7322_v44 = vld [vmem:[#allocation6 + $0x664] ss:$16 sps:$4 sm:$0xff]  }
 0x2b6   :  { %v7810_v47 = vpop.f32.mrf.mxu0 }
 0x2b8   :  { %5061 = vmatpush1.bf16.msra.mxu0 %v7263_v41  ;;  %v3462_v51 = vpop.f32.mrf.mxu0  ;;  %v7320_v41 = vld [vmem:[#allocation6 + $0x660] ss:$16 sps:$4 sm:$0xff]  }
 0x2b9   :  { %5062 = vmatprep.subr.bf16.mxu0 %v7268_v54  ;;  %v7328_v54 = vld [vmem:[#allocation6 + $0x644] ss:$16 sps:$4 sm:$0xff]  }
 0x2ba   :  { %v3463_v56 = vpop.f32.mrf.mxu0  ;;  %v7334_v51 = vld [vmem:[#allocation6 + $0x624] ss:$16 sps:$4 sm:$0xff]  }
 0x2bb   :  { %v7340_v56 = vld [vmem:[#allocation6 + $0x604] ss:$16 sps:$4 sm:$0xff]  }
 0x2bc   :  { %5063 = vmatpush1.bf16.msra.mxu0 %v7266_v49  ;;  %v7326_v49 = vld [vmem:[#allocation6 + $0x640] ss:$16 sps:$4 sm:$0xff]  }
 0x2bd   :  { %5064 = vmatprep.subr.bf16.mxu0 %v7271_v53  ;;  %v7332_v53 = vld [vmem:[#allocation6 + $0x620] ss:$16 sps:$4 sm:$0xff]  }
 0x2c0   :  { %5065 = vmatpush2.bf16.msra.mxu0 %v7269_v57  ;;  %v7338_v57 = vld [vmem:[#allocation6 + $0x600] ss:$16 sps:$4 sm:$0xff]  }
 0x2c1   :  { %5066 = vmatprep.subr.bf16.mxu0 %v7274_v58  ;;  %v7346_v58 = vld [vmem:[#allocation6 + $0xec] ss:$16 sps:$4 sm:$0xff]  }
 0x2c4   :  { %5067 = vmatpush2.bf16.msra.mxu0 %v7272_v59  ;;  %v2091_v59 = vsub.s32 4, %v7719_v4 }
 0x2c5   :  { %5068 = vmatprep.subr.bf16.mxu0 %v7277_v60  ;;  %v2095_v60 = vsub.s32 5, %v7719_v4 }
 0x2c8   :  { %5069 = vmatpush2.bf16.msra.mxu0 %v7275_v61  ;;  %v2092_v61 = vrot.slane %v7791_v55, %v2091_v59  ;;  %v7358_v59 = vld [vmem:[#allocation6 + $0xac] ss:$16 sps:$4 sm:$0xff]  }
 0x2c9   :  { %5070 = vmatprep.subr.bf16.mxu0 %v7280_v62  ;;  %v2096_v62 = vrot.slane %v7791_v55, %v2095_v60  ;;  %v7353_v60 = vld [vmem:[#allocation6 + $0x3a8] ss:$16 sps:$4 sm:$0xff]  }
 0x2cb   :  { %v3461_v18 = vadd.f32 %v7810_v47, %v2096_v62  ;;  %v7299_v47 = vld [vmem:[#allocation6 + $0x2c8] ss:$16 sps:$4 sm:$0xff]   ;;  %v7361_v62 = vld [vmem:[#allocation6 + $0x38c] ss:$16 sps:$4 sm:$0xff]  }
 0x2cc   :  { %5071 = vmatpush2.bf16.msra.mxu0 %v7278_v63  ;;  %v3459_v63 = vadd.f32 %v7808_v45, %v2092_v61  ;;  %v7356_v61 = vld [vmem:[#allocation6 + $0xa8] ss:$16 sps:$4 sm:$0xff]  }
 0x2cd   :  { %5072 = vmatprep.subr.bf16.mxu0 %v7283_v1  ;;  %v7523_v1 = vld [vmem:[%s7983_s0 + $0x10] sm:$0xff] }
 0x2d0   :  { %5073 = vmatpush2.bf16.msra.mxu0 %v7281_v2  ;;  %v85_v2 = vunpack.c.l.bf16 %v7523_v1 }
 0x2d1   :  { %5074 = vmatprep.subr.bf16.mxu0 %v7286_v48 }
 0x2d4   :  { %5075 = vmatpush2.bf16.msra.mxu0 %v7284_v8  ;;  %v6405_v40 = vpop.f32.mrf.mxu0 }
 0x2d5   :  { %v3417_v22 = vpop.f32.mrf.mxu1  ;;  %5076 = vmatprep.subr.bf16.mxu0 %v7289_v46  ;;  %v86_v46 = vunpack.c.h.bf16 %v7523_v1  ;;  %v7359_v1 = vld [vmem:[#allocation6 + $0x388] ss:$16 sps:$4 sm:$0xff]  }
 0x2d6   :  { %v3418_v20 = vadd.f32 %v3417_v22, %v3377_v37  ;;  %v6406_v27 = vpop.f32.mrf.mxu0 }
 0x2d7   :  { %v3419_v26 = vpop.f32.mrf.mxu1  ;;  %v7821_v29 = vadd.f32 %v6406_v27, %v6405_v40  ;;  %v7311_v27 = vld [vmem:[#allocation6 + $0x288] ss:$16 sps:$4 sm:$0xff]  }
 0x2d8   :  { %v3420_v28 = vadd.f32 %v3419_v26, %v3379_v16  ;;  %5077 = vmatpush2.bf16.msra.mxu0 %v7287_v11  ;;  %v3588_v31 = vadd.f32 %v3418_v20, %v83_v13  ;;  %v6408_v50 = vpop.f32.mrf.mxu0  ;;  %v7301_v16 = vld [vmem:[#allocation6 + $0x2cc] ss:$16 sps:$4 sm:$0xff]  }
 0x2d9   :  { %v3421_v24 = vpop.f32.mrf.mxu1  ;;  %5078 = vmatprep.subr.bf16.mxu0 %v7292_v14  ;;  %v7293_v14 = vld [vmem:[#allocation6 + $0x2e8] ss:$16 sps:$4 sm:$0xff]   ;;  %v7307_v20 = vld [vmem:[#allocation6 + $0x2ac] ss:$16 sps:$4 sm:$0xff]  }
 0x2da   :  { %v3589_v25 = vadd.f32 %v3420_v28, %v84_v21  ;;  %v6409_v33 = vpop.f32.mrf.mxu0  ;;  %v7823_v35 = vpack.c.bf16 %v3588_v31, %v3588_v31  ;;  %v7305_v21 = vld [vmem:[#allocation6 + $0x2a8] ss:$16 sps:$4 sm:$0xff]   ;;  %v7313_v26 = vld [vmem:[#allocation6 + $0x28c] ss:$16 sps:$4 sm:$0xff]   ;;  %v2099_v24 = vsub.s32 6, %v7719_v4 }
 0x2db   :  { %v3422_v32 = vpop.f32.mrf.mxu1  ;;  %v7319_v28 = vld [vmem:[#allocation6 + $0x26c] ss:$16 sps:$4 sm:$0xff]   ;;  %v7323_v50 = vld [vmem:[#allocation6 + $0x248] ss:$16 sps:$4 sm:$0xff]  }
 0x2dc   :  { %v3596_v34 = vpack.c.bf16 %v3589_v25, %v3589_v25  ;;  %5079 = vmatpush2.bf16.msra.mxu0 %v7290_v36  ;;  %v7317_v36 = vld [vmem:[#allocation6 + $0x268] ss:$16 sps:$4 sm:$0xff]   ;;  %v7325_v31 = vld [vmem:[#allocation6 + $0x24c] ss:$16 sps:$4 sm:$0xff]   ;;  %v2100_v25 = vrot.slane %v7791_v55, %v2099_v24 }
 0x2dd   :  { %5171 = vmatprep.subr.bf16.mxu0 %v7295_v23  ;;  %v7331_v23 = vld [vmem:[#allocation6 + $0x22c] ss:$16 sps:$4 sm:$0xff]   ;;  %v7329_v32 = vld [vmem:[#allocation6 + $0x228] ss:$16 sps:$4 sm:$0xff]  }
 0x2de   :  { %5039 = vmatprep.mubr.bf16.mxu1 %v3596_v34  ;;  %v7400_v24 = vld [vmem:[#allocation6 + $0x1cc] ss:$16 sps:$4 sm:$0xff]  }
 0x2df   :  { %5040 = vmatmul.mubr.bf16.vlgmr.msra.gmra.mxu1 %v7823_v35 }
 0x2e0   :  { %5090 = vmatpush1.bf16.msra.mxu1 %v7296_v52  ;;  %5121 = vmatprep.mubr.bf16.mxu1 %v7596_v0 }
 0x2e1   :  { %5091 = vmatprep.subr.bf16.mxu1 %v7304_v9  ;;  %v3541_v9 = vadd.f32 %v7821_v29, %v2100_v25  ;;  %v7349_v29 = vld [vmem:[#allocation6 + $0x3cc] ss:$16 sps:$4 sm:$0xff]  }
 0x2e4   :  { %5092 = vmatpush1.bf16.msra.mxu1 %v7302_v5  ;;  %v7524_v5 = vld [vmem:[%s7983_s0 + $0x18] sm:$0xf] }
 0x2e5   :  { %5093 = vmatprep.subr.bf16.mxu1 %v7310_v38  ;;  %v87_v38 = vunpack.c.l.bf16 %v7524_v5 }
 0x2e8   :  { %5094 = vmatpush1.bf16.msra.mxu1 %v7308_v39  ;;  %v7335_v39 = vld [vmem:[#allocation6 + $0x208] ss:$16 sps:$4 sm:$0xff]  }
 0x2e9   :  { %5095 = vmatprep.subr.bf16.mxu1 %v7316_v42 }
 0x2ec   :  { %5096 = vmatpush1.bf16.msra.mxu1 %v7314_v43  ;;  %v7343_v43 = vld [vmem:[#allocation6 + $0x3ec] ss:$16 sps:$4 sm:$0xff]  }
 0x2ed   :  { %5097 = vmatprep.subr.bf16.mxu1 %v7322_v44 }
 0x2f0   :  { %5098 = vmatpush1.bf16.msra.mxu1 %v7320_v41 }
 0x2f1   :  { %5099 = vmatprep.subr.bf16.mxu1 %v7328_v54  ;;  %v7341_v54 = vld [vmem:[#allocation6 + $0x3e8] ss:$16 sps:$4 sm:$0xff]  }
 0x2f4   :  { %5100 = vmatpush1.bf16.msra.mxu1 %v7326_v49  ;;  %v7344_v49 = vld [vmem:[#allocation6 + $0xe8] ss:$16 sps:$4 sm:$0xff]  }
 0x2f5   :  { %5101 = vmatprep.subr.bf16.mxu1 %v7334_v51 }
 0x2f8   :  { %5102 = vmatpush1.bf16.msra.mxu1 %v7332_v53  ;;  %v7352_v53 = vld [vmem:[#allocation6 + $0xcc] ss:$16 sps:$4 sm:$0xff]  }
 0x2f9   :  { %5103 = vmatprep.subr.bf16.mxu1 %v7340_v56  ;;  %v7347_v56 = vld [vmem:[#allocation6 + $0x3c8] ss:$16 sps:$4 sm:$0xff]  }
 0x2fc   :  { %5104 = vmatpush1.bf16.msra.mxu1 %v7338_v57  ;;  %v7350_v57 = vld [vmem:[#allocation6 + $0xc8] ss:$16 sps:$4 sm:$0xff]  }
 0x2fd   :  { %5130 = vmatprep.subr.bf16.mxu1 %v7346_v58  ;;  %v7355_v58 = vld [vmem:[#allocation6 + $0x3ac] ss:$16 sps:$4 sm:$0xff]  }
 0x315   :  { %v3499_v48 = vpop.f32.mrf.mxu1 }
 0x316   :  { %v3500_v8 = vadd.f32 %v3499_v48, %v3459_v63  ;;  %v7364_v63 = vld [vmem:[#allocation6 + $0x8c] ss:$16 sps:$4 sm:$0xff]  }
 0x317   :  { %v3501_v10 = vpop.f32.mrf.mxu1  ;;  %v7367_v48 = vld [vmem:[#allocation6 + $0x36c] ss:$16 sps:$4 sm:$0xff]  }
 0x318   :  { %v3502_v37 = vadd.f32 %v3501_v10, %v3461_v18  ;;  %v3590_v11 = vadd.f32 %v3500_v8, %v85_v2  ;;  %v7362_v2 = vld [vmem:[#allocation6 + $0x88] ss:$16 sps:$4 sm:$0xff]   ;;  %v7376_v10 = vld [vmem:[#allocation6 + $0x4c] ss:$16 sps:$4 sm:$0xff]  }
 0x319   :  { %v3503_v12 = vpop.f32.mrf.mxu1  ;;  %v7365_v18 = vld [vmem:[#allocation6 + $0x368] ss:$16 sps:$4 sm:$0xff]  }
 0x31a   :  { %v3591_v13 = vadd.f32 %v3502_v37, %v86_v46  ;;  %v7838_v45 = vpack.c.bf16 %v3590_v11, %v3590_v11  ;;  %v7368_v8 = vld [vmem:[#allocation6 + $0x68] ss:$16 sps:$4 sm:$0xff]   ;;  %v7373_v46 = vld [vmem:[#allocation6 + $0x34c] ss:$16 sps:$4 sm:$0xff]  }
 0x31b   :  { %v3504_v22 = vpop.f32.mrf.mxu1  ;;  %v7371_v37 = vld [vmem:[#allocation6 + $0x348] ss:$16 sps:$4 sm:$0xff]   ;;  %v7379_v12 = vld [vmem:[#allocation6 + $0x32c] ss:$16 sps:$4 sm:$0xff]  }
 0x31c   :  { %v7836_v40 = vpack.c.bf16 %v3591_v13, %v3591_v13  ;;  %v7374_v11 = vld [vmem:[#allocation6 + $0x48] ss:$16 sps:$4 sm:$0xff]   ;;  %v7382_v13 = vld [vmem:[#allocation6 + $0x2c] ss:$16 sps:$4 sm:$0xff]  }
 0x31d   :  { %v7377_v22 = vld [vmem:[#allocation6 + $0x328] ss:$16 sps:$4 sm:$0xff]  }
 0x31e   :  { %5080 = vmatprep.mubr.bf16.mxu0 %v7836_v40 }
 0x31f   :  { %5081 = vmatmul.mubr.bf16.vlgmr.msra.gmra.mxu0 %v7838_v45 }
 0x320   :  { %5172 = vmatpush1.bf16.msra.mxu0 %v7293_v14  ;;  %5203 = vmatprep.mubr.bf16.mxu0 %v3596_v34  ;;  %v7337_v34 = vld [vmem:[#allocation6 + $0x20c] ss:$16 sps:$4 sm:$0xff]   ;;  %v7380_v14 = vld [vmem:[#allocation6 + $0x28] ss:$16 sps:$4 sm:$0xff]  }
 0x321   :  { %5173 = vmatprep.subr.bf16.mxu0 %v7301_v16  ;;  %v7385_v16 = vld [vmem:[#allocation6 + $0x30c] ss:$16 sps:$4 sm:$0xff]  }
 0x324   :  { %5174 = vmatpush1.bf16.msra.mxu0 %v7299_v47  ;;  %v7388_v47 = vld [vmem:[#allocation6 + $0xc] ss:$16 sps:$4 sm:$0xff]  }
 0x325   :  { %5175 = vmatprep.subr.bf16.mxu0 %v7307_v20  ;;  %v7383_v20 = vld [vmem:[#allocation6 + $0x308] ss:$16 sps:$4 sm:$0xff]  }
 0x328   :  { %5176 = vmatpush1.bf16.msra.mxu0 %v7305_v21  ;;  %v7386_v21 = vld [vmem:[#allocation6 + $0x8] ss:$16 sps:$4 sm:$0xff]  }
 0x329   :  { %5177 = vmatprep.subr.bf16.mxu0 %v7313_v26  ;;  %v7391_v26 = vld [vmem:[#allocation6 + $0x6ec] ss:$16 sps:$4 sm:$0xff]  }
 0x32c   :  { %5178 = vmatpush1.bf16.msra.mxu0 %v7311_v27  ;;  %v7394_v27 = vld [vmem:[#allocation6 + $0x1ec] ss:$16 sps:$4 sm:$0xff]  }
 0x32d   :  { %5179 = vmatprep.subr.bf16.mxu0 %v7319_v28  ;;  %v7389_v28 = vld [vmem:[#allocation6 + $0x6e8] ss:$16 sps:$4 sm:$0xff]  }
 0x330   :  { %5180 = vmatpush1.bf16.msra.mxu0 %v7317_v36  ;;  %v7392_v36 = vld [vmem:[#allocation6 + $0x1e8] ss:$16 sps:$4 sm:$0xff]  }
 0x331   :  { %5181 = vmatprep.subr.bf16.mxu0 %v7325_v31  ;;  %v7397_v31 = vld [vmem:[#allocation6 + $0x6cc] ss:$16 sps:$4 sm:$0xff]  }
 0x334   :  { %5182 = vmatpush1.bf16.msra.mxu0 %v7323_v50 }
 0x335   :  { %v6427_v33 = vpop.f32.mrf.mxu1  ;;  %5183 = vmatprep.subr.bf16.mxu0 %v7331_v23  ;;  %v7395_v23 = vld [vmem:[#allocation6 + $0x6c8] ss:$16 sps:$4 sm:$0xff]  }
 0x337   :  { %v6428_v52 = vpop.f32.mrf.mxu1 }
 0x338   :  { %v6429_v4 = vadd.f32 %v6428_v52, %v6427_v33  ;;  %5184 = vmatpush1.bf16.msra.mxu0 %v7329_v32  ;;  %v7398_v32 = vld [vmem:[#allocation6 + $0x1c8] ss:$16 sps:$4 sm:$0xff]   ;;  %v7403_v33 = vld [vmem:[#allocation6 + $0x6ac] ss:$16 sps:$4 sm:$0xff]  }
 0x339   :  { %v6430_v42 = vpop.f32.mrf.mxu1  ;;  %5185 = vmatprep.subr.bf16.mxu0 %v7337_v34  ;;  %v7406_v34 = vld [vmem:[#allocation6 + $0x1ac] ss:$16 sps:$4 sm:$0xff]  }
 0x33a   :  { %v3581_v55 = vadd.f32 %v6429_v4, %v3541_v9  ;;  %v7401_v9 = vld [vmem:[#allocation6 + $0x6a8] ss:$16 sps:$4 sm:$0xff]   ;;  %v7412_v4 = vld [vmem:[#allocation6 + $0x18c] ss:$16 sps:$4 sm:$0xff]  }
 0x33b   :  { %v6431_v44 = vpop.f32.mrf.mxu1  ;;  %v7415_v42 = vld [vmem:[#allocation6 + $0x66c] ss:$16 sps:$4 sm:$0xff]  }
 0x33c   :  { %v3592_v41 = vadd.f32 %v3581_v55, %v87_v38  ;;  %5186 = vmatpush1.bf16.msra.mxu0 %v7335_v39  ;;  %v7409_v38 = vld [vmem:[#allocation6 + $0x68c] ss:$16 sps:$4 sm:$0xff]   ;;  %v7410_v39 = vld [vmem:[#allocation6 + $0x188] ss:$16 sps:$4 sm:$0xff]  }
 0x33d   :  { %5187 = vmatprep.subr.bf16.mxu0 %v7343_v43  ;;  %v7418_v43 = vld [vmem:[#allocation6 + $0x16c] ss:$16 sps:$4 sm:$0xff]   ;;  %v7413_v55 = vld [vmem:[#allocation6 + $0x668] ss:$16 sps:$4 sm:$0xff]  }
 0x33e   :  { %v7848_v51 = vpack.c.bf16 %v3592_v41, %v3592_v41  ;;  %v7416_v44 = vld [vmem:[#allocation6 + $0x168] ss:$16 sps:$4 sm:$0xff]   ;;  %v7421_v41 = vld [vmem:[#allocation6 + $0x64c] ss:$16 sps:$4 sm:$0xff]  }
 0x340   :  { %5188 = vmatpush2.bf16.msra.mxu0 %v7341_v54  ;;  %5122 = vmatmul.mubr.bf16.vlgmr.msra.gmra.mxu1 %v7848_v51  ;;  %v7424_v54 = vld [vmem:[#allocation6 + $0x14c] ss:$16 sps:$4 sm:$0xff]  }
 0x341   :  { %5131 = vmatpush1.bf16.msra.mxu1 %v7344_v49  ;;  %5162 = vmatprep.mubr.bf16.mxu1 %v7802_v17  ;;  %v7370_v17 = vld [vmem:[#allocation6 + $0x6c] ss:$16 sps:$4 sm:$0xff]   ;;  %v7419_v49 = vld [vmem:[#allocation6 + $0x648] ss:$16 sps:$4 sm:$0xff]  }
 0x342   :  { %5189 = vmatprep.subr.bf16.mxu0 %v7349_v29  ;;  %5132 = vmatprep.subr.bf16.mxu1 %v7352_v53  ;;  %v7422_v29 = vld [vmem:[#allocation6 + $0x148] ss:$16 sps:$4 sm:$0xff]   ;;  %v7427_v53 = vld [vmem:[#allocation6 + $0x62c] ss:$16 sps:$4 sm:$0xff]  }
 0x344   :  { %5190 = vmatpush2.bf16.msra.mxu0 %v7347_v56  ;;  %v7430_v56 = vld [vmem:[#allocation6 + $0x12c] ss:$16 sps:$4 sm:$0xff]  }
 0x345   :  { %5133 = vmatpush1.bf16.msra.mxu1 %v7350_v57  ;;  %5191 = vmatprep.subr.bf16.mxu0 %v7355_v58  ;;  %v7425_v57 = vld [vmem:[#allocation6 + $0x628] ss:$16 sps:$4 sm:$0xff]  }
 0x346   :  { %5134 = vmatprep.subr.bf16.mxu1 %v7358_v59  ;;  %v7428_v58 = vld [vmem:[#allocation6 + $0x128] ss:$16 sps:$4 sm:$0xff]   ;;  %v7433_v59 = vld [vmem:[#allocation6 + $0x60c] ss:$16 sps:$4 sm:$0xff]  }
 0x348   :  { %5192 = vmatpush2.bf16.msra.mxu0 %v7353_v60  ;;  %v7436_v60 = vld [vmem:[#allocation6 + $0x10c] ss:$16 sps:$4 sm:$0xff]  }
 0x349   :  { %5135 = vmatpush1.bf16.msra.mxu1 %v7356_v61  ;;  %5193 = vmatprep.subr.bf16.mxu0 %v7361_v62  ;;  %v7431_v61 = vld [vmem:[#allocation6 + $0x608] ss:$16 sps:$4 sm:$0xff]  }
 0x34a   :  { %5136 = vmatprep.subr.bf16.mxu1 %v7364_v63  ;;  %v7434_v62 = vld [vmem:[#allocation6 + $0x108] ss:$16 sps:$4 sm:$0xff]  }
 0x34b   :  { %v7485_v63 = vld [vmem:[%s7991_s8 + $0x78] sm:$0xff]  }
 0x34c   :  { %5194 = vmatpush2.bf16.msra.mxu0 %v7359_v1  ;;  %v7439_v1 = vld [vmem:[#allocation6 + $0x4ec] ss:$16 sps:$4 sm:$0xff]  }
 0x34d   :  { %5137 = vmatpush1.bf16.msra.mxu1 %v7362_v2  ;;  %5195 = vmatprep.subr.bf16.mxu0 %v7367_v48  ;;  %v7486_v2 = vld [vmem:[%s7991_s8 + $0x38] sm:$0xff]  }
 0x34e   :  { %5138 = vmatprep.subr.bf16.mxu1 %v7370_v17  ;;  %v7437_v48 = vld [vmem:[#allocation6 + $0x4e8] ss:$16 sps:$4 sm:$0xff]   ;;  %v7442_v17 = vld [vmem:[#allocation6 + $0x4cc] ss:$16 sps:$4 sm:$0xff]  }
 0x350   :  { %5196 = vmatpush2.bf16.msra.mxu0 %v7365_v18  ;;  %v7487_v18 = vld [vmem:[%s7991_s8 + $0x70] sm:$0xff]  }
 0x351   :  { %5139 = vmatpush1.bf16.msra.mxu1 %v7368_v8  ;;  %5197 = vmatprep.subr.bf16.mxu0 %v7373_v46  ;;  %v7488_v8 = vld [vmem:[%s7991_s8 + $0x30] sm:$0xff]   ;;  %v7440_v46 = vld [vmem:[#allocation6 + $0x4c8] ss:$16 sps:$4 sm:$0xff]  }
 0x352   :  { %5140 = vmatprep.subr.bf16.mxu1 %v7376_v10  ;;  %v7489_v10 = vld [vmem:[%s7991_s8 + $0x68] sm:$0xff]  }
 0x354   :  { %5198 = vmatpush2.bf16.msra.mxu0 %v7371_v37  ;;  %v7445_v37 = vld [vmem:[#allocation6 + $0x4ac] ss:$16 sps:$4 sm:$0xff]  }
 0x355   :  { %5141 = vmatpush1.bf16.msra.mxu1 %v7374_v11  ;;  %5199 = vmatprep.subr.bf16.mxu0 %v7379_v12  ;;  %v7448_v11 = vld [vmem:[#allocation6 + $0x48c] ss:$16 sps:$4 sm:$0xff]   ;;  %v7492_v12 = vld [vmem:[%s7991_s8 + $0x20] sm:$0xff]  }
 0x356   :  { %5142 = vmatprep.subr.bf16.mxu1 %v7382_v13  ;;  %v7446_v13 = vld [vmem:[#allocation6 + $0x488] ss:$16 sps:$4 sm:$0xff]  }
 0x358   :  { %5200 = vmatpush2.bf16.msra.mxu0 %v7377_v22  ;;  %v7493_v22 = vld [vmem:[%s7991_s8 + $0x58] sm:$0xff]  }
 0x359   :  { %5143 = vmatpush1.bf16.msra.mxu1 %v7380_v14  ;;  %5201 = vmatprep.subr.bf16.mxu0 %v7385_v16  ;;  %v7451_v14 = vld [vmem:[#allocation6 + $0x46c] ss:$16 sps:$4 sm:$0xff]  }
 0x35a   :  { %5144 = vmatprep.subr.bf16.mxu1 %v7388_v47  ;;  %v7494_v16 = vld [vmem:[%s7991_s8 + $0x18] sm:$0xff]  }
 0x35b   :  { %v7449_v47 = vld [vmem:[#allocation6 + $0x468] ss:$16 sps:$4 sm:$0xff]  }
 0x35c   :  { %5202 = vmatpush2.bf16.msra.mxu0 %v7383_v20  ;;  %v7495_v20 = vld [vmem:[%s7991_s8 + $0x50] sm:$0xff]  }
 0x35d   :  { %5145 = vmatpush1.bf16.msra.mxu1 %v7386_v21  ;;  %5253 = vmatprep.subr.bf16.mxu0 %v7391_v26  ;;  %v7454_v21 = vld [vmem:[#allocation6 + $0x44c] ss:$16 sps:$4 sm:$0xff]   ;;  %v7496_v26 = vld [vmem:[%s7991_s8 + $0x10] sm:$0xff]  }
 0x35e   :  { %5146 = vmatprep.subr.bf16.mxu1 %v7394_v27  ;;  %v7452_v27 = vld [vmem:[#allocation6 + $0x448] ss:$16 sps:$4 sm:$0xff]  }
 0x35f   :  { %5204 = vmatmul.mubr.bf16.vlgmr.msra.gmra.mxu0 %v7823_v35  ;;  %v7853_v50 = vpop.f32.mrf.mxu0  ;;  %v7404_v35 = vld [vmem:[#allocation6 + $0x1a8] ss:$16 sps:$4 sm:$0xff]  }
 0x360   :  { %5254 = vmatpush1.bf16.msra.mxu0 %v7389_v28  ;;  %5285 = vmatprep.mubr.bf16.mxu0 %v7596_v0  ;;  %v7407_v0 = vld [vmem:[#allocation6 + $0x688] ss:$16 sps:$4 sm:$0xff]  }
 0x361   :  { %5147 = vmatpush2.bf16.msra.mxu1 %v7392_v36  ;;  %v7856_v25 = vpop.f32.mrf.mxu0  ;;  %5255 = vmatprep.subr.bf16.mxu0 %v7397_v31  ;;  %v7497_v28 = vld [vmem:[%s7991_s8 + $0x48] sm:$0xff]  }
 0x362   :  { %5148 = vmatprep.subr.bf16.mxu1 %v7400_v24  ;;  %v7457_v36 = vld [vmem:[#allocation6 + $0x42c] ss:$16 sps:$4 sm:$0xff]   ;;  %v7455_v24 = vld [vmem:[#allocation6 + $0x428] ss:$16 sps:$4 sm:$0xff]  }
 0x363   :  { %v5004_v52 = vpop.f32.mrf.mxu0  ;;  %v7498_v31 = vld [vmem:[%s7991_s8 + $0x8] sm:$0xff]  }
 0x364   :  { %5256 = vmatpush1.bf16.msra.mxu0 %v7395_v23  ;;  %v7499_v23 = vld [vmem:[%s7991_s8 + $0x40] sm:$0xff]   ;;  %v7458_v52 = vld [vmem:[#allocation6 + $0x408] ss:$16 sps:$4 sm:$0xff]  }
 0x365   :  { %5149 = vmatpush2.bf16.msra.mxu1 %v7398_v32  ;;  %v5005_v5 = vpop.f32.mrf.mxu0  ;;  %5257 = vmatprep.subr.bf16.mxu0 %v7403_v33  ;;  %v7460_v32 = vld [vmem:[#allocation6 + $0x40c] ss:$16 sps:$4 sm:$0xff]   ;;  %v7909_v33 = vld [vmem:[%s7990_s7] sm:$0xf] }
 0x366   :  { %5150 = vmatprep.subr.bf16.mxu1 %v7406_v34  ;;  %v7500_v34 = vld [vmem:[%s7991_s8] sm:$0xff]   ;;  %v7463_v5 = vld [vmem:[#allocation6 + $0x5ec] ss:$16 sps:$4 sm:$0xff]  }
 0x368   :  { %5258 = vmatpush1.bf16.msra.mxu0 %v7401_v9  ;;  %v3829_v9 = vrot.slane %v7909_v33, %v7727_v6 }
 0x369   :  { %5151 = vmatpush2.bf16.msra.mxu1 %v7404_v35  ;;  %5259 = vmatprep.subr.bf16.mxu0 %v7409_v38  ;;  %v3833_v35 = vrot.slane %v7909_v33, %v7730_v7  ;;  %v7461_v38 = vld [vmem:[#allocation6 + $0x5e8] ss:$16 sps:$4 sm:$0xff]  }
 0x36a   :  { %5152 = vmatprep.subr.bf16.mxu1 %v7412_v4  ;;  %v5001_v4 = vadd.f32 %v7853_v50, %v3829_v9  ;;  %v7470_v50 = vld [vmem:[#allocation6 + $0x588] ss:$16 sps:$4 sm:$0xff]  }
 0x36c   :  { %5260 = vmatpush1.bf16.msra.mxu0 %v7407_v0  ;;  %v7466_v0 = vld [vmem:[#allocation6 + $0x5cc] ss:$16 sps:$4 sm:$0xff]  }
 0x36d   :  { %5153 = vmatpush2.bf16.msra.mxu1 %v7410_v39  ;;  %5261 = vmatprep.subr.bf16.mxu0 %v7415_v42  ;;  %v5003_v42 = vadd.f32 %v7856_v25, %v3833_v35  ;;  %v7478_v25 = vld [vmem:[#allocation6 + $0x54c] ss:$16 sps:$4 sm:$0xff]  }
 0x36e   :  { %5154 = vmatprep.subr.bf16.mxu1 %v7418_v43 }
 0x370   :  { %5262 = vmatpush1.bf16.msra.mxu0 %v7413_v55 }
 0x371   :  { %5155 = vmatpush2.bf16.msra.mxu1 %v7416_v44  ;;  %5263 = vmatprep.subr.bf16.mxu0 %v7421_v41  ;;  %v7464_v44 = vld [vmem:[#allocation6 + $0x5c8] ss:$16 sps:$4 sm:$0xff]   ;;  %v7469_v41 = vld [vmem:[#allocation6 + $0x5ac] ss:$16 sps:$4 sm:$0xff]  }
 0x372   :  { %5156 = vmatprep.subr.bf16.mxu1 %v7424_v54 }
 0x374   :  { %5264 = vmatpush1.bf16.msra.mxu0 %v7419_v49  ;;  %v7467_v49 = vld [vmem:[#allocation6 + $0x5a8] ss:$16 sps:$4 sm:$0xff]  }
 0x375   :  { %5157 = vmatpush2.bf16.msra.mxu1 %v7422_v29  ;;  %5265 = vmatprep.subr.bf16.mxu0 %v7427_v53  ;;  %v7472_v29 = vld [vmem:[#allocation6 + $0x58c] ss:$16 sps:$4 sm:$0xff]  }
 0x376   :  { %5158 = vmatprep.subr.bf16.mxu1 %v7430_v56  ;;  %v7475_v53 = vld [vmem:[#allocation6 + $0x56c] ss:$16 sps:$4 sm:$0xff]   ;;  %v7473_v56 = vld [vmem:[#allocation6 + $0x568] ss:$16 sps:$4 sm:$0xff]  }
 0x378   :  { %5266 = vmatpush1.bf16.msra.mxu0 %v7425_v57  ;;  %v7476_v57 = vld [vmem:[#allocation6 + $0x548] ss:$16 sps:$4 sm:$0xff]  }
 0x379   :  { %5159 = vmatpush2.bf16.msra.mxu1 %v7428_v58  ;;  %5267 = vmatprep.subr.bf16.mxu0 %v7433_v59  ;;  %v7481_v58 = vld [vmem:[#allocation6 + $0x52c] ss:$16 sps:$4 sm:$0xff]   ;;  %v7479_v59 = vld [vmem:[#allocation6 + $0x528] ss:$16 sps:$4 sm:$0xff]  }
 0x37a   :  { %5160 = vmatprep.subr.bf16.mxu1 %v7436_v60  ;;  %v7484_v60 = vld [vmem:[#allocation6 + $0x50c] ss:$16 sps:$4 sm:$0xff]  }
 0x37c   :  { %5268 = vmatpush1.bf16.msra.mxu0 %v7431_v61  ;;  %v7482_v61 = vld [vmem:[#allocation6 + $0x508] ss:$16 sps:$4 sm:$0xff]  }
 0x37d   :  { %5161 = vmatpush2.bf16.msra.mxu1 %v7434_v62  ;;  %6433 = vmatprep.subr.bf16.mxu0 %v7485_v63  ;;  %v7501_v62 = vld [vmem:[%s7991_s8 + $0xf8] sm:$0xff]  }
 0x37e   :  { %5212 = vmatprep.subr.bf16.mxu1 %v7439_v1  ;;  %v7502_v63 = vld [vmem:[%s7991_s8 + $0xb8] sm:$0xff]   ;;  %v7503_v1 = vld [vmem:[%s7991_s8 + $0xf0] sm:$0xff]  }
 0x37f   :  { %5286 = vmatmul.mubr.bf16.vlgmr.msra.gmra.mxu0 %v7848_v51  ;;  %v7443_v51 = vld [vmem:[#allocation6 + $0x4a8] ss:$16 sps:$4 sm:$0xff]  }
 0x380   :  { %5163 = vmatmul.mubr.bf16.vlgmr.msra.gmra.mxu1 %v7804_v30  ;;  %6434 = vmatpush3.bf16.msra.mxu0 %v7486_v2  ;;  %v7490_v30 = vld [vmem:[%s7991_s8 + $0x28] sm:$0xff]   ;;  %v7504_v2 = vld [vmem:[%s7991_s8 + $0xb0] sm:$0xff]  }
 0x381   :  { %5213 = vmatpush1.bf16.msra.mxu1 %v7437_v48  ;;  %5244 = vmatprep.mubr.bf16.mxu1 %v7836_v40  ;;  %v7491_v40 = vld [vmem:[%s7991_s8 + $0x60] sm:$0xff]   ;;  %v7506_v48 = vld [vmem:[%s7991_s8 + $0xa8] sm:$0xff]  }
 0x382   :  { %5214 = vmatprep.subr.bf16.mxu1 %v7442_v17  ;;  %6435 = vmatprep.subr.bf16.mxu0 %v7487_v18  ;;  %v7507_v17 = vld [vmem:[%s7991_s8 + $0xe0] sm:$0xff]  }
 0x383   :  { %v7508_v18 = vld [vmem:[%s7991_s8 + $0xa0] sm:$0xff]  }
 0x384   :  { %6436 = vmatpush3.bf16.msra.mxu0 %v7488_v8  ;;  %v7509_v8 = vld [vmem:[%s7991_s8 + $0xd8] sm:$0xff]  }
 0x385   :  { %5215 = vmatpush1.bf16.msra.mxu1 %v7440_v46  ;;  %6437 = vmatprep.subr.bf16.mxu0 %v7489_v10  ;;  %v7510_v46 = vld [vmem:[%s7991_s8 + $0x98] sm:$0xff]  }
 0x386   :  { %5216 = vmatprep.subr.bf16.mxu1 %v7445_v37 }
 0x388   :  { %6438 = vmatpush3.bf16.msra.mxu0 %v7490_v30 }
 0x389   :  { %5217 = vmatpush1.bf16.msra.mxu1 %v7443_v51  ;;  %6439 = vmatprep.subr.bf16.mxu0 %v7491_v40  ;;  %v7511_v40 = vld [vmem:[%s7991_s8 + $0xd0] sm:$0xff]  }
 0x38a   :  { %5218 = vmatprep.subr.bf16.mxu1 %v7448_v11 }
 0x38c   :  { %6440 = vmatpush3.bf16.msra.mxu0 %v7492_v12  ;;  %v7512_v12 = vld [vmem:[%s7991_s8 + $0x90] sm:$0xff]  }
 0x38d   :  { %5219 = vmatpush1.bf16.msra.mxu1 %v7446_v13  ;;  %6441 = vmatprep.subr.bf16.mxu0 %v7493_v22 }
 0x38e   :  { %5220 = vmatprep.subr.bf16.mxu1 %v7451_v14 }
 0x390   :  { %6442 = vmatpush3.bf16.msra.mxu0 %v7494_v16 }
 0x391   :  { %5221 = vmatpush1.bf16.msra.mxu1 %v7449_v47  ;;  %6443 = vmatprep.subr.bf16.mxu0 %v7495_v20  ;;  %v7513_v47 = vld [vmem:[%s7991_s8 + $0xc8] sm:$0xff]  }
 0x392   :  { %5222 = vmatprep.subr.bf16.mxu1 %v7454_v21  ;;  %v7514_v21 = vld [vmem:[%s7991_s8 + $0x88] sm:$0xff]  }
 0x394   :  { %6444 = vmatpush3.bf16.msra.mxu0 %v7496_v26 }
 0x395   :  { %5223 = vmatpush1.bf16.msra.mxu1 %v7452_v27  ;;  %6445 = vmatprep.subr.bf16.mxu0 %v7497_v28 }
 0x396   :  { %5224 = vmatprep.subr.bf16.mxu1 %v7457_v36 }
 0x398   :  { %6446 = vmatpush3.bf16.msra.mxu0 %v7498_v31  ;;  %v7515_v31 = vld [vmem:[%s7991_s8 + $0xc0] sm:$0xff]  }
 0x399   :  { %5225 = vmatpush1.bf16.msra.mxu1 %v7455_v24  ;;  %6447 = vmatprep.subr.bf16.mxu0 %v7499_v23  ;;  %v7516_v23 = vld [vmem:[%s7991_s8 + $0x80] sm:$0xff]  }
 0x39a   :  { %5226 = vmatprep.subr.bf16.mxu1 %v7460_v32 }
 0x39c   :  { %6448 = vmatpush3.bf16.msra.mxu0 %v7500_v34 }
 0x39d   :  { %5227 = vmatpush1.bf16.msra.mxu1 %v7458_v52 }
 0x39e   :  { %5228 = vmatprep.subr.bf16.mxu1 %v7463_v5 }
 0x39f   :  { %v5041_v39 = vpop.f32.mrf.mxu1 }
 0x3a0   :  { %v5042_v43 = vadd.f32 %v5041_v39, %v5001_v4 }
 0x3a1   :  { %5229 = vmatpush2.bf16.msra.mxu1 %v7461_v38  ;;  %v5043_v55 = vpop.f32.mrf.mxu1 }
 0x3a2   :  { %v5044_v6 = vadd.f32 %v5043_v55, %v5003_v42  ;;  %5230 = vmatprep.subr.bf16.mxu1 %v7466_v0 }
 0x3a3   :  { %v5045_v54 = vpop.f32.mrf.mxu1 }
 0x3a5   :  { %5231 = vmatpush2.bf16.msra.mxu1 %v7464_v44  ;;  %v5046_v7 = vpop.f32.mrf.mxu1  ;;  %v3837_v44 = vrot.slane %v7909_v33, %v7754_v15 }
 0x3a6   :  { %5232 = vmatprep.subr.bf16.mxu1 %v7469_v41 }
 0x3a9   :  { %5233 = vmatpush2.bf16.msra.mxu1 %v7467_v49 }
 0x3aa   :  { %5234 = vmatprep.subr.bf16.mxu1 %v7472_v29 }
 0x3ad   :  { %5235 = vmatpush2.bf16.msra.mxu1 %v7470_v50 }
 0x3ae   :  { %5236 = vmatprep.subr.bf16.mxu1 %v7475_v53 }
 0x3b1   :  { %5237 = vmatpush2.bf16.msra.mxu1 %v7473_v56 }
 0x3b2   :  { %5238 = vmatprep.subr.bf16.mxu1 %v7478_v25 }
 0x3b5   :  { %5239 = vmatpush2.bf16.msra.mxu1 %v7476_v57 }
 0x3b6   :  { %5240 = vmatprep.subr.bf16.mxu1 %v7481_v58 }
 0x3b9   :  { %5241 = vmatpush2.bf16.msra.mxu1 %v7479_v59 }
 0x3ba   :  { %5242 = vmatprep.subr.bf16.mxu1 %v7484_v60 }
 0x3bd   :  { %5243 = vmatpush2.bf16.msra.mxu1 %v7482_v61 }
 0x3be   :  { %6455 = vmatprep.subr.bf16.mxu1 %v7501_v62 }
 0x3c0   :  { %5245 = vmatmul.mubr.bf16.vlgmr.msra.gmra.mxu1 %v7838_v45  ;;  %v7505_v45 = vld [vmem:[%s7991_s8 + $0xe8] sm:$0xff]  }
 0x3c1   :  { %6456 = vmatpush3.bf16.msra.mxu1 %v7502_v63 }
 0x3c2   :  { %6457 = vmatprep.subr.bf16.mxu1 %v7503_v1 }
 0x3c5   :  { %6458 = vmatpush3.bf16.msra.mxu1 %v7504_v2 }
 0x3c6   :  { %6459 = vmatprep.subr.bf16.mxu1 %v7505_v45  ;;  %v6356_v45 = vld [vmem:[%s7992_s9] ss:$0 sm:$0xff] }
 0x3c9   :  { %6460 = vmatpush3.bf16.msra.mxu1 %v7506_v48 }
 0x3ca   :  { %6461 = vmatprep.subr.bf16.mxu1 %v7507_v17  ;;  %v5646_v17 = vand.u32 127, %v314_v3 }
 0x3cc   :  { %vm5647_vm0 = vcmp.lt.s32.totalorder %v5646_v17, 10  ;;  %vm5668_vm2 = vcmp.eq.s32.totalorder %v5646_v17, 10 }
 0x3cd   :  { %6462 = vmatpush3.bf16.msra.mxu1 %v7508_v18 }
 0x3ce   :  { %6463 = vmatprep.subr.bf16.mxu1 %v7509_v8 }
 0x3d1   :  { %6464 = vmatpush3.bf16.msra.mxu1 %v7510_v46 }
 0x3d2   :  { %6465 = vmatprep.subr.bf16.mxu1 %v7511_v40  ;;  %v5659_v40 = vld [vmem:[%s7984_s1] sm:$0xff] }
 0x3d5   :  { %6466 = vmatpush3.bf16.msra.mxu1 %v7512_v12 }
 0x3d6   :  { %6467 = vmatprep.subr.bf16.mxu1 %v7513_v47 }
 0x3d9   :  { %6468 = vmatpush3.bf16.msra.mxu1 %v7514_v21 }
 0x3da   :  { %6469 = vmatprep.subr.bf16.mxu1 %v7515_v31 }
 0x3dd   :  { %6470 = vmatpush3.bf16.msra.mxu1 %v7516_v23 }
 0x3df   :  { %v5082_v10 = vpop.f32.mrf.mxu0 }
 0x3e0   :  { %v5083_v11 = vadd.f32 %v5082_v10, %v5042_v43 }
 0x3e1   :  { %v5084_v37 = vpop.f32.mrf.mxu0 }
 0x3e2   :  { %v5085_v22 = vadd.f32 %v5084_v37, %v5044_v6  ;;  %v3841_v6 = vrot.slane %v7909_v33, %v7757_v19 }
 0x3e3   :  { %v5086_v30 = vpop.f32.mrf.mxu0 }
 0x3e5   :  { %v5087_v51 = vpop.f32.mrf.mxu0 }
 0x400   :  { %v5123_v13 = vpop.f32.mrf.mxu1 }
 0x401   :  { %v5124_v14 = vadd.f32 %v5123_v13, %v5083_v11 }
 0x402   :  { %v5125_v16 = vpop.f32.mrf.mxu1 }
 0x403   :  { %v5126_v20 = vadd.f32 %v5125_v16, %v5085_v22  ;;  %v5294_v26 = vmax.f32 %v5124_v14, 0.0 }
 0x404   :  { %v5127_v27 = vpop.f32.mrf.mxu1 }
 0x405   :  { %v5295_v28 = vmax.f32 %v5126_v20, 0.0  ;;  %v5298_v32 = vpack.c.bf16 %v5294_v26, %v5294_v26 }
 0x406   :  { %v5128_v36 = vpop.f32.mrf.mxu1 }
 0x407   :  { %v5299_v24 = vpack.c.bf16 %v5295_v28, %v5295_v28 }
 0x409   :  { %5597 = vmatprep.mubr.bf16.mxu0 %v5299_v24 }
 0x40a   :  { %5598 = vmatmul.mubr.bf16.vlgmr.msra.gmra.mxu0 %v5298_v32 }
 0x41f   :  { %v5205_v34 = vpop.f32.mrf.mxu0 }
 0x421   :  { %v5207_v52 = vpop.f32.mrf.mxu0 }
 0x423   :  { %v5209_v9 = vpop.f32.mrf.mxu0 }
 0x425   :  { %v5210_v5 = vpop.f32.mrf.mxu0 }
 0x43f   :  { %v5287_v35 = vpop.f32.mrf.mxu0 }
 0x440   :  { %v5164_v38 = vpop.f32.mrf.mxu1 }
 0x441   :  { %v5289_v4 = vpop.f32.mrf.mxu0  ;;  %v5165_v41 = vadd.f32 %v5164_v38, %v3837_v44 }
 0x442   :  { %v5166_v0 = vpop.f32.mrf.mxu1 }
 0x443   :  { %v5291_v39 = vpop.f32.mrf.mxu0  ;;  %v5167_v54 = vadd.f32 %v5166_v0, %v3841_v6  ;;  %v5206_v7 = vadd.f32 %v5205_v34, %v5165_v41 }
 0x444   :  { %v5168_v42 = vpop.f32.mrf.mxu1 }
 0x445   :  { %v5292_v43 = vpop.f32.mrf.mxu0  ;;  %v5208_v50 = vadd.f32 %v5207_v52, %v5167_v54 }
 0x446   :  { %v5169_v55 = vpop.f32.mrf.mxu1 }
 0x480   :  { %v5246_v49 = vpop.f32.mrf.mxu1 }
 0x481   :  { %v5247_v29 = vadd.f32 %v5246_v49, %v5206_v7 }
 0x482   :  { %v5248_v53 = vpop.f32.mrf.mxu1 }
 0x483   :  { %v5288_v56 = vadd.f32 %v5287_v35, %v5247_v29  ;;  %v5249_v25 = vadd.f32 %v5248_v53, %v5208_v50 }
 0x484   :  { %v5250_v57 = vpop.f32.mrf.mxu1 }
 0x485   :  { %v5290_v58 = vadd.f32 %v5289_v4, %v5249_v25  ;;  %v5296_v59 = vmax.f32 %v5288_v56, 0.0 }
 0x486   :  { %v5251_v60 = vpop.f32.mrf.mxu1 }
 0x487   :  { %v5297_v61 = vmax.f32 %v5290_v58, 0.0  ;;  %v5300_v63 = vpack.c.bf16 %v5296_v59, %v5296_v59 }
 0x489   :  { %v5301_v62 = vpack.c.bf16 %v5297_v61, %v5297_v61 }
 0x48b   :  { %5637 = vmatprep.mubr.bf16.mxu1 %v5301_v62 }
 0x48c   :  { %5638 = vmatmul.mubr.bf16.vlgmr.msra.gmra.mxu1 %v5300_v63 }
 0x4ca   :  { %v6449_v15 = vpop.f32.mrf.mxu0 }
 0x4cc   :  { %v6450_v19 = vpop.f32.mrf.mxu0 }
 0x4cd   :  { %v6451_v33 = vadd.f32 %v6450_v19, %v6449_v15 }
 0x4ce   :  { %v6452_v1 = vpop.f32.mrf.mxu0 }
 0x4cf   :  { %v5600_v8 = vadd.f32 %v6451_v33, %v6356_v45 }
 0x4d0   :  { %v6453_v2 = vpop.f32.mrf.mxu0 }
 0x54c   :  { %v6471_v48 = vpop.f32.mrf.mxu1 }
 0x54e   :  { %v6472_v18 = vpop.f32.mrf.mxu1 }
 0x54f   :  { %v6473_v46 = vadd.f32 %v6472_v18, %v6471_v48 }
 0x550   :  { %v6474_v10 = vpop.f32.mrf.mxu1 }
 0x551   :  { %v5640_v37 = vadd.f32 %v6473_v46, %v5600_v8 }
 0x552   :  { %v6475_v30 = vpop.f32.mrf.mxu1 }
 0x553   :  { %v5648_v51 = vsel %vm5647_vm0, %v5640_v37, -1e+30 }
 0x554   :  { %5649 = vmax.xlane.f32.xlu0 %v5648_v51 }
 0x56a   :  { %5661 = vperm.xlu0 %6485, %v5659_v40  }
 0x5dd   :  { %v5650_v11 = vpop.xlane.xlu0 %5649 }
 0x5de   :  { %v5651_v12 = vsub.f32 %v5648_v51, %v5650_v11 }
 0x5e0   :  { %v5652_v13 = vmul.f32 1.442695, %v5651_v12 }
 0x5e2   :  { %7517 = vpow2.f32 %v5652_v13 }
 0x5e5   :  { %v5662_v22 = vpop.permute.xlu0 %5661 }
 0x5e6   :  { %vm5663_vm1 = vcmp.eq.s32.totalorder %v5646_v17, %v5662_v22 }
 0x5e7   :  { %v5664_v14 = vsel %vm5663_vm1, %v5640_v37, 0.0 }
 0x5ef   :  { %v7518_v3 = vpop.eup %7517 }
 0x5f0   :  { %5654 = vadd.xlane.f32.xlu1 %v7518_v3 }
 0x5f4   :  { %5665 = vadd.xlane.f32.xlu1 %v5664_v14 }
 0x679   :  { %v5655_v16 = vpop.xlane.xlu1 %5654 }
 0x67a   :  { %7519 = vlog2.f32 %v5655_v16 }
 0x67d   :  { %v5666_v26 = vpop.xlane.xlu1 %5665 }
 0x687   :  { %v7520_v47 = vpop.eup %7519 }
 0x688   :  { %v5657_v20 = vmul.f32 0.6931472, %v7520_v47 }
 0x68a   :  { %v5658_v21 = vadd.f32 %v5657_v20, %v5650_v11 }
 0x68c   :  { %v5667_v27 = vsub.f32 %v5658_v21, %v5666_v26 }
 0x68e   :  { %v5669_v28 = vsel %vm5668_vm2, %v5667_v27, %v5640_v37 }
 0x68f   :  { %5670 = vst [vmem:[%s7993_s10] sm:$0xff] %v5669_v28 }
 0x690   :  { %5675 = vsyncpa [#allocation3], 1 }
 0x691   :  { %5676 = vsyncpa [#allocation5], 1 }

</bundles_post_ra>
